<compile_context>
chip_gen: v5e
topology: v5e:2x2
jax: 0.10.0
libtpu: 0.0.40
codegen_flags: <defaults>
</compile_context>

<pallas_src>
import jax
import jax.numpy as jnp
from jax.experimental import pallas as pl
from jax.experimental.pallas import tpu as pltpu


_KP_ORDER = ("s1", "r1", "b1", "s2", "r2", "b2",
             "s3", "r3", "b3", "s4", "r4", "b4", "w5")


# ----------------------------- Pallas kernel ---------------------------------

def _discriminator_kernel(x_ref,
                          s1_ref, r1_ref, b1_ref,
                          s2_ref, r2_ref, b2_ref,
                          s3_ref, r3_ref, b3_ref,
                          s4_ref, r4_ref, b4_ref,
                          w5_ref,
                          o_ref):
    """Entire Discriminator forward for one image (grid axis = batch)."""
    a = x_ref[0]                                        # (H, W*C) bf16

    def conv_bn_lrelu(a, s_ref, r_ref, b_ref):
        # Stride-2 4x4 conv (+ folded eval-BN + LeakyReLU(0.2)) as 8 GEMMs.
        acc = None
        for kh in range(4):
            rows = jnp.dot(s_ref[kh], a,                # select rows 2*ho+kh-1
                           preferred_element_type=jnp.float32)
            part = jnp.dot(rows.astype(jnp.bfloat16), r_ref[kh],
                           preferred_element_type=jnp.float32)
            acc = part if acc is None else acc + part
        y = acc + b_ref[...]                            # (Ho, Wo*O) f32
        y = jnp.where(y >= 0.0, y, 0.2 * y)             # LeakyReLU(0.2)
        return y.astype(jnp.bfloat16)                   # next layer's bf16 lhs

    a = conv_bn_lrelu(a, s1_ref, r1_ref, b1_ref)        # (32, 32*nc)
    a = conv_bn_lrelu(a, s2_ref, r2_ref, b2_ref)        # (16, 16*2nc)
    a = conv_bn_lrelu(a, s3_ref, r3_ref, b3_ref)        # (8,  8*4nc)
    a = conv_bn_lrelu(a, s4_ref, r4_ref, b4_ref)        # (4,  4*8nc)

    # conv5 (4x4 valid, stride 1 -> 1x1, single output channel) + sigmoid,
    # fused as an elementwise-dot epilogue on the resident activation.
    prod = a.astype(jnp.float32) * w5_ref[...]          # (4, 4*8nc)
    v = jnp.sum(jnp.sum(prod, axis=1, keepdims=True), axis=0, keepdims=True)
    o_ref[0] = 1.0 / (1.0 + jnp.exp(-v))                # (1, 1)


# ------------------------------ wrapper ---------------------------------------

def _const_spec(arr):
    if arr.ndim == 3:
        return pl.BlockSpec(arr.shape, lambda n: (0, 0, 0))
    return pl.BlockSpec(arr.shape, lambda n: (0, 0))


def discriminator_forward(kparams, x_nchw):
    """Eval-mode forward. BN uses running stats; Dropout(p=0.2) is identity."""
    # TODO(synk): training-mode BatchNorm (batch statistics) and stochastic
    #             Dropout masks are not implemented (eval semantics only).
    N, C, H, W = x_nchw.shape
    x_rows = jnp.transpose(x_nchw, (0, 2, 3, 1)).reshape(N, H, W * C)
    x_rows = x_rows.astype(jnp.bfloat16)
    consts = [kparams[k] for k in _KP_ORDER]

    out = pl.pallas_call(
        _discriminator_kernel,
        out_shape=jax.ShapeDtypeStruct((N, 1, 1), jnp.float32),
        grid_spec=pltpu.PrefetchScalarGridSpec(
            num_scalar_prefetch=0,
            grid=(N,),
            in_specs=[pl.BlockSpec((1, H, W * C), lambda n: (n, 0, 0))]
                     + [_const_spec(c) for c in consts],
            out_specs=pl.BlockSpec((1, 1, 1), lambda n: (n, 0, 0)),
        ),
        compiler_params=pltpu.CompilerParams(
            dimension_semantics=("parallel",)),
    )(x_rows, *consts)
    return out.reshape(N, 1, 1, 1)


# ------------------ parameter preparation (trace-time folding) ----------------

def _make_row_select(h_out, h_in):
    # S[kh, ho, h] = 1  iff  h == 2*ho + kh - 1   (pad=1 folded in: rows that
    # fall into the zero padding simply have no match -> all-zero row).
    kh = jnp.arange(4)[:, None, None]
    ho = jnp.arange(h_out)[None, :, None]
    h = jnp.arange(h_in)[None, None, :]
    return (h == 2 * ho + kh - 1).astype(jnp.bfloat16)


def _make_col_weight(w_oihw, scale, w_in, w_out):
    # R[kh, w*C + c, wo*O + o] = scale[o] * w[o, c, kh, kw],  kw = w - 2*wo + 1,
    # zero whenever kw falls outside the 4-tap window (pad=1 folded in).
    o_dim, c_dim, k_h, k_w = w_oihw.shape
    w_idx = jnp.arange(w_in)[:, None]
    wo_idx = jnp.arange(w_out)[None, :]
    kw = w_idx - 2 * wo_idx + 1                          # (w_in, w_out)
    valid = ((kw >= 0) & (kw < k_w)).astype(w_oihw.dtype)
    kw_c = jnp.clip(kw, 0, k_w - 1)
    gath = w_oihw[:, :, :, kw_c]                         # (O, C, KH, w_in, w_out)
    gath = gath * valid[None, None, None, :, :]
    gath = gath * scale[:, None, None, None, None]
    gath = jnp.transpose(gath, (2, 3, 1, 4, 0))          # (KH, w_in, C, w_out, O)
    return gath.reshape(k_h, w_in * c_dim, w_out * o_dim).astype(jnp.bfloat16)


def prepare_discriminator_params(params, image_hw=64, eps=1e-5):
    """Fold eval-mode BN, reorder conv weights and build the row-select /
    kw-window matrices consumed by the fused kernel.  Call once, reuse."""
    assert image_hw == 64, "final 4x4 valid conv expects a 64x64 input"
    kp = {}
    h_in = image_hw
    for idx in range(1, 5):
        w_oihw = params[f"w{idx}"]
        o_dim = w_oihw.shape[0]
        h_out = h_in // 2
        if idx == 1:                                     # first conv: no BN
            scale = jnp.ones((o_dim,), jnp.float32)
            bias = jnp.zeros((o_dim,), jnp.float32)
        else:                                            # eval-mode BN fold
            scale = params[f"bn{idx}_gamma"] / jnp.sqrt(params[f"bn{idx}_var"] + eps)
            bias = params[f"bn{idx}_beta"] - params[f"bn{idx}_mean"] * scale
        kp[f"s{idx}"] = _make_row_select(h_out, h_in)
        kp[f"r{idx}"] = _make_col_weight(w_oihw, scale, h_in, h_out)
        kp[f"b{idx}"] = jnp.tile(bias, h_out).reshape(1, h_out * o_dim).astype(jnp.float32)
        h_in = h_out
    # conv5: (1, 8nc, 4, 4) -> map aligned with the (4, 4*8nc) activation layout.
    w5 = params["w5"][0]                                 # (8nc, 4, 4)
    kp["w5"] = jnp.transpose(w5, (1, 2, 0)).reshape(4, 4 * w5.shape[0]).astype(jnp.float32)
    return kp


# ------------------------- Discriminator parameters ---------------------------

def init_discriminator_params(key, nc=8):
    ks = jax.random.split(key, 5)

    def w(k, o, c):
        std = 1.0 / (c * 16) ** 0.5                      # ~ PyTorch default scale
        return (std * jax.random.normal(k, (o, c, 4, 4))).astype(jnp.float32)

    params = {
        "w1": w(ks[0], nc, 3),
        "w2": w(ks[1], nc * 2, nc),
        "w3": w(ks[2], nc * 4, nc * 2),
        "w4": w(ks[3], nc * 8, nc * 4),
        "w5": w(ks[4], 1, nc * 8),
    }
    # BatchNorm2d default init: gamma=1, beta=0, running_mean=0, running_var=1.
    for i, c in zip((2, 3, 4), (nc * 2, nc * 4, nc * 8)):
        params[f"bn{i}_gamma"] = jnp.ones((c,), jnp.float32)
        params[f"bn{i}_beta"] = jnp.zeros((c,), jnp.float32)
        params[f"bn{i}_mean"] = jnp.zeros((c,), jnp.float32)
        params[f"bn{i}_var"] = jnp.ones((c,), jnp.float32)
    return params


# ------------------------- pure-JAX reference (check) -------------------------

def _ref_forward(params, x_nchw, eps=1e-5):
    def conv(x, w, stride, pad):
        return jax.lax.conv_general_dilated(
            x, w, (stride, stride), [(pad, pad), (pad, pad)],
            dimension_numbers=("NCHW", "OIHW", "NCHW"),
            precision=jax.lax.Precision.HIGHEST)

    def lrelu(x):
        return jnp.where(x >= 0, x, 0.2 * x)

    def bn(x, i):
        s = params[f"bn{i}_gamma"] / jnp.sqrt(params[f"bn{i}_var"] + eps)
        b = params[f"bn{i}_beta"] - params[f"bn{i}_mean"] * s
        return x * s.reshape(1, -1, 1, 1) + b.reshape(1, -1, 1, 1)

    x = lrelu(conv(x_nchw, params["w1"], 2, 1))
    x = lrelu(bn(conv(x, params["w2"], 2, 1), 2))
    x = lrelu(bn(conv(x, params["w3"], 2, 1), 3))
    x = lrelu(bn(conv(x, params["w4"], 2, 1), 4))
    return jax.nn.sigmoid(conv(x, params["w5"], 1, 0))


# ---------------------------------- main ---------------------------------------

if __name__ == "__main__":
    nc = 8                                   # small nc for a compact test
    key = jax.random.PRNGKey(0)
    k_params, k_x = jax.random.split(key)

    params = init_discriminator_params(k_params, nc=nc)
    # Input must be 64x64 spatially so the final 4x4 valid conv yields 1x1.
    x = jax.random.normal(k_x, (2, 3, 64, 64), dtype=jnp.float32)  # NCHW

    kparams = prepare_discriminator_params(params)        # one-time folding
    fwd = jax.jit(discriminator_forward)
    out = jax.block_until_ready(fwd(kparams, x))
    assert out.shape == (2, 1, 1, 1), out.shape

    ref = jax.block_until_ready(_ref_forward(params, x))
    assert jnp.allclose(out, ref, rtol=1e-2, atol=1e-2), (
        float(jnp.max(jnp.abs(out - ref))))

    print("KERNEL_OK")
</pallas_src>

<mosaic_0001>
module attributes {stable_mosaic.version = 11 : i64} {
  func.func @_discriminator_kernel(%arg0: i32, %arg1: memref<1x64x192xbf16, #tpu.memory_space<vmem>>, %arg2: memref<4x32x64xbf16, #tpu.memory_space<vmem>>, %arg3: memref<4x192x256xbf16, #tpu.memory_space<vmem>>, %arg4: memref<1x256xf32, #tpu.memory_space<vmem>>, %arg5: memref<4x16x32xbf16, #tpu.memory_space<vmem>>, %arg6: memref<4x256x256xbf16, #tpu.memory_space<vmem>>, %arg7: memref<1x256xf32, #tpu.memory_space<vmem>>, %arg8: memref<4x8x16xbf16, #tpu.memory_space<vmem>>, %arg9: memref<4x256x256xbf16, #tpu.memory_space<vmem>>, %arg10: memref<1x256xf32, #tpu.memory_space<vmem>>, %arg11: memref<4x4x8xbf16, #tpu.memory_space<vmem>>, %arg12: memref<4x256x256xbf16, #tpu.memory_space<vmem>>, %arg13: memref<1x256xf32, #tpu.memory_space<vmem>>, %arg14: memref<4x256xf32, #tpu.memory_space<vmem>>, %arg15: memref<1x1x1xf32, #tpu.memory_space<vmem>>) attributes {dimension_semantics = [#tpu.dimension_semantics<parallel>], iteration_bounds = array<i64: 2>, scalar_prefetch = 0 : i64, scratch_operands = 0 : i64, tpu.core_type = #tpu.core_type<tc>, window_params = [{transform_indices = @transform_0, window_bounds = array<i64: 1, 64, 192>}, {pipeline_mode = #tpu.pipeline_mode<synchronous>, transform_indices = @transform_1, window_bounds = array<i64: 4, 32, 64>}, {pipeline_mode = #tpu.pipeline_mode<synchronous>, transform_indices = @transform_2, window_bounds = array<i64: 4, 192, 256>}, {pipeline_mode = #tpu.pipeline_mode<synchronous>, transform_indices = @transform_3, window_bounds = array<i64: 1, 256>}, {pipeline_mode = #tpu.pipeline_mode<synchronous>, transform_indices = @transform_4, window_bounds = array<i64: 4, 16, 32>}, {pipeline_mode = #tpu.pipeline_mode<synchronous>, transform_indices = @transform_5, window_bounds = array<i64: 4, 256, 256>}, {pipeline_mode = #tpu.pipeline_mode<synchronous>, transform_indices = @transform_6, window_bounds = array<i64: 1, 256>}, {pipeline_mode = #tpu.pipeline_mode<synchronous>, transform_indices = @transform_7, window_bounds = array<i64: 4, 8, 16>}, {pipeline_mode = #tpu.pipeline_mode<synchronous>, transform_indices = @transform_8, window_bounds = array<i64: 4, 256, 256>}, {pipeline_mode = #tpu.pipeline_mode<synchronous>, transform_indices = @transform_9, window_bounds = array<i64: 1, 256>}, {pipeline_mode = #tpu.pipeline_mode<synchronous>, transform_indices = @transform_10, window_bounds = array<i64: 4, 4, 8>}, {pipeline_mode = #tpu.pipeline_mode<synchronous>, transform_indices = @transform_11, window_bounds = array<i64: 4, 256, 256>}, {pipeline_mode = #tpu.pipeline_mode<synchronous>, transform_indices = @transform_12, window_bounds = array<i64: 1, 256>}, {pipeline_mode = #tpu.pipeline_mode<synchronous>, transform_indices = @transform_13, window_bounds = array<i64: 4, 256>}, {transform_indices = @transform_14, window_bounds = array<i64: 1, 1, 1>}]} {
    %c0 = arith.constant 0 : index
    %c0_0 = arith.constant 0 : index
    %c0_1 = arith.constant 0 : index
    %0 = vector.load %arg1[%c0, %c0_0, %c0_1] : memref<1x64x192xbf16, #tpu.memory_space<vmem>>, vector<1x64x192xbf16>
    %1 = vector.shape_cast %0 : vector<1x64x192xbf16> to vector<64x192xbf16>
    %c0_2 = arith.constant 0 : index
    %c0_3 = arith.constant 0 : index
    %c0_4 = arith.constant 0 : index
    %2 = vector.load %arg2[%c0_2, %c0_3, %c0_4] : memref<4x32x64xbf16, #tpu.memory_space<vmem>>, vector<1x32x64xbf16>
    %3 = vector.shape_cast %2 : vector<1x32x64xbf16> to vector<32x64xbf16>
    %cst = arith.constant dense<0.000000e+00> : vector<32x192xf32>
    %4 = tpu.matmul %3, %1, %cst {dimension_numbers = #tpu.dot_dimension_numbers<[1], [0], [0], [1], [0, 0, 1, 1], [], []>} : vector<32x64xbf16>, vector<64x192xbf16>, vector<32x192xf32> -> vector<32x192xf32>
    %5 = arith.truncf %4 : vector<32x192xf32> to vector<32x192xbf16>
    %c0_5 = arith.constant 0 : index
    %c0_6 = arith.constant 0 : index
    %c0_7 = arith.constant 0 : index
    %6 = vector.load %arg3[%c0_5, %c0_6, %c0_7] : memref<4x192x256xbf16, #tpu.memory_space<vmem>>, vector<1x192x256xbf16>
    %7 = vector.shape_cast %6 : vector<1x192x256xbf16> to vector<192x256xbf16>
    %cst_8 = arith.constant dense<0.000000e+00> : vector<32x256xf32>
    %8 = tpu.matmul %5, %7, %cst_8 {dimension_numbers = #tpu.dot_dimension_numbers<[1], [0], [0], [1], [0, 0, 1, 1], [], []>} : vector<32x192xbf16>, vector<192x256xbf16>, vector<32x256xf32> -> vector<32x256xf32>
    %c1 = arith.constant 1 : index
    %c0_9 = arith.constant 0 : index
    %c0_10 = arith.constant 0 : index
    %9 = vector.load %arg2[%c1, %c0_9, %c0_10] : memref<4x32x64xbf16, #tpu.memory_space<vmem>>, vector<1x32x64xbf16>
    %10 = vector.shape_cast %9 : vector<1x32x64xbf16> to vector<32x64xbf16>
    %cst_11 = arith.constant dense<0.000000e+00> : vector<32x192xf32>
    %11 = tpu.matmul %10, %1, %cst_11 {dimension_numbers = #tpu.dot_dimension_numbers<[1], [0], [0], [1], [0, 0, 1, 1], [], []>} : vector<32x64xbf16>, vector<64x192xbf16>, vector<32x192xf32> -> vector<32x192xf32>
    %12 = arith.truncf %11 : vector<32x192xf32> to vector<32x192xbf16>
    %c1_12 = arith.constant 1 : index
    %c0_13 = arith.constant 0 : index
    %c0_14 = arith.constant 0 : index
    %13 = vector.load %arg3[%c1_12, %c0_13, %c0_14] : memref<4x192x256xbf16, #tpu.memory_space<vmem>>, vector<1x192x256xbf16>
    %14 = vector.shape_cast %13 : vector<1x192x256xbf16> to vector<192x256xbf16>
    %cst_15 = arith.constant dense<0.000000e+00> : vector<32x256xf32>
    %15 = tpu.matmul %12, %14, %cst_15 {dimension_numbers = #tpu.dot_dimension_numbers<[1], [0], [0], [1], [0, 0, 1, 1], [], []>} : vector<32x192xbf16>, vector<192x256xbf16>, vector<32x256xf32> -> vector<32x256xf32>
    %16 = arith.addf %8, %15 : vector<32x256xf32>
    %c2 = arith.constant 2 : index
    %c0_16 = arith.constant 0 : index
    %c0_17 = arith.constant 0 : index
    %17 = vector.load %arg2[%c2, %c0_16, %c0_17] : memref<4x32x64xbf16, #tpu.memory_space<vmem>>, vector<1x32x64xbf16>
    %18 = vector.shape_cast %17 : vector<1x32x64xbf16> to vector<32x64xbf16>
    %cst_18 = arith.constant dense<0.000000e+00> : vector<32x192xf32>
    %19 = tpu.matmul %18, %1, %cst_18 {dimension_numbers = #tpu.dot_dimension_numbers<[1], [0], [0], [1], [0, 0, 1, 1], [], []>} : vector<32x64xbf16>, vector<64x192xbf16>, vector<32x192xf32> -> vector<32x192xf32>
    %20 = arith.truncf %19 : vector<32x192xf32> to vector<32x192xbf16>
    %c2_19 = arith.constant 2 : index
    %c0_20 = arith.constant 0 : index
    %c0_21 = arith.constant 0 : index
    %21 = vector.load %arg3[%c2_19, %c0_20, %c0_21] : memref<4x192x256xbf16, #tpu.memory_space<vmem>>, vector<1x192x256xbf16>
    %22 = vector.shape_cast %21 : vector<1x192x256xbf16> to vector<192x256xbf16>
    %cst_22 = arith.constant dense<0.000000e+00> : vector<32x256xf32>
    %23 = tpu.matmul %20, %22, %cst_22 {dimension_numbers = #tpu.dot_dimension_numbers<[1], [0], [0], [1], [0, 0, 1, 1], [], []>} : vector<32x192xbf16>, vector<192x256xbf16>, vector<32x256xf32> -> vector<32x256xf32>
    %24 = arith.addf %16, %23 : vector<32x256xf32>
    %c3 = arith.constant 3 : index
    %c0_23 = arith.constant 0 : index
    %c0_24 = arith.constant 0 : index
    %25 = vector.load %arg2[%c3, %c0_23, %c0_24] : memref<4x32x64xbf16, #tpu.memory_space<vmem>>, vector<1x32x64xbf16>
    %26 = vector.shape_cast %25 : vector<1x32x64xbf16> to vector<32x64xbf16>
    %cst_25 = arith.constant dense<0.000000e+00> : vector<32x192xf32>
    %27 = tpu.matmul %26, %1, %cst_25 {dimension_numbers = #tpu.dot_dimension_numbers<[1], [0], [0], [1], [0, 0, 1, 1], [], []>} : vector<32x64xbf16>, vector<64x192xbf16>, vector<32x192xf32> -> vector<32x192xf32>
    %28 = arith.truncf %27 : vector<32x192xf32> to vector<32x192xbf16>
    %c3_26 = arith.constant 3 : index
    %c0_27 = arith.constant 0 : index
    %c0_28 = arith.constant 0 : index
    %29 = vector.load %arg3[%c3_26, %c0_27, %c0_28] : memref<4x192x256xbf16, #tpu.memory_space<vmem>>, vector<1x192x256xbf16>
    %30 = vector.shape_cast %29 : vector<1x192x256xbf16> to vector<192x256xbf16>
    %cst_29 = arith.constant dense<0.000000e+00> : vector<32x256xf32>
    %31 = tpu.matmul %28, %30, %cst_29 {dimension_numbers = #tpu.dot_dimension_numbers<[1], [0], [0], [1], [0, 0, 1, 1], [], []>} : vector<32x192xbf16>, vector<192x256xbf16>, vector<32x256xf32> -> vector<32x256xf32>
    %32 = arith.addf %24, %31 : vector<32x256xf32>
    %c0_30 = arith.constant 0 : index
    %c0_31 = arith.constant 0 : index
    %33 = vector.load %arg4[%c0_30, %c0_31] : memref<1x256xf32, #tpu.memory_space<vmem>>, vector<1x256xf32>
    %34 = vector.broadcast %33 : vector<1x256xf32> to vector<32x256xf32>
    %35 = arith.addf %32, %34 : vector<32x256xf32>
    %cst_32 = arith.constant 0.000000e+00 : f32
    %36 = vector.broadcast %cst_32 : f32 to vector<32x256xf32>
    %37 = arith.cmpf oge, %35, %36 : vector<32x256xf32>
    %cst_33 = arith.constant 2.000000e-01 : f32
    %38 = vector.broadcast %cst_33 : f32 to vector<32x256xf32>
    %39 = arith.mulf %38, %35 : vector<32x256xf32>
    %40 = arith.select %37, %35, %39 : vector<32x256xi1>, vector<32x256xf32>
    %41 = arith.truncf %40 : vector<32x256xf32> to vector<32x256xbf16>
    %c0_34 = arith.constant 0 : index
    %c0_35 = arith.constant 0 : index
    %c0_36 = arith.constant 0 : index
    %42 = vector.load %arg5[%c0_34, %c0_35, %c0_36] : memref<4x16x32xbf16, #tpu.memory_space<vmem>>, vector<1x16x32xbf16>
    %43 = vector.shape_cast %42 : vector<1x16x32xbf16> to vector<16x32xbf16>
    %cst_37 = arith.constant dense<0.000000e+00> : vector<16x256xf32>
    %44 = tpu.matmul %43, %41, %cst_37 {dimension_numbers = #tpu.dot_dimension_numbers<[1], [0], [0], [1], [0, 0, 1, 1], [], []>} : vector<16x32xbf16>, vector<32x256xbf16>, vector<16x256xf32> -> vector<16x256xf32>
    %45 = arith.truncf %44 : vector<16x256xf32> to vector<16x256xbf16>
    %c0_38 = arith.constant 0 : index
    %c0_39 = arith.constant 0 : index
    %c0_40 = arith.constant 0 : index
    %46 = vector.load %arg6[%c0_38, %c0_39, %c0_40] : memref<4x256x256xbf16, #tpu.memory_space<vmem>>, vector<1x256x256xbf16>
    %47 = vector.shape_cast %46 : vector<1x256x256xbf16> to vector<256x256xbf16>
    %cst_41 = arith.constant dense<0.000000e+00> : vector<16x256xf32>
    %48 = tpu.matmul %45, %47, %cst_41 {dimension_numbers = #tpu.dot_dimension_numbers<[1], [0], [0], [1], [0, 0, 1, 1], [], []>} : vector<16x256xbf16>, vector<256x256xbf16>, vector<16x256xf32> -> vector<16x256xf32>
    %c1_42 = arith.constant 1 : index
    %c0_43 = arith.constant 0 : index
    %c0_44 = arith.constant 0 : index
    %49 = vector.load %arg5[%c1_42, %c0_43, %c0_44] : memref<4x16x32xbf16, #tpu.memory_space<vmem>>, vector<1x16x32xbf16>
    %50 = vector.shape_cast %49 : vector<1x16x32xbf16> to vector<16x32xbf16>
    %cst_45 = arith.constant dense<0.000000e+00> : vector<16x256xf32>
    %51 = tpu.matmul %50, %41, %cst_45 {dimension_numbers = #tpu.dot_dimension_numbers<[1], [0], [0], [1], [0, 0, 1, 1], [], []>} : vector<16x32xbf16>, vector<32x256xbf16>, vector<16x256xf32> -> vector<16x256xf32>
    %52 = arith.truncf %51 : vector<16x256xf32> to vector<16x256xbf16>
    %c1_46 = arith.constant 1 : index
    %c0_47 = arith.constant 0 : index
    %c0_48 = arith.constant 0 : index
    %53 = vector.load %arg6[%c1_46, %c0_47, %c0_48] : memref<4x256x256xbf16, #tpu.memory_space<vmem>>, vector<1x256x256xbf16>
    %54 = vector.shape_cast %53 : vector<1x256x256xbf16> to vector<256x256xbf16>
    %cst_49 = arith.constant dense<0.000000e+00> : vector<16x256xf32>
    %55 = tpu.matmul %52, %54, %cst_49 {dimension_numbers = #tpu.dot_dimension_numbers<[1], [0], [0], [1], [0, 0, 1, 1], [], []>} : vector<16x256xbf16>, vector<256x256xbf16>, vector<16x256xf32> -> vector<16x256xf32>
    %56 = arith.addf %48, %55 : vector<16x256xf32>
    %c2_50 = arith.constant 2 : index
    %c0_51 = arith.constant 0 : index
    %c0_52 = arith.constant 0 : index
    %57 = vector.load %arg5[%c2_50, %c0_51, %c0_52] : memref<4x16x32xbf16, #tpu.memory_space<vmem>>, vector<1x16x32xbf16>
    %58 = vector.shape_cast %57 : vector<1x16x32xbf16> to vector<16x32xbf16>
    %cst_53 = arith.constant dense<0.000000e+00> : vector<16x256xf32>
    %59 = tpu.matmul %58, %41, %cst_53 {dimension_numbers = #tpu.dot_dimension_numbers<[1], [0], [0], [1], [0, 0, 1, 1], [], []>} : vector<16x32xbf16>, vector<32x256xbf16>, vector<16x256xf32> -> vector<16x256xf32>
    %60 = arith.truncf %59 : vector<16x256xf32> to vector<16x256xbf16>
    %c2_54 = arith.constant 2 : index
    %c0_55 = arith.constant 0 : index
    %c0_56 = arith.constant 0 : index
    %61 = vector.load %arg6[%c2_54, %c0_55, %c0_56] : memref<4x256x256xbf16, #tpu.memory_space<vmem>>, vector<1x256x256xbf16>
    %62 = vector.shape_cast %61 : vector<1x256x256xbf16> to vector<256x256xbf16>
    %cst_57 = arith.constant dense<0.000000e+00> : vector<16x256xf32>
    %63 = tpu.matmul %60, %62, %cst_57 {dimension_numbers = #tpu.dot_dimension_numbers<[1], [0], [0], [1], [0, 0, 1, 1], [], []>} : vector<16x256xbf16>, vector<256x256xbf16>, vector<16x256xf32> -> vector<16x256xf32>
    %64 = arith.addf %56, %63 : vector<16x256xf32>
    %c3_58 = arith.constant 3 : index
    %c0_59 = arith.constant 0 : index
    %c0_60 = arith.constant 0 : index
    %65 = vector.load %arg5[%c3_58, %c0_59, %c0_60] : memref<4x16x32xbf16, #tpu.memory_space<vmem>>, vector<1x16x32xbf16>
    %66 = vector.shape_cast %65 : vector<1x16x32xbf16> to vector<16x32xbf16>
    %cst_61 = arith.constant dense<0.000000e+00> : vector<16x256xf32>
    %67 = tpu.matmul %66, %41, %cst_61 {dimension_numbers = #tpu.dot_dimension_numbers<[1], [0], [0], [1], [0, 0, 1, 1], [], []>} : vector<16x32xbf16>, vector<32x256xbf16>, vector<16x256xf32> -> vector<16x256xf32>
    %68 = arith.truncf %67 : vector<16x256xf32> to vector<16x256xbf16>
    %c3_62 = arith.constant 3 : index
    %c0_63 = arith.constant 0 : index
    %c0_64 = arith.constant 0 : index
    %69 = vector.load %arg6[%c3_62, %c0_63, %c0_64] : memref<4x256x256xbf16, #tpu.memory_space<vmem>>, vector<1x256x256xbf16>
    %70 = vector.shape_cast %69 : vector<1x256x256xbf16> to vector<256x256xbf16>
    %cst_65 = arith.constant dense<0.000000e+00> : vector<16x256xf32>
    %71 = tpu.matmul %68, %70, %cst_65 {dimension_numbers = #tpu.dot_dimension_numbers<[1], [0], [0], [1], [0, 0, 1, 1], [], []>} : vector<16x256xbf16>, vector<256x256xbf16>, vector<16x256xf32> -> vector<16x256xf32>
    %72 = arith.addf %64, %71 : vector<16x256xf32>
    %c0_66 = arith.constant 0 : index
    %c0_67 = arith.constant 0 : index
    %73 = vector.load %arg7[%c0_66, %c0_67] : memref<1x256xf32, #tpu.memory_space<vmem>>, vector<1x256xf32>
    %74 = vector.broadcast %73 : vector<1x256xf32> to vector<16x256xf32>
    %75 = arith.addf %72, %74 : vector<16x256xf32>
    %cst_68 = arith.constant 0.000000e+00 : f32
    %76 = vector.broadcast %cst_68 : f32 to vector<16x256xf32>
    %77 = arith.cmpf oge, %75, %76 : vector<16x256xf32>
    %cst_69 = arith.constant 2.000000e-01 : f32
    %78 = vector.broadcast %cst_69 : f32 to vector<16x256xf32>
    %79 = arith.mulf %78, %75 : vector<16x256xf32>
    %80 = arith.select %77, %75, %79 : vector<16x256xi1>, vector<16x256xf32>
    %81 = arith.truncf %80 : vector<16x256xf32> to vector<16x256xbf16>
    %c0_70 = arith.constant 0 : index
    %c0_71 = arith.constant 0 : index
    %c0_72 = arith.constant 0 : index
    %82 = vector.load %arg8[%c0_70, %c0_71, %c0_72] : memref<4x8x16xbf16, #tpu.memory_space<vmem>>, vector<1x8x16xbf16>
    %83 = vector.shape_cast %82 : vector<1x8x16xbf16> to vector<8x16xbf16>
    %cst_73 = arith.constant dense<0.000000e+00> : vector<8x256xf32>
    %84 = tpu.matmul %83, %81, %cst_73 {dimension_numbers = #tpu.dot_dimension_numbers<[1], [0], [0], [1], [0, 0, 1, 1], [], []>} : vector<8x16xbf16>, vector<16x256xbf16>, vector<8x256xf32> -> vector<8x256xf32>
    %85 = arith.truncf %84 : vector<8x256xf32> to vector<8x256xbf16>
    %c0_74 = arith.constant 0 : index
    %c0_75 = arith.constant 0 : index
    %c0_76 = arith.constant 0 : index
    %86 = vector.load %arg9[%c0_74, %c0_75, %c0_76] : memref<4x256x256xbf16, #tpu.memory_space<vmem>>, vector<1x256x256xbf16>
    %87 = vector.shape_cast %86 : vector<1x256x256xbf16> to vector<256x256xbf16>
    %cst_77 = arith.constant dense<0.000000e+00> : vector<8x256xf32>
    %88 = tpu.matmul %85, %87, %cst_77 {dimension_numbers = #tpu.dot_dimension_numbers<[1], [0], [0], [1], [0, 0, 1, 1], [], []>} : vector<8x256xbf16>, vector<256x256xbf16>, vector<8x256xf32> -> vector<8x256xf32>
    %c1_78 = arith.constant 1 : index
    %c0_79 = arith.constant 0 : index
    %c0_80 = arith.constant 0 : index
    %89 = vector.load %arg8[%c1_78, %c0_79, %c0_80] : memref<4x8x16xbf16, #tpu.memory_space<vmem>>, vector<1x8x16xbf16>
    %90 = vector.shape_cast %89 : vector<1x8x16xbf16> to vector<8x16xbf16>
    %cst_81 = arith.constant dense<0.000000e+00> : vector<8x256xf32>
    %91 = tpu.matmul %90, %81, %cst_81 {dimension_numbers = #tpu.dot_dimension_numbers<[1], [0], [0], [1], [0, 0, 1, 1], [], []>} : vector<8x16xbf16>, vector<16x256xbf16>, vector<8x256xf32> -> vector<8x256xf32>
    %92 = arith.truncf %91 : vector<8x256xf32> to vector<8x256xbf16>
    %c1_82 = arith.constant 1 : index
    %c0_83 = arith.constant 0 : index
    %c0_84 = arith.constant 0 : index
    %93 = vector.load %arg9[%c1_82, %c0_83, %c0_84] : memref<4x256x256xbf16, #tpu.memory_space<vmem>>, vector<1x256x256xbf16>
    %94 = vector.shape_cast %93 : vector<1x256x256xbf16> to vector<256x256xbf16>
    %cst_85 = arith.constant dense<0.000000e+00> : vector<8x256xf32>
    %95 = tpu.matmul %92, %94, %cst_85 {dimension_numbers = #tpu.dot_dimension_numbers<[1], [0], [0], [1], [0, 0, 1, 1], [], []>} : vector<8x256xbf16>, vector<256x256xbf16>, vector<8x256xf32> -> vector<8x256xf32>
    %96 = arith.addf %88, %95 : vector<8x256xf32>
    %c2_86 = arith.constant 2 : index
    %c0_87 = arith.constant 0 : index
    %c0_88 = arith.constant 0 : index
    %97 = vector.load %arg8[%c2_86, %c0_87, %c0_88] : memref<4x8x16xbf16, #tpu.memory_space<vmem>>, vector<1x8x16xbf16>
    %98 = vector.shape_cast %97 : vector<1x8x16xbf16> to vector<8x16xbf16>
    %cst_89 = arith.constant dense<0.000000e+00> : vector<8x256xf32>
    %99 = tpu.matmul %98, %81, %cst_89 {dimension_numbers = #tpu.dot_dimension_numbers<[1], [0], [0], [1], [0, 0, 1, 1], [], []>} : vector<8x16xbf16>, vector<16x256xbf16>, vector<8x256xf32> -> vector<8x256xf32>
    %100 = arith.truncf %99 : vector<8x256xf32> to vector<8x256xbf16>
    %c2_90 = arith.constant 2 : index
    %c0_91 = arith.constant 0 : index
    %c0_92 = arith.constant 0 : index
    %101 = vector.load %arg9[%c2_90, %c0_91, %c0_92] : memref<4x256x256xbf16, #tpu.memory_space<vmem>>, vector<1x256x256xbf16>
    %102 = vector.shape_cast %101 : vector<1x256x256xbf16> to vector<256x256xbf16>
    %cst_93 = arith.constant dense<0.000000e+00> : vector<8x256xf32>
    %103 = tpu.matmul %100, %102, %cst_93 {dimension_numbers = #tpu.dot_dimension_numbers<[1], [0], [0], [1], [0, 0, 1, 1], [], []>} : vector<8x256xbf16>, vector<256x256xbf16>, vector<8x256xf32> -> vector<8x256xf32>
    %104 = arith.addf %96, %103 : vector<8x256xf32>
    %c3_94 = arith.constant 3 : index
    %c0_95 = arith.constant 0 : index
    %c0_96 = arith.constant 0 : index
    %105 = vector.load %arg8[%c3_94, %c0_95, %c0_96] : memref<4x8x16xbf16, #tpu.memory_space<vmem>>, vector<1x8x16xbf16>
    %106 = vector.shape_cast %105 : vector<1x8x16xbf16> to vector<8x16xbf16>
    %cst_97 = arith.constant dense<0.000000e+00> : vector<8x256xf32>
    %107 = tpu.matmul %106, %81, %cst_97 {dimension_numbers = #tpu.dot_dimension_numbers<[1], [0], [0], [1], [0, 0, 1, 1], [], []>} : vector<8x16xbf16>, vector<16x256xbf16>, vector<8x256xf32> -> vector<8x256xf32>
    %108 = arith.truncf %107 : vector<8x256xf32> to vector<8x256xbf16>
    %c3_98 = arith.constant 3 : index
    %c0_99 = arith.constant 0 : index
    %c0_100 = arith.constant 0 : index
    %109 = vector.load %arg9[%c3_98, %c0_99, %c0_100] : memref<4x256x256xbf16, #tpu.memory_space<vmem>>, vector<1x256x256xbf16>
    %110 = vector.shape_cast %109 : vector<1x256x256xbf16> to vector<256x256xbf16>
    %cst_101 = arith.constant dense<0.000000e+00> : vector<8x256xf32>
    %111 = tpu.matmul %108, %110, %cst_101 {dimension_numbers = #tpu.dot_dimension_numbers<[1], [0], [0], [1], [0, 0, 1, 1], [], []>} : vector<8x256xbf16>, vector<256x256xbf16>, vector<8x256xf32> -> vector<8x256xf32>
    %112 = arith.addf %104, %111 : vector<8x256xf32>
    %c0_102 = arith.constant 0 : index
    %c0_103 = arith.constant 0 : index
    %113 = vector.load %arg10[%c0_102, %c0_103] : memref<1x256xf32, #tpu.memory_space<vmem>>, vector<1x256xf32>
    %114 = vector.broadcast %113 : vector<1x256xf32> to vector<8x256xf32>
    %115 = arith.addf %112, %114 : vector<8x256xf32>
    %cst_104 = arith.constant 0.000000e+00 : f32
    %116 = vector.broadcast %cst_104 : f32 to vector<8x256xf32>
    %117 = arith.cmpf oge, %115, %116 : vector<8x256xf32>
    %cst_105 = arith.constant 2.000000e-01 : f32
    %118 = vector.broadcast %cst_105 : f32 to vector<8x256xf32>
    %119 = arith.mulf %118, %115 : vector<8x256xf32>
    %120 = arith.select %117, %115, %119 : vector<8x256xi1>, vector<8x256xf32>
    %121 = arith.truncf %120 : vector<8x256xf32> to vector<8x256xbf16>
    %c0_106 = arith.constant 0 : index
    %c0_107 = arith.constant 0 : index
    %c0_108 = arith.constant 0 : index
    %122 = vector.load %arg11[%c0_106, %c0_107, %c0_108] : memref<4x4x8xbf16, #tpu.memory_space<vmem>>, vector<1x4x8xbf16>
    %123 = vector.shape_cast %122 : vector<1x4x8xbf16> to vector<4x8xbf16>
    %cst_109 = arith.constant dense<0.000000e+00> : vector<4x256xf32>
    %124 = tpu.matmul %123, %121, %cst_109 {dimension_numbers = #tpu.dot_dimension_numbers<[1], [0], [0], [1], [0, 0, 1, 1], [], []>} : vector<4x8xbf16>, vector<8x256xbf16>, vector<4x256xf32> -> vector<4x256xf32>
    %125 = arith.truncf %124 : vector<4x256xf32> to vector<4x256xbf16>
    %c0_110 = arith.constant 0 : index
    %c0_111 = arith.constant 0 : index
    %c0_112 = arith.constant 0 : index
    %126 = vector.load %arg12[%c0_110, %c0_111, %c0_112] : memref<4x256x256xbf16, #tpu.memory_space<vmem>>, vector<1x256x256xbf16>
    %127 = vector.shape_cast %126 : vector<1x256x256xbf16> to vector<256x256xbf16>
    %cst_113 = arith.constant dense<0.000000e+00> : vector<4x256xf32>
    %128 = tpu.matmul %125, %127, %cst_113 {dimension_numbers = #tpu.dot_dimension_numbers<[1], [0], [0], [1], [0, 0, 1, 1], [], []>} : vector<4x256xbf16>, vector<256x256xbf16>, vector<4x256xf32> -> vector<4x256xf32>
    %c1_114 = arith.constant 1 : index
    %c0_115 = arith.constant 0 : index
    %c0_116 = arith.constant 0 : index
    %129 = vector.load %arg11[%c1_114, %c0_115, %c0_116] : memref<4x4x8xbf16, #tpu.memory_space<vmem>>, vector<1x4x8xbf16>
    %130 = vector.shape_cast %129 : vector<1x4x8xbf16> to vector<4x8xbf16>
    %cst_117 = arith.constant dense<0.000000e+00> : vector<4x256xf32>
    %131 = tpu.matmul %130, %121, %cst_117 {dimension_numbers = #tpu.dot_dimension_numbers<[1], [0], [0], [1], [0, 0, 1, 1], [], []>} : vector<4x8xbf16>, vector<8x256xbf16>, vector<4x256xf32> -> vector<4x256xf32>
    %132 = arith.truncf %131 : vector<4x256xf32> to vector<4x256xbf16>
    %c1_118 = arith.constant 1 : index
    %c0_119 = arith.constant 0 : index
    %c0_120 = arith.constant 0 : index
    %133 = vector.load %arg12[%c1_118, %c0_119, %c0_120] : memref<4x256x256xbf16, #tpu.memory_space<vmem>>, vector<1x256x256xbf16>
    %134 = vector.shape_cast %133 : vector<1x256x256xbf16> to vector<256x256xbf16>
    %cst_121 = arith.constant dense<0.000000e+00> : vector<4x256xf32>
    %135 = tpu.matmul %132, %134, %cst_121 {dimension_numbers = #tpu.dot_dimension_numbers<[1], [0], [0], [1], [0, 0, 1, 1], [], []>} : vector<4x256xbf16>, vector<256x256xbf16>, vector<4x256xf32> -> vector<4x256xf32>
    %136 = arith.addf %128, %135 : vector<4x256xf32>
    %c2_122 = arith.constant 2 : index
    %c0_123 = arith.constant 0 : index
    %c0_124 = arith.constant 0 : index
    %137 = vector.load %arg11[%c2_122, %c0_123, %c0_124] : memref<4x4x8xbf16, #tpu.memory_space<vmem>>, vector<1x4x8xbf16>
    %138 = vector.shape_cast %137 : vector<1x4x8xbf16> to vector<4x8xbf16>
    %cst_125 = arith.constant dense<0.000000e+00> : vector<4x256xf32>
    %139 = tpu.matmul %138, %121, %cst_125 {dimension_numbers = #tpu.dot_dimension_numbers<[1], [0], [0], [1], [0, 0, 1, 1], [], []>} : vector<4x8xbf16>, vector<8x256xbf16>, vector<4x256xf32> -> vector<4x256xf32>
    %140 = arith.truncf %139 : vector<4x256xf32> to vector<4x256xbf16>
    %c2_126 = arith.constant 2 : index
    %c0_127 = arith.constant 0 : index
    %c0_128 = arith.constant 0 : index
    %141 = vector.load %arg12[%c2_126, %c0_127, %c0_128] : memref<4x256x256xbf16, #tpu.memory_space<vmem>>, vector<1x256x256xbf16>
    %142 = vector.shape_cast %141 : vector<1x256x256xbf16> to vector<256x256xbf16>
    %cst_129 = arith.constant dense<0.000000e+00> : vector<4x256xf32>
    %143 = tpu.matmul %140, %142, %cst_129 {dimension_numbers = #tpu.dot_dimension_numbers<[1], [0], [0], [1], [0, 0, 1, 1], [], []>} : vector<4x256xbf16>, vector<256x256xbf16>, vector<4x256xf32> -> vector<4x256xf32>
    %144 = arith.addf %136, %143 : vector<4x256xf32>
    %c3_130 = arith.constant 3 : index
    %c0_131 = arith.constant 0 : index
    %c0_132 = arith.constant 0 : index
    %145 = vector.load %arg11[%c3_130, %c0_131, %c0_132] : memref<4x4x8xbf16, #tpu.memory_space<vmem>>, vector<1x4x8xbf16>
    %146 = vector.shape_cast %145 : vector<1x4x8xbf16> to vector<4x8xbf16>
    %cst_133 = arith.constant dense<0.000000e+00> : vector<4x256xf32>
    %147 = tpu.matmul %146, %121, %cst_133 {dimension_numbers = #tpu.dot_dimension_numbers<[1], [0], [0], [1], [0, 0, 1, 1], [], []>} : vector<4x8xbf16>, vector<8x256xbf16>, vector<4x256xf32> -> vector<4x256xf32>
    %148 = arith.truncf %147 : vector<4x256xf32> to vector<4x256xbf16>
    %c3_134 = arith.constant 3 : index
    %c0_135 = arith.constant 0 : index
    %c0_136 = arith.constant 0 : index
    %149 = vector.load %arg12[%c3_134, %c0_135, %c0_136] : memref<4x256x256xbf16, #tpu.memory_space<vmem>>, vector<1x256x256xbf16>
    %150 = vector.shape_cast %149 : vector<1x256x256xbf16> to vector<256x256xbf16>
    %cst_137 = arith.constant dense<0.000000e+00> : vector<4x256xf32>
    %151 = tpu.matmul %148, %150, %cst_137 {dimension_numbers = #tpu.dot_dimension_numbers<[1], [0], [0], [1], [0, 0, 1, 1], [], []>} : vector<4x256xbf16>, vector<256x256xbf16>, vector<4x256xf32> -> vector<4x256xf32>
    %152 = arith.addf %144, %151 : vector<4x256xf32>
    %c0_138 = arith.constant 0 : index
    %c0_139 = arith.constant 0 : index
    %153 = vector.load %arg13[%c0_138, %c0_139] : memref<1x256xf32, #tpu.memory_space<vmem>>, vector<1x256xf32>
    %154 = vector.broadcast %153 : vector<1x256xf32> to vector<4x256xf32>
    %155 = arith.addf %152, %154 : vector<4x256xf32>
    %cst_140 = arith.constant 0.000000e+00 : f32
    %156 = vector.broadcast %cst_140 : f32 to vector<4x256xf32>
    %157 = arith.cmpf oge, %155, %156 : vector<4x256xf32>
    %cst_141 = arith.constant 2.000000e-01 : f32
    %158 = vector.broadcast %cst_141 : f32 to vector<4x256xf32>
    %159 = arith.mulf %158, %155 : vector<4x256xf32>
    %160 = arith.select %157, %155, %159 : vector<4x256xi1>, vector<4x256xf32>
    %161 = arith.truncf %160 : vector<4x256xf32> to vector<4x256xbf16>
    %162 = arith.extf %161 : vector<4x256xbf16> to vector<4x256xf32>
    %c0_142 = arith.constant 0 : index
    %c0_143 = arith.constant 0 : index
    %163 = vector.load %arg14[%c0_142, %c0_143] : memref<4x256xf32, #tpu.memory_space<vmem>>, vector<4x256xf32>
    %164 = arith.mulf %162, %163 : vector<4x256xf32>
    %cst_144 = arith.constant dense<0.000000e+00> : vector<4xf32>
    %165 = vector.multi_reduction <add>, %164, %cst_144 [1] : vector<4x256xf32> to vector<4xf32>
    %166 = vector.shape_cast %165 : vector<4xf32> to vector<4x1xf32>
    %cst_145 = arith.constant dense<0.000000e+00> : vector<1xf32>
    %167 = vector.multi_reduction <add>, %166, %cst_145 [0] : vector<4x1xf32> to vector<1xf32>
    %168 = vector.shape_cast %167 : vector<1xf32> to vector<1x1xf32>
    %cst_146 = arith.constant 0.000000e+00 : f32
    %169 = vector.broadcast %cst_146 : f32 to vector<1x1xf32>
    %170 = arith.subf %169, %168 : vector<1x1xf32>
    %171 = math.exp %170 : vector<1x1xf32>
    %cst_147 = arith.constant 1.000000e+00 : f32
    %172 = vector.broadcast %cst_147 : f32 to vector<1x1xf32>
    %173 = arith.addf %172, %171 : vector<1x1xf32>
    %cst_148 = arith.constant 1.000000e+00 : f32
    %174 = vector.broadcast %cst_148 : f32 to vector<1x1xf32>
    %175 = arith.divf %174, %173 : vector<1x1xf32>
    %c0_149 = arith.constant 0 : index
    %c0_150 = arith.constant 0 : index
    %c0_151 = arith.constant 0 : index
    %176 = vector.load %arg15[%c0_149, %c0_150, %c0_151] : memref<1x1x1xf32, #tpu.memory_space<vmem>>, vector<1x1x1xf32>
    %177 = vector.shape_cast %176 : vector<1x1x1xf32> to vector<1x1xf32>
    %178 = vector.shape_cast %175 : vector<1x1xf32> to vector<1x1x1xf32>
    tpu.vector_store %arg15[%c0_149, %c0_150, %c0_151], %178 {strides = array<i32>} : memref<1x1x1xf32, #tpu.memory_space<vmem>>, vector<1x1x1xf32>,
    return
  }
  func.func @transform_0(%arg0: i32) -> (i32, i32, i32) {
    %c0_i32 = arith.constant 0 : i32
    %c0_i32_0 = arith.constant 0 : i32
    %c0_i32_1 = arith.constant 0 : i32
    return %arg0, %c0_i32, %c0_i32_0 : i32, i32, i32
  }
  func.func @transform_1(%arg0: i32) -> (i32, i32, i32) {
    %c0_i32 = arith.constant 0 : i32
    %c0_i32_0 = arith.constant 0 : i32
    %c0_i32_1 = arith.constant 0 : i32
    %c0_i32_2 = arith.constant 0 : i32
    return %c0_i32, %c0_i32_0, %c0_i32_1 : i32, i32, i32
  }
  func.func @transform_2(%arg0: i32) -> (i32, i32, i32) {
    %c0_i32 = arith.constant 0 : i32
    %c0_i32_0 = arith.constant 0 : i32
    %c0_i32_1 = arith.constant 0 : i32
    %c0_i32_2 = arith.constant 0 : i32
    return %c0_i32, %c0_i32_0, %c0_i32_1 : i32, i32, i32
  }
  func.func @transform_3(%arg0: i32) -> (i32, i32) {
    %c0_i32 = arith.constant 0 : i32
    %c0_i32_0 = arith.constant 0 : i32
    %c0_i32_1 = arith.constant 0 : i32
    return %c0_i32, %c0_i32_0 : i32, i32
  }
  func.func @transform_4(%arg0: i32) -> (i32, i32, i32) {
    %c0_i32 = arith.constant 0 : i32
    %c0_i32_0 = arith.constant 0 : i32
    %c0_i32_1 = arith.constant 0 : i32
    %c0_i32_2 = arith.constant 0 : i32
    return %c0_i32, %c0_i32_0, %c0_i32_1 : i32, i32, i32
  }
  func.func @transform_5(%arg0: i32) -> (i32, i32, i32) {
    %c0_i32 = arith.constant 0 : i32
    %c0_i32_0 = arith.constant 0 : i32
    %c0_i32_1 = arith.constant 0 : i32
    %c0_i32_2 = arith.constant 0 : i32
    return %c0_i32, %c0_i32_0, %c0_i32_1 : i32, i32, i32
  }
  func.func @transform_6(%arg0: i32) -> (i32, i32) {
    %c0_i32 = arith.constant 0 : i32
    %c0_i32_0 = arith.constant 0 : i32
    %c0_i32_1 = arith.constant 0 : i32
    return %c0_i32, %c0_i32_0 : i32, i32
  }
  func.func @transform_7(%arg0: i32) -> (i32, i32, i32) {
    %c0_i32 = arith.constant 0 : i32
    %c0_i32_0 = arith.constant 0 : i32
    %c0_i32_1 = arith.constant 0 : i32
    %c0_i32_2 = arith.constant 0 : i32
    return %c0_i32, %c0_i32_0, %c0_i32_1 : i32, i32, i32
  }
  func.func @transform_8(%arg0: i32) -> (i32, i32, i32) {
    %c0_i32 = arith.constant 0 : i32
    %c0_i32_0 = arith.constant 0 : i32
    %c0_i32_1 = arith.constant 0 : i32
    %c0_i32_2 = arith.constant 0 : i32
    return %c0_i32, %c0_i32_0, %c0_i32_1 : i32, i32, i32
  }
  func.func @transform_9(%arg0: i32) -> (i32, i32) {
    %c0_i32 = arith.constant 0 : i32
    %c0_i32_0 = arith.constant 0 : i32
    %c0_i32_1 = arith.constant 0 : i32
    return %c0_i32, %c0_i32_0 : i32, i32
  }
  func.func @transform_10(%arg0: i32) -> (i32, i32, i32) {
    %c0_i32 = arith.constant 0 : i32
    %c0_i32_0 = arith.constant 0 : i32
    %c0_i32_1 = arith.constant 0 : i32
    %c0_i32_2 = arith.constant 0 : i32
    return %c0_i32, %c0_i32_0, %c0_i32_1 : i32, i32, i32
  }
  func.func @transform_11(%arg0: i32) -> (i32, i32, i32) {
    %c0_i32 = arith.constant 0 : i32
    %c0_i32_0 = arith.constant 0 : i32
    %c0_i32_1 = arith.constant 0 : i32
    %c0_i32_2 = arith.constant 0 : i32
    return %c0_i32, %c0_i32_0, %c0_i32_1 : i32, i32, i32
  }
  func.func @transform_12(%arg0: i32) -> (i32, i32) {
    %c0_i32 = arith.constant 0 : i32
    %c0_i32_0 = arith.constant 0 : i32
    %c0_i32_1 = arith.constant 0 : i32
    return %c0_i32, %c0_i32_0 : i32, i32
  }
  func.func @transform_13(%arg0: i32) -> (i32, i32) {
    %c0_i32 = arith.constant 0 : i32
    %c0_i32_0 = arith.constant 0 : i32
    %c0_i32_1 = arith.constant 0 : i32
    return %c0_i32, %c0_i32_0 : i32, i32
  }
  func.func @transform_14(%arg0: i32) -> (i32, i32, i32) {
    %c0_i32 = arith.constant 0 : i32
    %c0_i32_0 = arith.constant 0 : i32
    %c0_i32_1 = arith.constant 0 : i32
    return %arg0, %c0_i32, %c0_i32_0 : i32, i32, i32
  }
}

</mosaic_0001>

<bundles_post_ra>
// kernel: discriminator_forward.1
= control target key start
LH: loop header
LB: loop body
LE: loop exit
PB: predicated region body
PF: predicated region fallthrough
CT: control target
= control target key end

     0   :  { %19 = vsyncpa [#allocation3], 0  ;;  %s9459_s0 = inlined_call_operand.vmem [shape: bf16[2,64,192], index: 0, kind: input, shape index: {}]   ;;  %s9460_s1 = inlined_call_operand.vmem [shape: bf16[4,32,64], index: 1, kind: input, shape index: {}]   ;;  %s9461_s2 = inlined_call_operand.hbm [shape: bf16[4,192,256], index: 2, kind: input, shape index: {}]   ;;  %s9462_s3 = inlined_call_operand.vmem [shape: f32[1,256], index: 3, kind: input, shape index: {}]   ;;  %s9463_s4 = inlined_call_operand.vmem [shape: bf16[4,16,32], index: 4, kind: input, shape index: {}]   ;;  %s9464_s5 = inlined_call_operand.vmem [shape: bf16[4,256,256], index: 5, kind: input, shape index: {}]   ;;  %s9465_s6 = inlined_call_operand.vmem [shape: f32[1,256], index: 6, kind: input, shape index: {}]   ;;  %s9466_s7 = inlined_call_operand.vmem [shape: bf16[4,8,16], index: 7, kind: input, shape index: {}]   ;;  %s9467_s8 = inlined_call_operand.hbm [shape: bf16[4,256,256], index: 8, kind: input, shape index: {}]   ;;  %s9468_s9 = inlined_call_operand.vmem [shape: f32[1,256], index: 9, kind: input, shape index: {}]   ;;  %s9469_s10 = inlined_call_operand.vmem [shape: bf16[4,4,8], index: 10, kind: input, shape index: {}]   ;;  %s9470_s11 = inlined_call_operand.hbm [shape: bf16[4,256,256], index: 11, kind: input, shape index: {}]   ;;  %s9471_s12 = inlined_call_operand.vmem [shape: f32[1,256], index: 12, kind: input, shape index: {}]   ;;  %s9472_s13 = inlined_call_operand.vmem [shape: f32[4,256], index: 13, kind: input, shape index: {}]   ;;  %s9473_s14 = inlined_call_operand.vmem [shape: f32[2,1,1], index: 14, kind: output, shape index: {}]  }
   0x1   :  { %20 = vsyncpa [#allocation5], 0  ;;  %s8284_s29 = smov 0  }
   0x2 LB: > { %s8290_s30 = sadd.s32 4294967295, %s8202_s29   ;;  %p5363_p0 = scmp.ge.s32.totalorder %s8202_s29, 1  ;;  %s8202_s29 = sphi %s8284_s29, %s26_s29  }
   0x3   : > { %p356_p1 = scmp.lt.s32.totalorder %s8202_s29, 3  ;;  %p8075_p2 = scmp.eq.s32.totalorder %s8290_s30, 0 }
   0x4   : > { %s399_s17 = sshll.u32 %s9467_s8, 4  ;;  %s370_s21 = sshll.u32 %s9461_s2, 4  ;;  %s400_s17 = int_to_ptr.hbm [resolvable:$true] %s399_s17  ;;  %s371_s21 = int_to_ptr.hbm [resolvable:$true] %s370_s21 }
   0x5   : > { %p8298_p3 = pnand %p5363_p0, %p356_p1  ;;  %s8204_s22 = smov [#allocation4]  }
   0x6   : > { %s401_s23 = sshll.u32 %s8204_s22, 4  ;;  %s8205_s24 = smov [#allocation2]   ;;  %s402_s23 = int_to_ptr.vmem [resolvable:$true] %s401_s23 }
   0x7   : > { %p8065_p4 = pneg %p8298_p3  ;;  %s372_s25 = sshll.u32 %s8205_s24, 4  ;;  %s373_s25 = int_to_ptr.vmem [resolvable:$true] %s372_s25 }
   0x8   : > { %s419_s28 = sshll.u32 %s9470_s11, 4  ;;  %s8206_s15 = smov 128   ;;  %s420_s28 = int_to_ptr.hbm [resolvable:$true] %s419_s28 }
   0x9   : > { %p8066_p5 = pnand %p8075_p2, %p8065_p4  ;;  %s8207_s16 = smov 8  }
   0xa   : > { %s8208_s19 = smov [#allocation6]   ;;  %451 = sbr.rel (%p8298_p3) target bundleno = 2700 (0xa8c), region = 76 }
   0xb   : > { %8071 = dma.hbm_to_vmem [thread:$0]  (!%p8066_p5), %s400_s17, 16384, %s402_s23, [#allocation5], %s8206_s15, %s8206_s15, %s8207_s16  }
   0xc   : > { %8068 = dma.hbm_to_vmem [thread:$0]  (!%p8066_p5), %s371_s21, 12288, %s373_s25, [#allocation3], %s8206_s15, %s8206_s15, %s8207_s16  }
   0xd   : > { %s421_s20 = sshll.u32 %s8208_s19, 4  ;;  %s422_s20 = int_to_ptr.vmem [resolvable:$true] %s421_s20 }
   0xe   : > { %8074 = dma.hbm_to_vmem [thread:$0]  (!%p8066_p5), %s420_s28, 16384, %s422_s20, [#allocation5], %s8206_s15, %s8206_s15, %s8207_s16  }
   0xf   : > { %8193 = dma.done.wait (%p8075_p2), [#allocation3], 12288  }
  0x10   : > { %8195 = vsyncadd (%p8075_p2), [#allocation3], 4294955008 }
  0x11   : > { %8197 = dma.done.wait (%p8075_p2), [#allocation5], 32768  }
  0x12   : > { %8199 = vsyncadd (%p8075_p2), [#allocation5], 4294934528  ;;  %p506_p6 = scmp.lt.s32.totalorder %s8290_s30, 1  ;;  %v5492_v22 = vld [vmem:[#allocation2 + $0x130] sm:$0xf]  ;;  %v7587_v28 = vld [vmem:[%s9460_s1 + $0x10] sm:$0xff] }
  0x13   : > { %v7604_v23 = vld [vmem:[#allocation2 + $0x134] sm:$0xf0]  ;;  %v7603_v24 = vld [vmem:[#allocation2 + $0x134] sm:$0xf]  ;;  %v5494_v25 = vld [vmem:[#allocation2 + $0x138] sm:$0xf0] }
  0x14   : > { %s9476_s30 = smov (!%p506_p6, %s8290_s30), 1  ;;  %v7561_v29 = vld [vmem:[%s9460_s1] sm:$0xff]  ;;  %v5484_v30 = vld [vmem:[#allocation2 + $0x120] sm:$0xf]  ;;  %v7602_v31 = vld [vmem:[#allocation2 + $0x124] sm:$0xf0]  ;;  %v5493_v32 = vor.u32 %v7604_v23, %v5492_v22  ;;  %v5497_v33 = vor.u32 %v7603_v24, %v5494_v25 }
  0x15   : > { %s7552_s17 = sshll.u32 %s9476_s30, 6  ;;  %v7601_v34 = vld [vmem:[#allocation2 + $0x124] sm:$0xf]  ;;  %v5524_v35 = vld [vmem:[#allocation2 + $0x170] sm:$0xf]  ;;  %vm577_vm0 = vcmask 523264   ;;  %v5485_v42 = vor.u32 %v7602_v31, %v5484_v30  ;;  %s513_s27 = scalar_lea.vmem %s9473_s14, %s9476_s30 }
  0x16   : > { %s510_s22 = scalar_lea.vmem %s9459_s0, %s7552_s17  ;;  %v7612_v36 = vld [vmem:[#allocation2 + $0x174] sm:$0xf0]  ;;  %v5486_v37 = vld [vmem:[#allocation2 + $0x128] sm:$0xf0]  ;;  %v7611_v38 = vld [vmem:[#allocation2 + $0x174] sm:$0xf] }
  0x17   : > { %v5408_v0 = vld [vmem:[%s510_s22 + $0x30] sm:$0xf]  ;;  %v7560_v1 = vld [vmem:[%s510_s22 + $0x34] sm:$0xf0]  ;;  %v7559_v2 = vld [vmem:[%s510_s22 + $0x34] sm:$0xf]  ;;  %v5525_v40 = vor.u32 %v7612_v36, %v5524_v35  ;;  %v5489_v43 = vor.u32 %v7601_v34, %v5486_v37 }
  0x18   : > { %v8330_v3 = vor.u32 %v7560_v1, %v5408_v0  ;;  %v5410_v4 = vld [vmem:[%s510_s22 + $0x38] sm:$0xf0]  ;;  %v5400_v5 = vld [vmem:[%s510_s22 + $0x20] sm:$0xf]  ;;  %v7558_v6 = vld [vmem:[%s510_s22 + $0x24] sm:$0xf0] }
  0x19   : > { %v8332_v7 = vor.u32 %v7559_v2, %v5410_v4  ;;  %v7557_v8 = vld [vmem:[%s510_s22 + $0x24] sm:$0xf]  ;;  %v5402_v9 = vld [vmem:[%s510_s22 + $0x28] sm:$0xf0]  ;;  %v8335_v10 = vor.u32 %v7558_v6, %v5400_v5  ;;  %v5392_v12 = vld [vmem:[%s510_s22 + $0x10] sm:$0xf] }
  0x1a   : > { %675 = vmatpush.bf16.msra.mxu2 %v8330_v3  ;;  %588 = vmatpush.bf16.msra.mxu0 %v8330_v3  ;;  %v8339_v11 = vor.u32 %v7557_v8, %v5402_v9  ;;  %v7556_v13 = vld [vmem:[%s510_s22 + $0x14] sm:$0xf0]  ;;  %v7555_v14 = vld [vmem:[%s510_s22 + $0x14] sm:$0xf]  ;;  %v5394_v15 = vld [vmem:[%s510_s22 + $0x18] sm:$0xf0] }
  0x1b   : > { %694 = vmatpush.bf16.msra.mxu3 %v8332_v7  ;;  %607 = vmatpush.bf16.msra.mxu1 %v8332_v7  ;;  %v8343_v16 = vor.u32 %v7556_v13, %v5392_v12  ;;  %v8347_v17 = vor.u32 %v7555_v14, %v5394_v15  ;;  %v5384_v18 = vld [vmem:[%s510_s22] sm:$0xf]  ;;  %v7554_v19 = vld [vmem:[%s510_s22 + $0x4] sm:$0xf0]  ;;  %v7553_v20 = vld [vmem:[%s510_s22 + $0x4] sm:$0xf] }
  0x1c   : > { %v5386_v21 = vld [vmem:[%s510_s22 + $0x8] sm:$0xf0]  ;;  %v8351_v26 = vor.u32 %v7554_v19, %v5384_v18  ;;  %v5526_v39 = vld [vmem:[#allocation2 + $0x178] sm:$0xf0]  ;;  %v5476_v44 = vld [vmem:[#allocation2 + $0x110] sm:$0xf] }
  0x1d   : > { %v8355_v27 = vor.u32 %v7553_v20, %v5386_v21  ;;  %v5529_v41 = vor.u32 %v7611_v38, %v5526_v39  ;;  %v7600_v45 = vld [vmem:[#allocation2 + $0x114] sm:$0xf0]  ;;  %v7599_v46 = vld [vmem:[#allocation2 + $0x114] sm:$0xf]  ;;  %v5478_v47 = vld [vmem:[#allocation2 + $0x118] sm:$0xf0] }
  0x1e   : > { %676 = vmatpush.bf16.msra.mxu2 %v8335_v10  ;;  %589 = vmatpush.bf16.msra.mxu0 %v8335_v10  ;;  %v5477_v48 = vor.u32 %v7600_v45, %v5476_v44  ;;  %v5481_v49 = vor.u32 %v7599_v46, %v5478_v47  ;;  %v5468_v50 = vld [vmem:[#allocation2 + $0x100] sm:$0xf]  ;;  %v7598_v51 = vld [vmem:[#allocation2 + $0x104] sm:$0xf0]  ;;  %v7597_v52 = vld [vmem:[#allocation2 + $0x104] sm:$0xf] }
  0x1f   : > { %695 = vmatpush.bf16.msra.mxu3 %v8339_v11  ;;  %608 = vmatpush.bf16.msra.mxu1 %v8339_v11  ;;  %v5470_v53 = vld [vmem:[#allocation2 + $0x108] sm:$0xf0]  ;;  %v5469_v54 = vor.u32 %v7598_v51, %v5468_v50  ;;  %v5460_v56 = vld [vmem:[#allocation2 + $0xf0] sm:$0xf]  ;;  %v7596_v57 = vld [vmem:[#allocation2 + $0xf4] sm:$0xf0] }
  0x20   : > { %v5473_v55 = vor.u32 %v7597_v52, %v5470_v53  ;;  %v7595_v58 = vld [vmem:[#allocation2 + $0xf4] sm:$0xf]  ;;  %v5462_v59 = vld [vmem:[#allocation2 + $0xf8] sm:$0xf0]  ;;  %v5461_v60 = vor.u32 %v7596_v57, %v5460_v56  ;;  %v7562_v63 = vld [vmem:[%s9460_s1 + $0x8] sm:$0xff]  ;;  %vm1787_vm8 = vcmask 261120  }
  0x21   : > { %v5465_v61 = vor.u32 %v7595_v58, %v5462_v59  ;;  %v7588_v62 = vld [vmem:[%s9460_s1 + $0x18] sm:$0xff]  ;;  %v5452_v0 = vld [vmem:[#allocation2 + $0xe0] sm:$0xf]  ;;  %v7594_v1 = vld [vmem:[#allocation2 + $0xe4] sm:$0xf0]  ;;  %vm2972_vm13 = vcmask 130048  }
  0x22   : > { %677 = vmatpush.bf16.msra.mxu2 %v8343_v16  ;;  %590 = vmatpush.bf16.msra.mxu0 %v8343_v16  ;;  %v5516_v2 = vld [vmem:[#allocation2 + $0x160] sm:$0xf]  ;;  %v5453_v4 = vor.u32 %v7594_v1, %v5452_v0  ;;  %v7610_v5 = vld [vmem:[#allocation2 + $0x164] sm:$0xf0]  ;;  %v7593_v6 = vld [vmem:[#allocation2 + $0xe4] sm:$0xf] }
  0x23   : > { %696 = vmatpush.bf16.msra.mxu3 %v8347_v17  ;;  %609 = vmatpush.bf16.msra.mxu1 %v8347_v17  ;;  %v5454_v8 = vld [vmem:[#allocation2 + $0xe8] sm:$0xf0]  ;;  %v5517_v9 = vor.u32 %v7610_v5, %v5516_v2  ;;  %v7609_v13 = vld [vmem:[#allocation2 + $0x164] sm:$0xf]  ;;  %v5444_v18 = vld [vmem:[#allocation2 + $0xd0] sm:$0xf] }
  0x24   : > { %v5457_v12 = vor.u32 %v7593_v6, %v5454_v8  ;;  %v5518_v14 = vld [vmem:[#allocation2 + $0x168] sm:$0xf0]  ;;  %v7592_v19 = vld [vmem:[#allocation2 + $0xd4] sm:$0xf0]  ;;  %v5508_v20 = vld [vmem:[#allocation2 + $0x150] sm:$0xf] }
  0x25   : > { %v5521_v15 = vor.u32 %v7609_v13, %v5518_v14  ;;  %v5445_v21 = vor.u32 %v7592_v19, %v5444_v18  ;;  %v7608_v22 = vld [vmem:[#allocation2 + $0x154] sm:$0xf0]  ;;  %v7591_v23 = vld [vmem:[#allocation2 + $0xd4] sm:$0xf]  ;;  %v5446_v24 = vld [vmem:[#allocation2 + $0xd8] sm:$0xf0] }
  0x26   : > { %678 = vmatpush.bf16.msra.mxu2 %v8351_v26  ;;  %591 = vmatpush.bf16.msra.mxu0 %v8351_v26  ;;  %v5509_v25 = vor.u32 %v7608_v22, %v5508_v20  ;;  %v5510_v30 = vld [vmem:[#allocation2 + $0x158] sm:$0xf0]  ;;  %v5500_v34 = vld [vmem:[#allocation2 + $0x140] sm:$0xf]  ;;  %v7606_v36 = vld [vmem:[#allocation2 + $0x144] sm:$0xf0] }
  0x27   : > { %697 = vmatpush.bf16.msra.mxu3 %v8355_v27  ;;  %610 = vmatpush.bf16.msra.mxu1 %v8355_v27  ;;  %v7589_v37 = vld [vmem:[#allocation2 + $0xc4] sm:$0xf]  ;;  %v5438_v38 = vld [vmem:[#allocation2 + $0xc8] sm:$0xf0]  ;;  %v5501_v39 = vor.u32 %v7606_v36, %v5500_v34  ;;  %v5592_v44 = vld [vmem:[#allocation2 + $0x70] sm:$0xf] }
  0x28   : > { %v7578_v45 = vld [vmem:[#allocation2 + $0x74] sm:$0xf0]  ;;  %v7577_v46 = vld [vmem:[#allocation2 + $0x74] sm:$0xf]  ;;  %v5584_v50 = vld [vmem:[#allocation2 + $0x60] sm:$0xf] }
  0x29   : > { %5430 = vmatmul.msk.bf16.vlgmr.msra.gmra.mxu2 %vm577_vm0, %v7587_v28  ;;  %5414 = vmatmul.msk.bf16.vlgmr.msra.gmra.mxu0 %vm577_vm0, %v7561_v29  ;;  %v5593_v47 = vor.u32 %v7578_v45, %v5592_v44  ;;  %v7576_v51 = vld [vmem:[#allocation2 + $0x64] sm:$0xf0]  ;;  %v7575_v52 = vld [vmem:[#allocation2 + $0x64] sm:$0xf]  ;;  %v5576_v56 = vld [vmem:[#allocation2 + $0x50] sm:$0xf] }
  0x2a   : > { %864 = vmatpush.bf16.msrb.mxu0 %v5493_v32  ;;  %902 = vmatpush.bf16.msrb.mxu2 %v5497_v33  ;;  %v5436_v32 = vld [vmem:[#allocation2 + $0xc0] sm:$0xf]  ;;  %v7590_v33 = vld [vmem:[#allocation2 + $0xc4] sm:$0xf0]  ;;  %v5585_v53 = vor.u32 %v7576_v51, %v5584_v50  ;;  %v7574_v57 = vld [vmem:[#allocation2 + $0x54] sm:$0xf0] }
  0x2b   : > { %5432 = vmatmul.msk.bf16.vlgmr.msra.gmra.mxu3 %vm577_vm0, %v7587_v28  ;;  %5416 = vmatmul.msk.bf16.vlgmr.msra.gmra.mxu1 %vm577_vm0, %v7561_v29  ;;  %v5449_v28 = vor.u32 %v7591_v23, %v5446_v24  ;;  %v7607_v29 = vld [vmem:[#allocation2 + $0x154] sm:$0xf]  ;;  %v5437_v35 = vor.u32 %v7590_v33, %v5436_v32  ;;  %v5577_v59 = vor.u32 %v7574_v57, %v5576_v56  ;;  %v7571_v0 = vld [vmem:[#allocation2 + $0x44] sm:$0xf]  ;;  %v5570_v2 = vld [vmem:[#allocation2 + $0x48] sm:$0xf0] }
  0x2c   : > { %887 = vmatpush.bf16.msrb.mxu1 %v5525_v40  ;;  %925 = vmatpush.bf16.msrb.mxu3 %v5529_v41  ;;  %v5513_v31 = vor.u32 %v7607_v29, %v5510_v30  ;;  %v5441_v40 = vor.u32 %v7589_v37, %v5438_v38  ;;  %v7605_v41 = vld [vmem:[#allocation2 + $0x144] sm:$0xf]  ;;  %v7573_v58 = vld [vmem:[#allocation2 + $0x54] sm:$0xf]  ;;  %v5560_v5 = vld [vmem:[#allocation2 + $0x30] sm:$0xf] }
  0x2d   : > { %v7570_v6 = vld [vmem:[#allocation2 + $0x34] sm:$0xf0]  ;;  %v5624_v8 = vld [vmem:[#allocation2 + $0xb0] sm:$0xf]  ;;  %v7569_v13 = vld [vmem:[#allocation2 + $0x34] sm:$0xf] }
  0x2e   : > { %865 = vmatpush.bf16.msrb.mxu0 %v5485_v42  ;;  %903 = vmatpush.bf16.msrb.mxu2 %v5489_v43  ;;  %v5502_v42 = vld [vmem:[#allocation2 + $0x148] sm:$0xf0]  ;;  %v5562_v14 = vld [vmem:[#allocation2 + $0x38] sm:$0xf0]  ;;  %v7585_v19 = vld [vmem:[#allocation2 + $0xb4] sm:$0xf] }
  0x2f   : > { %v5505_v43 = vor.u32 %v7605_v41, %v5502_v42  ;;  %v5565_v18 = vor.u32 %v7569_v13, %v5562_v14  ;;  %v5626_v20 = vld [vmem:[#allocation2 + $0xb8] sm:$0xf0]  ;;  %v7568_v23 = vld [vmem:[#allocation2 + $0x24] sm:$0xf0]  ;;  %v5616_v24 = vld [vmem:[#allocation2 + $0xa0] sm:$0xf] }
  0x30   : > { %888 = vmatpush.bf16.msrb.mxu1 %v5517_v9  ;;  %926 = vmatpush.bf16.msrb.mxu3 %v5521_v15  ;;  %v5561_v9 = vor.u32 %v7570_v6, %v5560_v5  ;;  %v5629_v22 = vor.u32 %v7585_v19, %v5626_v20  ;;  %v7567_v30 = vld [vmem:[#allocation2 + $0x24] sm:$0xf]  ;;  %v5618_v34 = vld [vmem:[#allocation2 + $0xa8] sm:$0xf0]  ;;  %v7566_v36 = vld [vmem:[#allocation2 + $0x14] sm:$0xf0] }
  0x31   : > { %v7583_v32 = vld [vmem:[#allocation2 + $0xa4] sm:$0xf]  ;;  %v7565_v41 = vld [vmem:[#allocation2 + $0x14] sm:$0xf]  ;;  %v5546_v44 = vld [vmem:[#allocation2 + $0x18] sm:$0xf0] }
  0x32   : > { %866 = vmatpush.bf16.msrb.mxu0 %v5477_v48  ;;  %904 = vmatpush.bf16.msrb.mxu2 %v5481_v49  ;;  %v5594_v48 = vld [vmem:[#allocation2 + $0x78] sm:$0xf0]  ;;  %v5621_v38 = vor.u32 %v7583_v32, %v5618_v34  ;;  %v7581_v45 = vld [vmem:[#allocation2 + $0x94] sm:$0xf]  ;;  %v7564_v50 = vld [vmem:[#allocation2 + $0x4] sm:$0xf0] }
  0x33   : > { %v5597_v49 = vor.u32 %v7577_v46, %v5594_v48  ;;  %v5610_v46 = vld [vmem:[#allocation2 + $0x98] sm:$0xf0]  ;;  %v5549_v48 = vor.u32 %v7565_v41, %v5546_v44  ;;  %v5600_v51 = vld [vmem:[#allocation2 + $0x80] sm:$0xf] }
  0x34   : > { %889 = vmatpush.bf16.msrb.mxu1 %v5509_v25  ;;  %927 = vmatpush.bf16.msrb.mxu3 %v5513_v31  ;;  %v7584_v25 = vld [vmem:[#allocation2 + $0xa4] sm:$0xf0]  ;;  %v5554_v31 = vld [vmem:[#allocation2 + $0x28] sm:$0xf0] }
  0x35   : > { %v5617_v29 = vor.u32 %v7584_v25, %v5616_v24  ;;  %v5557_v33 = vor.u32 %v7567_v30, %v5554_v31 }
  0x36   : > { %867 = vmatpush.bf16.msrb.mxu0 %v5469_v54  ;;  %905 = vmatpush.bf16.msrb.mxu2 %v5473_v55  ;;  %v5586_v54 = vld [vmem:[#allocation2 + $0x68] sm:$0xf0] }
  0x37   : > { %v5589_v55 = vor.u32 %v7575_v52, %v5586_v54  ;;  %v5613_v52 = vor.u32 %v7581_v45, %v5610_v46  ;;  %v7563_v54 = vld [vmem:[#allocation2 + $0x4] sm:$0xf]  ;;  %v5700_v45 = vld [vmem:[#allocation2 + $0x1e0] sm:$0xf]  ;;  %v7628_v46 = vld [vmem:[#allocation2 + $0x1e4] sm:$0xf0] }
  0x38   : > { %890 = vmatpush.bf16.msrb.mxu1 %v5501_v39  ;;  %928 = vmatpush.bf16.msrb.mxu3 %v5505_v43  ;;  %v5608_v39 = vld [vmem:[#allocation2 + $0x90] sm:$0xf] }
  0x39   : > { %5431 = vmatmul.msk.bf16.gmra.mxu2 %vm577_vm0, %v7588_v62  ;;  %5415 = vmatmul.msk.bf16.gmra.mxu0 %vm577_vm0, %v7562_v63 }
  0x3a   : > { %868 = vmatpush.bf16.msrb.mxu0 %v5461_v60  ;;  %906 = vmatpush.bf16.msrb.mxu2 %v5465_v61  ;;  %v5578_v60 = vld [vmem:[#allocation2 + $0x58] sm:$0xf0] }
  0x3b   : > { %5433 = vmatmul.msk.bf16.gmra.mxu3 %vm577_vm0, %v7588_v62  ;;  %5417 = vmatmul.msk.bf16.gmra.mxu1 %vm577_vm0, %v7562_v63  ;;  %v5581_v61 = vor.u32 %v7573_v58, %v5578_v60  ;;  %v5568_v62 = vld [vmem:[#allocation2 + $0x40] sm:$0xf]  ;;  %v7572_v63 = vld [vmem:[#allocation2 + $0x44] sm:$0xf0]  ;;  %v5602_v60 = vld [vmem:[#allocation2 + $0x88] sm:$0xf0] }
  0x3c   : > { %v5569_v1 = vor.u32 %v7572_v63, %v5568_v62  ;;  %1127 = vmatpush.bf16.msra.mxu3 %v5629_v22 }
  0x3e   : > { %869 = vmatpush.bf16.msrb.mxu0 %v5453_v4  ;;  %907 = vmatpush.bf16.msrb.mxu2 %v5457_v12  ;;  %v5573_v4 = vor.u32 %v7571_v0, %v5570_v2  ;;  %v7586_v12 = vld [vmem:[#allocation2 + $0xb4] sm:$0xf0] }
  0x3f   : > { %v5625_v15 = vor.u32 %v7586_v12, %v5624_v8 }
  0x40   : > { %1128 = vmatpush.bf16.msra.mxu3 %v5621_v38  ;;  %v5708_v38 = vld [vmem:[#allocation2 + $0x1f0] sm:$0xf] }
  0x41   : > { %1089 = vmatpush.bf16.msra.mxu1 %v5625_v15 }
  0x42   : > { %870 = vmatpush.bf16.msrb.mxu0 %v5445_v21  ;;  %908 = vmatpush.bf16.msrb.mxu2 %v5449_v28  ;;  %v5552_v21 = vld [vmem:[#allocation2 + $0x20] sm:$0xf] }
  0x43   : > { %v5553_v28 = vor.u32 %v7568_v23, %v5552_v21 }
  0x44   : > { %1129 = vmatpush.bf16.msra.mxu3 %v5613_v52 }
  0x45   : > { %1090 = vmatpush.bf16.msra.mxu1 %v5617_v29  ;;  %v7614_v29 = vld [vmem:[%s9460_s1 + $0x28] sm:$0xff] }
  0x46   : > { %871 = vmatpush.bf16.msrb.mxu0 %v5437_v35  ;;  %909 = vmatpush.bf16.msrb.mxu2 %v5441_v40  ;;  %v5544_v35 = vld [vmem:[#allocation2 + $0x10] sm:$0xf]  ;;  %v7582_v40 = vld [vmem:[#allocation2 + $0x94] sm:$0xf0] }
  0x47   : > { %v5545_v43 = vor.u32 %v7566_v36, %v5544_v35 }
  0x4a   : > { %1066 = vmatpush.bf16.msra.mxu0 %v5593_v47  ;;  %1104 = vmatpush.bf16.msra.mxu2 %v5597_v49  ;;  %v5609_v47 = vor.u32 %v7582_v40, %v5608_v39  ;;  %v5536_v49 = vld [vmem:[#allocation2] sm:$0xf]  ;;  %v7630_v39 = vld [vmem:[#allocation2 + $0x1f4] sm:$0xf0]  ;;  %v7629_v40 = vld [vmem:[#allocation2 + $0x1f4] sm:$0xf] }
  0x4b   : > { %v5537_v56 = vor.u32 %v7564_v50, %v5536_v49  ;;  %v5709_v41 = vor.u32 %v7630_v39, %v5708_v38  ;;  %v5701_v49 = vor.u32 %v7628_v46, %v5700_v45  ;;  %v5702_v50 = vld [vmem:[#allocation2 + $0x1e8] sm:$0xf0]  ;;  %v7636_v38 = vld [vmem:[#allocation2 + $0x224] sm:$0xf0]  ;;  %v7619_v39 = vld [vmem:[#allocation2 + $0x1a4] sm:$0xf] }
  0x4c   : > { %1091 = vmatpush.bf16.msra.mxu1 %v5609_v47  ;;  %v7627_v47 = vld [vmem:[#allocation2 + $0x1e4] sm:$0xf]  ;;  %v5734_v46 = vld [vmem:[#allocation2 + $0x228] sm:$0xf0] }
  0x4d   : > { %v5705_v52 = vor.u32 %v7627_v47, %v5702_v50  ;;  %v7635_v45 = vld [vmem:[#allocation2 + $0x224] sm:$0xf] }
  0x4e   : > { %1067 = vmatpush.bf16.msra.mxu0 %v5585_v53  ;;  %1105 = vmatpush.bf16.msra.mxu2 %v5589_v55  ;;  %v7580_v53 = vld [vmem:[#allocation2 + $0x84] sm:$0xf0]  ;;  %v5538_v55 = vld [vmem:[#allocation2 + $0x8] sm:$0xf0]  ;;  %v5737_v50 = vor.u32 %v7635_v45, %v5734_v46 }
  0x4f   : > { %v5601_v57 = vor.u32 %v7580_v53, %v5600_v51  ;;  %v5541_v58 = vor.u32 %v7563_v54, %v5538_v55  ;;  %v5692_v55 = vld [vmem:[#allocation2 + $0x1d0] sm:$0xf] }
  0x51   : > { %1092 = vmatpush.bf16.msra.mxu1 %v5601_v57  ;;  %v7625_v57 = vld [vmem:[#allocation2 + $0x1d4] sm:$0xf] }
  0x52   : > { %1068 = vmatpush.bf16.msra.mxu0 %v5577_v59  ;;  %1106 = vmatpush.bf16.msra.mxu2 %v5581_v61  ;;  %v7579_v59 = vld [vmem:[#allocation2 + $0x84] sm:$0xf] }
  0x53   : > { %v5605_v0 = vor.u32 %v7579_v59, %v5602_v60  ;;  %v5694_v59 = vld [vmem:[#allocation2 + $0x1d8] sm:$0xf0] }
  0x54   : > { %v5697_v60 = vor.u32 %v7625_v57, %v5694_v59  ;;  %v7617_v57 = vld [vmem:[#allocation2 + $0x194] sm:$0xf] }
  0x55   : > { %1130 = vmatpush.bf16.msra.mxu3 %v5605_v0  ;;  %v7623_v0 = vld [vmem:[#allocation2 + $0x1c4] sm:$0xf] }
  0x56   : > { %1069 = vmatpush.bf16.msra.mxu0 %v5569_v1  ;;  %1107 = vmatpush.bf16.msra.mxu2 %v5573_v4 }
  0x5a   : > { %1070 = vmatpush.bf16.msra.mxu0 %v5561_v9  ;;  %1108 = vmatpush.bf16.msra.mxu2 %v5565_v18 }
  0x5e   : > { %1071 = vmatpush.bf16.msra.mxu0 %v5553_v28  ;;  %1109 = vmatpush.bf16.msra.mxu2 %v5557_v33  ;;  %v7613_v28 = vld [vmem:[%s9460_s1 + $0x20] sm:$0xff] }
  0x62   : > { %1072 = vmatpush.bf16.msra.mxu0 %v5545_v43  ;;  %1110 = vmatpush.bf16.msra.mxu2 %v5549_v48 }
  0x66   : > { %1073 = vmatpush.bf16.msra.mxu0 %v5537_v56  ;;  %1111 = vmatpush.bf16.msra.mxu2 %v5541_v58  ;;  %v7626_v56 = vld [vmem:[#allocation2 + $0x1d4] sm:$0xf0] }
  0x67   : > { %v5693_v58 = vor.u32 %v7626_v56, %v5692_v55  ;;  %v7634_v56 = vld [vmem:[#allocation2 + $0x214] sm:$0xf0] }
  0xa6   : > { %v593_v5 = vpop.f32.mrf.mxu0 }
  0xa8   : > { %v612_v8 = vpop.f32.mrf.mxu1 }
  0xac   : > { %v680_v37 = vpop.f32.mrf.mxu2 }
  0xae   : > { %v699_v42 = vpop.f32.mrf.mxu3  ;;  %v595_v14 = vpop.f32.mrf.mxu0 }
  0xaf   : > { %v622_v18 = vpack.c.bf16 %v595_v14, %v593_v5  ;;  %v5740_v14 = vld [vmem:[#allocation2 + $0x230] sm:$0xf] }
  0xb0   : > { %v614_v15 = vpop.f32.mrf.mxu1 }
  0xb1   : > { %v623_v19 = vpack.c.bf16 %v614_v15, %v612_v8 }
  0xb4   : > { %v682_v61 = vpop.f32.mrf.mxu2 }
  0xb5   : > { %v709_v62 = vpack.c.bf16 %v682_v61, %v680_v37 }
  0xb6   : > { %v701_v63 = vpop.f32.mrf.mxu3  ;;  %v598_v20 = vpop.f32.mrf.mxu0 }
  0xb7   : > { %v710_v1 = vpack.c.bf16 %v701_v63, %v699_v42  ;;  %872 = vmatmul.bf16.vlgmr.msrb.gmra.mxu0 %v709_v62  ;;  %910 = vmatmul.bf16.vlgmr.msrb.gmra.mxu2 %v709_v62  ;;  %v5710_v42 = vld [vmem:[#allocation2 + $0x1f8] sm:$0xf0]  ;;  %v5684_v62 = vld [vmem:[#allocation2 + $0x1c0] sm:$0xf]  ;;  %v7624_v63 = vld [vmem:[#allocation2 + $0x1c4] sm:$0xf0] }
  0xb8   : > { %1167 = vmatpush.bf16.msrb.mxu0 %v8330_v3  ;;  %v617_v21 = vpop.f32.mrf.mxu1  ;;  %v5713_v43 = vor.u32 %v7629_v40, %v5710_v42  ;;  %1356 = vmatpush.bf16.msrb.mxu2 %v5709_v41  ;;  %v5670_v40 = vld [vmem:[#allocation2 + $0x1a8] sm:$0xf0] }
  0xb9   : > { %5530 = vmatmul.msk.bf16.vlgmr.msrb.gmra.mxu1 %vm577_vm0, %v710_v1  ;;  %5532 = vmatmul.msk.bf16.vlgmr.msrb.gmra.mxu3 %vm577_vm0, %v710_v1 }
  0xba   : > { %1186 = vmatpush.bf16.msrb.mxu1 %v8332_v7 }
  0xbc   : > { %v685_v2 = vpop.f32.mrf.mxu2  ;;  %1168 = vmatpush.bf16.msrb.mxu0 %v8335_v10  ;;  %1357 = vmatpush.bf16.msrb.mxu2 %v5701_v49 }
  0xbe   : > { %v704_v4 = vpop.f32.mrf.mxu3  ;;  %1187 = vmatpush.bf16.msrb.mxu1 %v8339_v11  ;;  %v600_v22 = vpop.f32.mrf.mxu0 }
  0xbf   : > { %v624_v24 = vpack.c.bf16 %v600_v22, %v598_v20  ;;  %v5678_v20 = vld [vmem:[#allocation2 + $0x1b8] sm:$0xf0] }
  0xc0   : > { %1169 = vmatpush.bf16.msrb.mxu0 %v8343_v16  ;;  %v619_v23 = vpop.f32.mrf.mxu1  ;;  %1358 = vmatpush.bf16.msrb.mxu2 %v5693_v58  ;;  %v5662_v58 = vld [vmem:[#allocation2 + $0x198] sm:$0xf0] }
  0xc1   : > { %v625_v25 = vpack.c.bf16 %v619_v23, %v617_v21  ;;  %v7637_v23 = vld [vmem:[#allocation2 + $0x234] sm:$0xf] }
  0xc2   : > { %1188 = vmatpush.bf16.msrb.mxu1 %v8347_v17 }
  0xc4   : > { %v687_v6 = vpop.f32.mrf.mxu2  ;;  %1170 = vmatpush.bf16.msrb.mxu0 %v8351_v26 }
  0xc5   : > { %v711_v12 = vpack.c.bf16 %v687_v6, %v685_v2  ;;  %v5685_v2 = vor.u32 %v7624_v63, %v5684_v62  ;;  %v7633_v62 = vld [vmem:[#allocation2 + $0x214] sm:$0xf]  ;;  %v5726_v63 = vld [vmem:[#allocation2 + $0x218] sm:$0xf0] }
  0xc6   : > { %v706_v9 = vpop.f32.mrf.mxu3  ;;  %1189 = vmatpush.bf16.msrb.mxu1 %v8355_v27 }
  0xc7   : > { %v712_v13 = vpack.c.bf16 %v706_v9, %v704_v4  ;;  %877 = vmatmul.bf16.gmra.mxu0 %v711_v12  ;;  %915 = vmatmul.bf16.gmra.mxu2 %v711_v12  ;;  %v5686_v4 = vld [vmem:[#allocation2 + $0x1c8] sm:$0xf0]  ;;  %v5676_v12 = vld [vmem:[#allocation2 + $0x1b0] sm:$0xf] }
  0xc8   : > { %v5689_v8 = vor.u32 %v7623_v0, %v5686_v4  ;;  %1359 = vmatpush.bf16.msrb.mxu2 %v5685_v2  ;;  %v7616_v2 = vld [vmem:[#allocation2 + $0x184] sm:$0xf0]  ;;  %v5716_v4 = vld [vmem:[#allocation2 + $0x200] sm:$0xf] }
  0xc9   : > { %5531 = vmatmul.msk.bf16.gmra.mxu1 %vm577_vm0, %v712_v13  ;;  %5533 = vmatmul.msk.bf16.gmra.mxu3 %vm577_vm0, %v712_v13  ;;  %v7622_v13 = vld [vmem:[#allocation2 + $0x1b4] sm:$0xf0] }
  0xca   : > { %v5677_v15 = vor.u32 %v7622_v13, %v5676_v12 }
  0xcc   : > { %1360 = vmatpush.bf16.msrb.mxu2 %v5677_v15  ;;  %v7615_v15 = vld [vmem:[#allocation2 + $0x184] sm:$0xf] }
  0xd7   : > { %1074 = vmatmul.bf16.vlgmr.msra.gmra.mxu0 %v622_v18  ;;  %1112 = vmatmul.bf16.vlgmr.msra.gmra.mxu2 %v622_v18  ;;  %v7638_v18 = vld [vmem:[#allocation2 + $0x234] sm:$0xf0] }
  0xd8   : > { %1394 = vmatpush.bf16.msra.mxu0 %v5713_v43  ;;  %v5741_v21 = vor.u32 %v7638_v18, %v5740_v14  ;;  %v5673_v43 = vor.u32 %v7619_v39, %v5670_v40  ;;  %v7632_v14 = vld [vmem:[#allocation2 + $0x204] sm:$0xf0]  ;;  %v5654_v18 = vld [vmem:[#allocation2 + $0x188] sm:$0xf0] }
  0xd9   : > { %5630 = vmatmul.msk.bf16.vlgmr.msra.gmra.mxu1 %vm577_vm0, %v623_v19  ;;  %5632 = vmatmul.msk.bf16.vlgmr.msra.gmra.mxu3 %vm577_vm0, %v623_v19  ;;  %v7621_v19 = vld [vmem:[#allocation2 + $0x1b4] sm:$0xf] }
  0xda   : > { %v5681_v22 = vor.u32 %v7621_v19, %v5678_v20  ;;  %1379 = vmatpush.bf16.msrb.mxu3 %v5741_v21  ;;  %v5717_v20 = vor.u32 %v7632_v14, %v5716_v4  ;;  %v5657_v21 = vor.u32 %v7615_v15, %v5654_v18  ;;  %v7651_v4 = vld [vmem:[#allocation2 + $0x294] sm:$0xf]  ;;  %v5800_v14 = vld [vmem:[#allocation2 + $0x280] sm:$0xf]  ;;  %v7650_v15 = vld [vmem:[#allocation2 + $0x284] sm:$0xf0] }
  0xdb   : > { %v7649_v18 = vld [vmem:[#allocation2 + $0x284] sm:$0xf] }
  0xdc   : > { %1395 = vmatpush.bf16.msra.mxu0 %v5705_v52  ;;  %v7618_v52 = vld [vmem:[#allocation2 + $0x194] sm:$0xf0] }
  0xe0   : > { %1396 = vmatpush.bf16.msra.mxu0 %v5697_v60 }
  0xe4   : > { %1397 = vmatpush.bf16.msra.mxu0 %v5689_v8 }
  0xe7   : > { %1079 = vmatmul.bf16.gmra.mxu0 %v624_v24  ;;  %1117 = vmatmul.bf16.gmra.mxu2 %v624_v24  ;;  %v5742_v24 = vld [vmem:[#allocation2 + $0x238] sm:$0xf0] }
  0xe8   : > { %1398 = vmatpush.bf16.msra.mxu0 %v5681_v22  ;;  %v7631_v22 = vld [vmem:[#allocation2 + $0x204] sm:$0xf] }
  0xe9   : > { %5631 = vmatmul.msk.bf16.gmra.mxu1 %vm577_vm0, %v625_v25  ;;  %5633 = vmatmul.msk.bf16.gmra.mxu3 %vm577_vm0, %v625_v25  ;;  %v5745_v25 = vor.u32 %v7637_v23, %v5742_v24  ;;  %v5718_v23 = vld [vmem:[#allocation2 + $0x208] sm:$0xf0] }
  0xeb   : > { %1417 = vmatpush.bf16.msra.mxu1 %v5745_v25 }
  0xec   : > { %1399 = vmatpush.bf16.msra.mxu0 %v5673_v43 }
  0xef   : > { %1418 = vmatpush.bf16.msra.mxu1 %v5737_v50  ;;  %v7639_v50 = vld [vmem:[%s9460_s1 + $0x30] sm:$0xff] }
  0xf7   : > { %5646 = vmatmul.msk.bf16.vlgmr.msrb.gmra.mxu0 %vm577_vm0, %v7613_v28 }
  0xf9   : > { %5648 = vmatmul.msk.bf16.vlgmr.msrb.gmra.mxu1 %vm577_vm0, %v7613_v28 }
 0x107   : > { %5647 = vmatmul.msk.bf16.gmra.mxu0 %vm577_vm0, %v7614_v29 }
 0x109   : > { %5649 = vmatmul.msk.bf16.gmra.mxu1 %vm577_vm0, %v7614_v29  ;;  %v5668_v29 = vld [vmem:[#allocation2 + $0x1a0] sm:$0xf] }
 0x134   : > { %v873_v30 = vpop.f32.mrf.mxu0 }
 0x136   : > { %v892_v31 = vpop.f32.mrf.mxu1 }
 0x137   : > { %v8408_v32 = vadd.f32 %v892_v31, %v873_v30  ;;  %v7620_v30 = vld [vmem:[#allocation2 + $0x1a4] sm:$0xf0]  ;;  %v5732_v31 = vld [vmem:[#allocation2 + $0x220] sm:$0xf] }
 0x138   : > { %v5733_v42 = vor.u32 %v7636_v38, %v5732_v31 }
 0x13a   : > { %v911_v33 = vpop.f32.mrf.mxu2  ;;  %1380 = vmatpush.bf16.msrb.mxu3 %v5733_v42 }
 0x13c   : > { %v930_v34 = vpop.f32.mrf.mxu3  ;;  %v8412_v36 = vpop.f32.mrf.mxu0 }
 0x13d   : > { %v8410_v35 = vadd.f32 %v930_v34, %v911_v33  ;;  %v5669_v34 = vor.u32 %v7620_v30, %v5668_v29  ;;  %v5721_v29 = vor.u32 %v7631_v22, %v5718_v23 }
 0x13e   : > { %v8414_v37 = vpop.f32.mrf.mxu1 }
 0x13f   : > { %1361 = vmatpush.bf16.msrb.mxu2 %v5669_v34 }
 0x142   : > { %v8416_v44 = vpop.f32.mrf.mxu2 }
 0x144   : > { %v8418_v48 = vpop.f32.mrf.mxu3  ;;  %v878_v51 = vpop.f32.mrf.mxu0 }
 0x146   : > { %v897_v53 = vpop.f32.mrf.mxu1 }
 0x147   : > { %v8420_v54 = vadd.f32 %v897_v53, %v878_v51  ;;  %v5660_v51 = vld [vmem:[#allocation2 + $0x190] sm:$0xf] }
 0x148   : > { %v5724_v53 = vld [vmem:[#allocation2 + $0x210] sm:$0xf]  ;;  %v5661_v55 = vor.u32 %v7618_v52, %v5660_v51 }
 0x149   : > { %v5725_v60 = vor.u32 %v7634_v56, %v5724_v53  ;;  %v7640_v51 = vld [vmem:[%s9460_s1 + $0x38] sm:$0xff]  ;;  %v7656_v53 = vld [vmem:[#allocation2 + $0x2b4] sm:$0xf0] }
 0x14a   : > { %v916_v61 = vpop.f32.mrf.mxu2  ;;  %1362 = vmatpush.bf16.msrb.mxu2 %v5661_v55  ;;  %v5824_v52 = vld [vmem:[#allocation2 + $0x2b0] sm:$0xf]  ;;  %v7655_v55 = vld [vmem:[#allocation2 + $0x2b4] sm:$0xf] }
 0x14b   : > { %1381 = vmatpush.bf16.msrb.mxu3 %v5725_v60  ;;  %v5825_v56 = vor.u32 %v7656_v53, %v5824_v52  ;;  %v5816_v60 = vld [vmem:[#allocation2 + $0x2a0] sm:$0xf]  ;;  %v7662_v52 = vld [vmem:[#allocation2 + $0x2e4] sm:$0xf0]  ;;  %v7645_v53 = vld [vmem:[#allocation2 + $0x264] sm:$0xf] }
 0x14c   : > { %v935_v1 = vpop.f32.mrf.mxu3  ;;  %v8424_v6 = vpop.f32.mrf.mxu0 }
 0x14d   : > { %v8422_v5 = vadd.f32 %v935_v1, %v916_v61  ;;  %v5665_v61 = vor.u32 %v7617_v57, %v5662_v58  ;;  %v5652_v1 = vld [vmem:[#allocation2 + $0x180] sm:$0xf]  ;;  %v5826_v57 = vld [vmem:[#allocation2 + $0x2b8] sm:$0xf0] }
 0x14e   : > { %v8426_v9 = vpop.f32.mrf.mxu1  ;;  %v5653_v13 = vor.u32 %v7616_v2, %v5652_v1  ;;  %v5829_v58 = vor.u32 %v7655_v55, %v5826_v57  ;;  %v5808_v1 = vld [vmem:[#allocation2 + $0x290] sm:$0xf]  ;;  %v7652_v2 = vld [vmem:[#allocation2 + $0x294] sm:$0xf0]  ;;  %v5786_v55 = vld [vmem:[#allocation2 + $0x268] sm:$0xf0] }
 0x14f   : > { %1400 = vmatpush.bf16.msra.mxu0 %v5665_v61  ;;  %1382 = vmatpush.bf16.msrb.mxu3 %v5717_v20  ;;  %v7654_v61 = vld [vmem:[#allocation2 + $0x2a4] sm:$0xf0]  ;;  %v5801_v20 = vor.u32 %v7650_v15, %v5800_v14  ;;  %v7659_v15 = vld [vmem:[#allocation2 + $0x2d4] sm:$0xf] }
 0x150   : > { %1363 = vmatpush.bf16.msrb.mxu2 %v5653_v13 }
 0x152   : > { %v8428_v28 = vpop.f32.mrf.mxu2 }
 0x153   : > { %1401 = vmatpush.bf16.msra.mxu0 %v5657_v21  ;;  %1484 = vmatpush.bf16.msra.mxu3 %v8332_v7  ;;  %v5802_v21 = vld [vmem:[#allocation2 + $0x288] sm:$0xf0] }
 0x154   : > { %v8430_v33 = vpop.f32.mrf.mxu3  ;;  %v1075_v41 = vpop.f32.mrf.mxu0  ;;  %1465 = vmatpush.bf16.msra.mxu2 %v8330_v3  ;;  %v5805_v23 = vor.u32 %v7649_v18, %v5802_v21  ;;  %v5842_v18 = vld [vmem:[#allocation2 + $0x2d8] sm:$0xf0] }
 0x155   : > { %v1076_v47 = vadd.f32 %v1075_v41, %v8408_v32  ;;  %v5729_v32 = vor.u32 %v7633_v62, %v5726_v63  ;;  %v7653_v62 = vld [vmem:[#allocation2 + $0x2a4] sm:$0xf]  ;;  %v5817_v63 = vor.u32 %v7654_v61, %v5816_v60  ;;  %v5850_v61 = vld [vmem:[#allocation2 + $0x2e8] sm:$0xf0]  ;;  %v5845_v21 = vor.u32 %v7659_v15, %v5842_v18 }
 0x156   : > { %v1094_v49 = vpop.f32.mrf.mxu1  ;;  %v7661_v60 = vld [vmem:[#allocation2 + $0x2e4] sm:$0xf] }
 0x157   : > { %v8433_v59 = vadd.f32 %v1094_v49, %v1076_v47  ;;  %1419 = vmatpush.bf16.msra.mxu1 %v5729_v32  ;;  %1485 = vmatpush.bf16.msra.mxu3 %v8339_v11  ;;  %v5818_v32 = vld [vmem:[#allocation2 + $0x2a8] sm:$0xf0] }
 0x158   : > { %1466 = vmatpush.bf16.msra.mxu2 %v8335_v10  ;;  %1654 = vmatpush.bf16.msrb.mxu0 %v5825_v56 }
 0x15a   : > { %v1113_v0 = vpop.f32.mrf.mxu2 }
 0x15b   : > { %v1114_v8 = vadd.f32 %v1113_v0, %v8410_v35  ;;  %1420 = vmatpush.bf16.msra.mxu1 %v5721_v29  ;;  %1486 = vmatpush.bf16.msra.mxu3 %v8347_v17  ;;  %v5821_v0 = vor.u32 %v7653_v62, %v5818_v32  ;;  %v7644_v32 = vld [vmem:[#allocation2 + $0x254] sm:$0xf0] }
 0x15c   : > { %v1132_v12 = vpop.f32.mrf.mxu3  ;;  %v8436_v19 = vpop.f32.mrf.mxu0  ;;  %1467 = vmatpush.bf16.msra.mxu2 %v8343_v16  ;;  %1655 = vmatpush.bf16.msrb.mxu0 %v5817_v63  ;;  %v5853_v63 = vor.u32 %v7661_v60, %v5850_v61 }
 0x15d   : > { %v8438_v24 = vadd.f32 %v1132_v12, %v1114_v8  ;;  %v5809_v8 = vor.u32 %v7652_v2, %v5808_v1  ;;  %v5810_v12 = vld [vmem:[#allocation2 + $0x298] sm:$0xf0] }
 0x15e   : > { %v8440_v25 = vpop.f32.mrf.mxu1  ;;  %v5813_v13 = vor.u32 %v7651_v4, %v5810_v12  ;;  %v7660_v4 = vld [vmem:[#allocation2 + $0x2d4] sm:$0xf0]  ;;  %v5778_v12 = vld [vmem:[#allocation2 + $0x258] sm:$0xf0] }
 0x15f   : > { %1487 = vmatpush.bf16.msra.mxu3 %v8355_v27 }
 0x160   : > { %1468 = vmatpush.bf16.msra.mxu2 %v8351_v26  ;;  %1656 = vmatpush.bf16.msrb.mxu0 %v5809_v8  ;;  %v7643_v8 = vld [vmem:[#allocation2 + $0x254] sm:$0xf] }
 0x161   : > { %v5781_v14 = vor.u32 %v7643_v8, %v5778_v12 }
 0x162   : > { %v8444_v35 = vpop.f32.mrf.mxu2 }
 0x164   : > { %v8446_v30 = vpop.f32.mrf.mxu3  ;;  %v1080_v31 = vpop.f32.mrf.mxu0  ;;  %1657 = vmatpush.bf16.msrb.mxu0 %v5801_v20 }
 0x165   : > { %v1081_v34 = vadd.f32 %v1080_v31, %v8420_v54 }
 0x166   : > { %v1099_v38 = vpop.f32.mrf.mxu1 }
 0x167   : > { %v8451_v39 = vadd.f32 %v1099_v38, %v1081_v34  ;;  %v5792_v34 = vld [vmem:[#allocation2 + $0x270] sm:$0xf]  ;;  %v7648_v38 = vld [vmem:[#allocation2 + $0x274] sm:$0xf0] }
 0x16a   : > { %v1118_v3 = vpop.f32.mrf.mxu2 }
 0x16b   : > { %v1119_v7 = vadd.f32 %v1118_v3, %v8422_v5  ;;  %v5856_v3 = vld [vmem:[#allocation2 + $0x2f0] sm:$0xf] }
 0x16c   : > { %v1137_v40 = vpop.f32.mrf.mxu3  ;;  %v8457_v41 = vpop.f32.mrf.mxu0 }
 0x16d   : > { %v8460_v10 = vadd.f32 %v1137_v40, %v1119_v7  ;;  %v5793_v40 = vor.u32 %v7648_v38, %v5792_v34  ;;  %v5832_v34 = vld [vmem:[#allocation2 + $0x2c0] sm:$0xf] }
 0x16e   : > { %v8462_v11 = vpop.f32.mrf.mxu1 }
 0x16f   : > { %1658 = vmatpush.bf16.msrb.mxu0 %v5793_v40  ;;  %v5770_v40 = vld [vmem:[#allocation2 + $0x248] sm:$0xf0] }
 0x172   : > { %v8478_v22 = vpop.f32.mrf.mxu2 }
 0x174   : > { %v1172_v54 = vpop.f32.mrf.mxu0  ;;  %v8480_v29 = vpop.f32.mrf.mxu3 }
 0x176   : > { %v1191_v42 = vpop.f32.mrf.mxu1 }
 0x17c   : > { %v1174_v43 = vpop.f32.mrf.mxu0 }
 0x17d   : > { %v1201_v16 = vpack.c.bf16 %v1174_v43, %v1172_v54  ;;  %v7664_v54 = vld [vmem:[#allocation2 + $0x2f4] sm:$0xf0]  ;;  %v5794_v43 = vld [vmem:[#allocation2 + $0x278] sm:$0xf0] }
 0x17e   : > { %v1193_v45 = vpop.f32.mrf.mxu1 }
 0x17f   : > { %v1202_v17 = vpack.c.bf16 %v1193_v45, %v1191_v42  ;;  %1364 = vmatmul.bf16.vlgmr.msrb.gmra.mxu2 %v1201_v16  ;;  %1402 = vmatmul.bf16.vlgmr.msra.gmra.mxu0 %v1201_v16  ;;  %v7647_v42 = vld [vmem:[#allocation2 + $0x274] sm:$0xf]  ;;  %v5857_v45 = vor.u32 %v7664_v54, %v5856_v3  ;;  %v7658_v3 = vld [vmem:[#allocation2 + $0x2c4] sm:$0xf0] }
 0x180   : > { %1692 = vmatpush.bf16.msrb.mxu2 %v5829_v58  ;;  %v5789_v58 = vor.u32 %v7645_v53, %v5786_v55 }
 0x181   : > { %5746 = vmatmul.msk.bf16.vlgmr.msrb.gmra.mxu3 %vm577_vm0, %v1202_v17  ;;  %5748 = vmatmul.msk.bf16.vlgmr.msra.gmra.mxu1 %vm577_vm0, %v1202_v17  ;;  %v5797_v17 = vor.u32 %v7647_v42, %v5794_v43  ;;  %v5833_v42 = vor.u32 %v7658_v3, %v5832_v34 }
 0x182   : > { %1677 = vmatpush.bf16.msrb.mxu1 %v5857_v45  ;;  %v5834_v45 = vld [vmem:[#allocation2 + $0x2c8] sm:$0xf0] }
 0x184   : > { %v1177_v26 = vpop.f32.mrf.mxu0  ;;  %1693 = vmatpush.bf16.msrb.mxu2 %v5821_v0  ;;  %v5840_v0 = vld [vmem:[#allocation2 + $0x2d0] sm:$0xf] }
 0x186   : > { %v1196_v5 = vpop.f32.mrf.mxu1 }
 0x188   : > { %1694 = vmatpush.bf16.msrb.mxu2 %v5813_v13  ;;  %v5841_v13 = vor.u32 %v7660_v4, %v5840_v0 }
 0x18c   : > { %v1179_v46 = vpop.f32.mrf.mxu0  ;;  %1695 = vmatpush.bf16.msrb.mxu2 %v5805_v23  ;;  %v5768_v23 = vld [vmem:[#allocation2 + $0x240] sm:$0xf] }
 0x18d   : > { %v1203_v47 = vpack.c.bf16 %v1179_v46, %v1177_v26  ;;  %v7663_v26 = vld [vmem:[#allocation2 + $0x2f4] sm:$0xf] }
 0x18e   : > { %v1198_v27 = vpop.f32.mrf.mxu1 }
 0x18f   : > { %v1204_v49 = vpack.c.bf16 %v1198_v27, %v1196_v5  ;;  %1369 = vmatmul.bf16.gmra.mxu2 %v1203_v47  ;;  %1407 = vmatmul.bf16.gmra.mxu0 %v1203_v47  ;;  %v5858_v5 = vld [vmem:[#allocation2 + $0x2f8] sm:$0xf0]  ;;  %v5784_v47 = vld [vmem:[#allocation2 + $0x260] sm:$0xf] }
 0x190   : > { %v5861_v46 = vor.u32 %v7663_v26, %v5858_v5  ;;  %1696 = vmatpush.bf16.msrb.mxu2 %v5797_v17 }
 0x191   : > { %5747 = vmatmul.msk.bf16.gmra.mxu3 %vm577_vm0, %v1204_v49  ;;  %5749 = vmatmul.msk.bf16.gmra.mxu1 %vm577_vm0, %v1204_v49  ;;  %v7646_v49 = vld [vmem:[#allocation2 + $0x264] sm:$0xf0] }
 0x192   : > { %1715 = vmatpush.bf16.msrb.mxu3 %v5861_v46 }
 0x194   : > { %1697 = vmatpush.bf16.msrb.mxu2 %v5789_v58 }
 0x196   : > { %1716 = vmatpush.bf16.msrb.mxu3 %v5853_v63 }
 0x198   : > { %1698 = vmatpush.bf16.msrb.mxu2 %v5781_v14 }
 0x19a   : > { %1717 = vmatpush.bf16.msrb.mxu3 %v5845_v21  ;;  %v895_v21 = vadd.f32 %v8414_v37, %v8412_v36 }
 0x19f   : > { %5762 = vmatmul.msk.bf16.vlgmr.msra.gmra.mxu2 %vm577_vm0, %v7639_v50 }
 0x1a1   : > { %5764 = vmatmul.msk.bf16.vlgmr.msra.gmra.mxu3 %vm577_vm0, %v7639_v50  ;;  %v5848_v50 = vld [vmem:[#allocation2 + $0x2e0] sm:$0xf] }
 0x1a2   : > { %v5849_v57 = vor.u32 %v7662_v52, %v5848_v50 }
 0x1a4   : > { %1678 = vmatpush.bf16.msrb.mxu1 %v5849_v57 }
 0x1a8   : > { %1679 = vmatpush.bf16.msrb.mxu1 %v5841_v13 }
 0x1ac   : > { %1680 = vmatpush.bf16.msrb.mxu1 %v5833_v42 }
 0x1af   : > { %5763 = vmatmul.msk.bf16.gmra.mxu2 %vm577_vm0, %v7640_v51 }
 0x1b1   : > { %5765 = vmatmul.msk.bf16.gmra.mxu3 %vm577_vm0, %v7640_v51  ;;  %v5785_v51 = vor.u32 %v7646_v49, %v5784_v47 }
 0x1b3   : > { %1659 = vmatpush.bf16.msrb.mxu0 %v5785_v51 }
 0x1fc   : > { %v1403_v31 = vpop.f32.mrf.mxu0 }
 0x1fe   : > { %v1422_v7 = vpop.f32.mrf.mxu1 }
 0x1ff   : > { %v1423_v16 = vadd.f32 %v1422_v7, %v1403_v31  ;;  %v7642_v31 = vld [vmem:[#allocation2 + $0x244] sm:$0xf0]  ;;  %v7641_v7 = vld [vmem:[#allocation2 + $0x244] sm:$0xf] }
 0x200   : > { %v5769_v38 = vor.u32 %v7642_v31, %v5768_v23  ;;  %v5773_v43 = vor.u32 %v7641_v7, %v5770_v40  ;;  %v1078_v31 = vadd.f32 %v8436_v19, %v895_v21  ;;  %v900_v40 = vadd.f32 %v8426_v9, %v8424_v6  ;;  %v5970_v21 = vld [vmem:[%s9464_s5 + $0x170] sm:$0xf] }
 0x201   : > { %v8483_v27 = vadd.f32 %v1423_v16, %v8438_v24  ;;  %v5776_v24 = vld [vmem:[#allocation2 + $0x250] sm:$0xf]  ;;  %v7657_v16 = vld [vmem:[#allocation2 + $0x2c4] sm:$0xf] }
 0x202   : > { %v1365_v56 = vpop.f32.mrf.mxu2  ;;  %v5777_v2 = vor.u32 %v7644_v32, %v5776_v24  ;;  %1699 = vmatpush.bf16.msrb.mxu2 %v5773_v43  ;;  %v933_v43 = vadd.f32 %v8418_v48, %v8416_v44  ;;  %v938_v44 = vadd.f32 %v8430_v33, %v8428_v28 }
 0x204   : > { %v1384_v62 = vpop.f32.mrf.mxu3  ;;  %1660 = vmatpush.bf16.msrb.mxu0 %v5777_v2  ;;  %v1405_v24 = vpop.f32.mrf.mxu0  ;;  %v1116_v36 = vadd.f32 %v8444_v35, %v933_v43 }
 0x205   : > { %v1385_v1 = vadd.f32 %v1384_v62, %v1365_v56 }
 0x206   : > { %v1424_v32 = vpop.f32.mrf.mxu1 }
 0x207   : > { %v8486_v20 = vadd.f32 %v1385_v1, %v8433_v59  ;;  %v5837_v59 = vor.u32 %v7657_v16, %v5834_v45  ;;  %v1097_v16 = vadd.f32 %v8440_v25, %v1078_v31  ;;  %v7713_v31 = vld [vmem:[%s9464_s5 + $0x174] sm:$0xf] }
 0x208   : > { %1661 = vmatpush.bf16.msrb.mxu0 %v5769_v38 }
 0x209   : > { %1718 = vmatpush.bf16.msrb.mxu3 %v5837_v59  ;;  %v1083_v59 = vadd.f32 %v8457_v41, %v900_v40  ;;  %v1425_v41 = vadd.f32 %v1424_v32, %v1405_v24 }
 0x20a   : > { %v1367_v54 = vpop.f32.mrf.mxu2 }
 0x20c   : > { %v1386_v17 = vpop.f32.mrf.mxu3  ;;  %v1408_v0 = vpop.f32.mrf.mxu0 }
 0x20d   : > { %v1387_v3 = vadd.f32 %v1386_v17, %v1367_v54  ;;  %v1738_v54 = vld [vmem:[%s9462_s3] sm:$0x3] }
 0x20e   : > { %v1427_v1 = vpop.f32.mrf.mxu1 }
 0x20f   : > { %v1434_v37 = vadd.f32 %v1387_v3, %v1097_v16  ;;  %v1428_v19 = vadd.f32 %v1427_v1, %v1408_v0  ;;  %v5962_v16 = vld [vmem:[%s9464_s5 + $0x160] sm:$0xf] }
 0x212   : > { %v1370_v26 = vpop.f32.mrf.mxu2 }
 0x214   : > { %v1389_v5 = vpop.f32.mrf.mxu3  ;;  %v1410_v2 = vpop.f32.mrf.mxu0 }
 0x215   : > { %v1390_v46 = vadd.f32 %v1389_v5, %v1370_v26  ;;  %v1102_v5 = vadd.f32 %v8462_v11, %v1083_v59 }
 0x216   : > { %v1429_v4 = vpop.f32.mrf.mxu1 }
 0x217   : > { %v1436_v47 = vadd.f32 %v1390_v46, %v8451_v39  ;;  %v1740_v46 = vperm.slane %v1738_v54, 0 }
 0x21a   : > { %v1372_v49 = vpop.f32.mrf.mxu2 }
 0x21c   : > { %v1391_v50 = vpop.f32.mrf.mxu3 }
 0x21d   : > { %v1392_v17 = vadd.f32 %v1391_v50, %v1372_v49 }
 0x21f   : > { %v1438_v50 = vadd.f32 %v1392_v17, %v1102_v5  ;;  %v5964_v17 = vld [vmem:[%s9464_s5 + $0x168] sm:$0xf0] }
 0x222   : > { %v1470_v51 = vpop.f32.mrf.mxu2 }
 0x224   : > { %v1489_v52 = vpop.f32.mrf.mxu3 }
 0x22a   : > { %v1472_v53 = vpop.f32.mrf.mxu2 }
 0x22b   : > { %v1499_v55 = vpack.c.bf16 %v1472_v53, %v1470_v51  ;;  %v1121_v53 = vadd.f32 %v8478_v22, %v938_v44 }
 0x22c   : > { %v1491_v56 = vpop.f32.mrf.mxu3 }
 0x22d   : > { %v1500_v57 = vpack.c.bf16 %v1491_v56, %v1489_v52  ;;  %1662 = vmatmul.bf16.vlgmr.msrb.gmra.mxu0 %v1499_v55  ;;  %1700 = vmatmul.bf16.vlgmr.msrb.gmra.mxu2 %v1499_v55  ;;  %v1135_v52 = vadd.f32 %v8446_v30, %v1116_v36  ;;  %v1437_v55 = vadd.f32 %v1428_v19, %v8460_v10 }
 0x22f   : > { %5862 = vmatmul.msk.bf16.vlgmr.msrb.gmra.mxu1 %vm577_vm0, %v1500_v57  ;;  %5864 = vmatmul.msk.bf16.vlgmr.msrb.gmra.mxu3 %vm577_vm0, %v1500_v57  ;;  %v1430_v57 = vadd.f32 %v1429_v4, %v1410_v2 }
 0x232   : > { %v1475_v58 = vpop.f32.mrf.mxu2 }
 0x234   : > { %v1494_v60 = vpop.f32.mrf.mxu3 }
 0x23a   : > { %v1477_v61 = vpop.f32.mrf.mxu2 }
 0x23b   : > { %v1501_v63 = vpack.c.bf16 %v1477_v61, %v1475_v58 }
 0x23c   : > { %v1496_v62 = vpop.f32.mrf.mxu3 }
 0x23d   : > { %v1502_v39 = vpack.c.bf16 %v1496_v62, %v1494_v60  ;;  %1667 = vmatmul.bf16.gmra.mxu0 %v1501_v63  ;;  %1705 = vmatmul.bf16.gmra.mxu2 %v1501_v63  ;;  %v1435_v60 = vadd.f32 %v1425_v41, %v1135_v52  ;;  %v1140_v63 = vadd.f32 %v8480_v29, %v1121_v53  ;;  %v7730_v41 = vld [vmem:[%s9464_s5 + $0x1f4] sm:$0xf0] }
 0x23f   : > { %5863 = vmatmul.msk.bf16.gmra.mxu1 %vm577_vm0, %v1502_v39  ;;  %5865 = vmatmul.msk.bf16.gmra.mxu3 %vm577_vm0, %v1502_v39  ;;  %v1741_v39 = vperm.slane %v1738_v54, 1  ;;  %v7711_v54 = vld [vmem:[%s9464_s5 + $0x164] sm:$0xf]  ;;  %vm4107_vm0 = vcmask 1043456  }
 0x240   : > { %v5967_v53 = vor.u32 %v7711_v54, %v5964_v17 }
 0x2aa   : > { %v1663_v8 = vpop.f32.mrf.mxu0 }
 0x2ac   : > { %v1682_v12 = vpop.f32.mrf.mxu1 }
 0x2ad   : > { %v1683_v26 = vadd.f32 %v1682_v12, %v1663_v8 }
 0x2b0   : > { %v1701_v13 = vpop.f32.mrf.mxu2 }
 0x2b2   : > { %v1720_v14 = vpop.f32.mrf.mxu3  ;;  %v1665_v15 = vpop.f32.mrf.mxu0 }
 0x2b3   : > { %v1721_v58 = vadd.f32 %v1720_v14, %v1701_v13 }
 0x2b4   : > { %v1684_v18 = vpop.f32.mrf.mxu1 }
 0x2b5   : > { %v1685_v45 = vadd.f32 %v1684_v18, %v1665_v15  ;;  %v1731_v0 = vadd.f32 %v1721_v58, %v8483_v27  ;;  %v7714_v27 = vld [vmem:[%s9464_s5 + $0x174] sm:$0xf0] }
 0x2b6   : > { %v5971_v43 = vor.u32 %v7714_v27, %v5970_v21  ;;  %v6010_v21 = vld [vmem:[%s9464_s5 + $0x1c0] sm:$0xf]  ;;  %v7724_v27 = vld [vmem:[%s9464_s5 + $0x1c4] sm:$0xf0] }
 0x2b7   : > { %v1732_v48 = vadd.f32 %v1685_v45, %v1434_v37  ;;  %v7712_v45 = vld [vmem:[%s9464_s5 + $0x164] sm:$0xf0] }
 0x2b8   : > { %v1703_v23 = vpop.f32.mrf.mxu2  ;;  %v7698_v37 = vld [vmem:[%s9463_s4 + $0x8] sm:$0xff]  ;;  %v5963_v52 = vor.u32 %v7712_v45, %v5962_v16  ;;  %v7703_v16 = vld [vmem:[%s9464_s5 + $0x124] sm:$0xf] }
 0x2b9   : > { %v1746_v11 = vadd.f32 %v1740_v46, %v1732_v48  ;;  %v7665_v48 = vld [vmem:[%s9463_s4] sm:$0xff]  ;;  %v5932_v45 = vld [vmem:[%s9464_s5 + $0x128] sm:$0xf0] }
 0x2ba   : > { %v1722_v34 = vpop.f32.mrf.mxu3  ;;  %v1668_v38 = vpop.f32.mrf.mxu0  ;;  %v5935_v17 = vor.u32 %v7703_v16, %v5932_v45 }
 0x2bb   : > { %v1723_v56 = vadd.f32 %v1722_v34, %v1703_v23  ;;  %v1762_v1 = vmul.f32 0.2, %v1746_v11  ;;  %vm1754_vm4 = vcmp.ge.f32.partialorder %v1746_v11, 0.0  ;;  %v5972_v34 = vld [vmem:[%s9464_s5 + $0x178] sm:$0xf0] }
 0x2bc   : > { %v1687_v7 = vpop.f32.mrf.mxu1  ;;  %v5975_v19 = vor.u32 %v7713_v31, %v5972_v34  ;;  %v7723_v31 = vld [vmem:[%s9464_s5 + $0x1c4] sm:$0xf]  ;;  %v6012_v34 = vld [vmem:[%s9464_s5 + $0x1c8] sm:$0xf0] }
 0x2bd   : > { %v1688_v42 = vadd.f32 %v1687_v7, %v1668_v38  ;;  %v1733_v22 = vadd.f32 %v1723_v56, %v1435_v60  ;;  %v1745_v38 = vadd.f32 %v1741_v39, %v1731_v0  ;;  %v1770_v40 = vsel %vm1754_vm4, %v1746_v11, %v1762_v1  ;;  %v7728_v11 = vld [vmem:[%s9464_s5 + $0x1e4] sm:$0xf0]  ;;  %v7727_v60 = vld [vmem:[%s9464_s5 + $0x1e4] sm:$0xf]  ;;  %v7726_v0 = vld [vmem:[%s9464_s5 + $0x1d4] sm:$0xf0] }
 0x2be   : > { %v7725_v1 = vld [vmem:[%s9464_s5 + $0x1d4] sm:$0xf] }
 0x2bf   : > { %v1734_v6 = vadd.f32 %v1688_v42, %v1436_v47  ;;  %v1730_v47 = vadd.f32 %v1683_v26, %v8486_v20  ;;  %v1439_v20 = vadd.f32 %v1430_v57, %v1140_v63  ;;  %v1747_v29 = vadd.f32 %v1741_v39, %v1733_v22  ;;  %v6026_v57 = vld [vmem:[%s9464_s5 + $0x1e0] sm:$0xf] }
 0x2c0   : > { %v1706_v9 = vpop.f32.mrf.mxu2  ;;  %vm1753_vm9 = vcmp.ge.f32.partialorder %v1745_v38, 0.0  ;;  %v6027_v22 = vor.u32 %v7728_v11, %v6026_v57  ;;  %v6098_v57 = vld [vmem:[%s9464_s5 + $0x70] sm:$0xf]  ;;  %v7681_v11 = vld [vmem:[%s9464_s5 + $0x74] sm:$0xf0] }
 0x2c1   : > { %v1748_v28 = vadd.f32 %v1740_v46, %v1734_v6  ;;  %v1744_v30 = vadd.f32 %v1740_v46, %v1730_v47  ;;  %v1763_v59 = vmul.f32 0.2, %v1747_v29  ;;  %vm1755_vm7 = vcmp.ge.f32.partialorder %v1747_v29, 0.0  ;;  %v7710_v47 = vld [vmem:[%s9464_s5 + $0x154] sm:$0xf0] }
 0x2c2   : > { %v1725_v25 = vpop.f32.mrf.mxu3  ;;  %v1670_v51 = vpop.f32.mrf.mxu0  ;;  %v1761_v6 = vmul.f32 0.2, %v1745_v38 }
 0x2c3   : > { %v1726_v35 = vadd.f32 %v1725_v25, %v1706_v9  ;;  %v1764_v24 = vmul.f32 0.2, %v1748_v28  ;;  %vm1756_vm1 = vcmp.ge.f32.partialorder %v1748_v28, 0.0  ;;  %vm1752_vm3 = vcmp.ge.f32.partialorder %v1744_v30, 0.0  ;;  %v6034_v25 = vld [vmem:[%s9464_s5 + $0x1f0] sm:$0xf] }
 0x2c4   : > { %v1689_v49 = vpop.f32.mrf.mxu1  ;;  %v1760_v13 = vmul.f32 0.2, %v1744_v30 }
 0x2c5   : > { %v1690_v33 = vadd.f32 %v1689_v49, %v1670_v51  ;;  %v1735_v61 = vadd.f32 %v1726_v35, %v1437_v55  ;;  %v1772_v15 = vsel %vm1756_vm1, %v1748_v28, %v1764_v24  ;;  %v6036_v35 = vld [vmem:[%s9464_s5 + $0x1f8] sm:$0xf0]  ;;  %v1771_v51 = vsel %vm1755_vm7, %v1747_v29, %v1763_v59  ;;  %v5954_v55 = vld [vmem:[%s9464_s5 + $0x150] sm:$0xf]  ;;  %v7709_v28 = vld [vmem:[%s9464_s5 + $0x154] sm:$0xf] }
 0x2c6   : > { %v1768_v42 = vsel %vm1752_vm3, %v1744_v30, %v1760_v13  ;;  %v1769_v49 = vsel %vm1753_vm9, %v1745_v38, %v1761_v6  ;;  %v5946_v30 = vld [vmem:[%s9464_s5 + $0x140] sm:$0xf]  ;;  %v7706_v13 = vld [vmem:[%s9464_s5 + $0x134] sm:$0xf0]  ;;  %v6002_v59 = vld [vmem:[%s9464_s5 + $0x1b0] sm:$0xf] }
 0x2c7   : > { %v1736_v62 = vadd.f32 %v1690_v33, %v1438_v50  ;;  %v1749_v2 = vadd.f32 %v1741_v39, %v1735_v61  ;;  %v8541_v26 = vpack.c.bf16 %v1770_v40, %v1768_v42  ;;  %v6035_v50 = vor.u32 %v7730_v41, %v6034_v25  ;;  %v5956_v33 = vld [vmem:[%s9464_s5 + $0x158] sm:$0xf0]  ;;  %v6028_v61 = vld [vmem:[%s9464_s5 + $0x1e8] sm:$0xf0]  ;;  %v7704_v40 = vld [vmem:[%s9464_s5 + $0x124] sm:$0xf0] }
 0x2c8   : > { %v1708_v32 = vpop.f32.mrf.mxu2  ;;  %v8590_v58 = vpack.c.bf16 %v1771_v51, %v1769_v49  ;;  %v5959_v63 = vor.u32 %v7709_v28, %v5956_v33  ;;  %v6031_v24 = vor.u32 %v7727_v60, %v6028_v61  ;;  %v6011_v42 = vor.u32 %v7724_v27, %v6010_v21  ;;  %v5922_v6 = vld [vmem:[%s9464_s5 + $0x110] sm:$0xf]  ;;  %v7701_v25 = vld [vmem:[%s9464_s5 + $0x114] sm:$0xf]  ;;  %v5924_v41 = vld [vmem:[%s9464_s5 + $0x118] sm:$0xf0] }
 0x2c9   : > { %v1750_v10 = vadd.f32 %v1740_v46, %v1736_v62  ;;  %v1765_v3 = vmul.f32 0.2, %v1749_v2  ;;  %vm1757_vm5 = vcmp.ge.f32.partialorder %v1749_v2, 0.0  ;;  %v7729_v46 = vld [vmem:[%s9464_s5 + $0x1f4] sm:$0xf]  ;;  %v5955_v62 = vor.u32 %v7710_v47, %v5954_v55 }
 0x2ca   : > { %v1727_v8 = vpop.f32.mrf.mxu3  ;;  %v6039_v56 = vor.u32 %v7729_v46, %v6036_v35  ;;  %v5994_v46 = vld [vmem:[%s9464_s5 + $0x1a0] sm:$0xf]  ;;  %v7720_v35 = vld [vmem:[%s9464_s5 + $0x1a4] sm:$0xf0]  ;;  %v7719_v51 = vld [vmem:[%s9464_s5 + $0x1a4] sm:$0xf]  ;;  %v5927_v55 = vor.u32 %v7701_v25, %v5924_v41 }
 0x2cb   : > { %vm1758_vm2 = vcmp.ge.f32.partialorder %v1750_v10, 0.0  ;;  %v1766_v4 = vmul.f32 0.2, %v1750_v10  ;;  %v1728_v12 = vadd.f32 %v1727_v8, %v1708_v32  ;;  %v1773_v9 = vsel %vm1757_vm5, %v1749_v2, %v1765_v3  ;;  %v5948_v32 = vld [vmem:[%s9464_s5 + $0x148] sm:$0xf0] }
 0x2cc   : > { %v6020_v8 = vld [vmem:[%s9464_s5 + $0x1d8] sm:$0xf0]  ;;  %v5914_v47 = vld [vmem:[%s9464_s5 + $0x100] sm:$0xf]  ;;  %v7700_v49 = vld [vmem:[%s9464_s5 + $0x104] sm:$0xf0] }
 0x2cd   : > { %v1737_v14 = vadd.f32 %v1728_v12, %v1439_v20  ;;  %v1774_v18 = vsel %vm1758_vm2, %v1750_v10, %v1766_v4  ;;  %v7707_v10 = vld [vmem:[%s9464_s5 + $0x144] sm:$0xf]  ;;  %v6018_v20 = vld [vmem:[%s9464_s5 + $0x1d0] sm:$0xf]  ;;  %v5916_v33 = vld [vmem:[%s9464_s5 + $0x108] sm:$0xf0] }
 0x2ce   : > { %v8521_v23 = vpack.c.bf16 %v1774_v18, %v1772_v15  ;;  %v5951_v4 = vor.u32 %v7707_v10, %v5948_v32  ;;  %v5938_v12 = vld [vmem:[%s9464_s5 + $0x130] sm:$0xf]  ;;  %v6019_v29 = vor.u32 %v7726_v0, %v6018_v20  ;;  %v7705_v15 = vld [vmem:[%s9464_s5 + $0x134] sm:$0xf]  ;;  %v5940_v18 = vld [vmem:[%s9464_s5 + $0x138] sm:$0xf0]  ;;  %v6099_v10 = vor.u32 %v7681_v11, %v6098_v57 }
 0x2cf   : > { %v1751_v7 = vadd.f32 %v1741_v39, %v1737_v14  ;;  %v7708_v39 = vld [vmem:[%s9464_s5 + $0x144] sm:$0xf0]  ;;  %v6023_v14 = vor.u32 %v7725_v1, %v6020_v8  ;;  %v5939_v38 = vor.u32 %v7706_v13, %v5938_v12  ;;  %v5943_v3 = vor.u32 %v7705_v15, %v5940_v18  ;;  %v7680_v60 = vld [vmem:[%s9464_s5 + $0x74] sm:$0xf]  ;;  %v6100_v61 = vld [vmem:[%s9464_s5 + $0x78] sm:$0xf0] }
 0x2d0   : > { %1797 = vmatpush.bf16.msra.mxu0 %v8521_v23  ;;  %1870 = vmatpush.bf16.msra.mxu2 %v8521_v23  ;;  %v5947_v2 = vor.u32 %v7708_v39, %v5946_v30  ;;  %v7717_v30 = vld [vmem:[%s9464_s5 + $0x194] sm:$0xf]  ;;  %v5988_v39 = vld [vmem:[%s9464_s5 + $0x198] sm:$0xf0]  ;;  %v6103_v32 = vor.u32 %v7680_v60, %v6100_v61  ;;  %v6090_v20 = vld [vmem:[%s9464_s5 + $0x60] sm:$0xf] }
 0x2d1   : > { %vm1759_vm6 = vcmp.ge.f32.partialorder %v1751_v7, 0.0  ;;  %v1767_v36 = vmul.f32 0.2, %v1751_v7  ;;  %v7679_v0 = vld [vmem:[%s9464_s5 + $0x64] sm:$0xf0]  ;;  %vm4103_vm1 = vcmask 64512  }
 0x2d2   : > { %v7678_v1 = vld [vmem:[%s9464_s5 + $0x64] sm:$0xf]  ;;  %v5978_v12 = vld [vmem:[%s9464_s5 + $0x180] sm:$0xf]  ;;  %v7716_v13 = vld [vmem:[%s9464_s5 + $0x184] sm:$0xf0] }
 0x2d3   : > { %v1775_v44 = vsel %vm1759_vm6, %v1751_v7, %v1767_v36  ;;  %v5930_v7 = vld [vmem:[%s9464_s5 + $0x120] sm:$0xf]  ;;  %v7722_v36 = vld [vmem:[%s9464_s5 + $0x1b4] sm:$0xf0]  ;;  %v6162_v15 = vld [vmem:[%s9464_s5 + $0xf0] sm:$0xf] }
 0x2d4   : > { %1798 = vmatpush.bf16.msra.mxu0 %v8541_v26  ;;  %1871 = vmatpush.bf16.msra.mxu2 %v8541_v26  ;;  %v8558_v5 = vpack.c.bf16 %v1775_v44, %v1773_v9  ;;  %v5931_v54 = vor.u32 %v7704_v40, %v5930_v7  ;;  %v7702_v9 = vld [vmem:[%s9464_s5 + $0x114] sm:$0xf0]  ;;  %v6003_v44 = vor.u32 %v7722_v36, %v6002_v59  ;;  %v7696_v21 = vld [vmem:[%s9464_s5 + $0xf4] sm:$0xf]  ;;  %v6164_v27 = vld [vmem:[%s9464_s5 + $0xf8] sm:$0xf0] }
 0x2d5   : > { %v7697_v18 = vld [vmem:[%s9464_s5 + $0xf4] sm:$0xf0]  ;;  %v6167_v45 = vor.u32 %v7696_v21, %v6164_v27  ;;  %v6154_v59 = vld [vmem:[%s9464_s5 + $0xe0] sm:$0xf]  ;;  %v7695_v36 = vld [vmem:[%s9464_s5 + $0xe4] sm:$0xf0] }
 0x2d6   : > { %1811 = vmatpush.bf16.msra.mxu1 %v8558_v5  ;;  %1884 = vmatpush.bf16.msra.mxu3 %v8558_v5  ;;  %v7677_v40 = vld [vmem:[%s9464_s5 + $0x54] sm:$0xf0]  ;;  %v6163_v16 = vor.u32 %v7697_v18, %v6162_v15  ;;  %v6155_v25 = vor.u32 %v7695_v36, %v6154_v59  ;;  %v6138_v60 = vld [vmem:[%s9464_s5 + $0xc0] sm:$0xf]  ;;  %v7691_v61 = vld [vmem:[%s9464_s5 + $0xc4] sm:$0xf0] }
 0x2d7   : > { %5878 = vmatmul.msk.bf16.vlgmr.msra.gmra.mxu2 %vm1787_vm8, %v7698_v37  ;;  %5870 = vmatmul.msk.bf16.vlgmr.msra.gmra.mxu0 %vm1787_vm8, %v7665_v48  ;;  %v7668_v15 = vld [vmem:[%s9464_s5 + $0x14] sm:$0xf]  ;;  %v6052_v21 = vld [vmem:[%s9464_s5 + $0x18] sm:$0xf0]  ;;  %v6044_v59 = vld [vmem:[%s9464_s5 + $0x8] sm:$0xf0] }
 0x2d8   : > { %2087 = vmatpush.bf16.msrb.mxu0 %v5971_v43  ;;  %2115 = vmatpush.bf16.msrb.mxu2 %v5975_v19  ;;  %v6015_v43 = vor.u32 %v7723_v31, %v6012_v34  ;;  %v6004_v19 = vld [vmem:[%s9464_s5 + $0x1b8] sm:$0xf0]  ;;  %v6091_v31 = vor.u32 %v7679_v0, %v6090_v20  ;;  %v6060_v20 = vld [vmem:[%s9464_s5 + $0x28] sm:$0xf0]  ;;  %v6130_v0 = vld [vmem:[%s9464_s5 + $0xb0] sm:$0xf]  ;;  %v6055_v27 = vor.u32 %v7668_v15, %v6052_v21 }
 0x2d9   : > { %v6306_v15 = vld [vmem:[%s9464_s5 + $0x2c0] sm:$0xf] }
 0x2da   : > { %1812 = vmatpush.bf16.msra.mxu1 %v8590_v58  ;;  %1885 = vmatpush.bf16.msra.mxu3 %v8590_v58 }
 0x2dc   : > { %2088 = vmatpush.bf16.msrb.mxu0 %v5963_v52  ;;  %2116 = vmatpush.bf16.msrb.mxu2 %v5967_v53  ;;  %v5996_v52 = vld [vmem:[%s9464_s5 + $0x1a8] sm:$0xf0]  ;;  %v5923_v53 = vor.u32 %v7702_v9, %v5922_v6  ;;  %v6074_v6 = vld [vmem:[%s9464_s5 + $0x40] sm:$0xf]  ;;  %v7675_v9 = vld [vmem:[%s9464_s5 + $0x44] sm:$0xf0] }
 0x2dd   : > { %5879 = vmatmul.msk.bf16.vlgmr.msra.gmra.mxu3 %vm1787_vm8, %v7698_v37  ;;  %5871 = vmatmul.msk.bf16.vlgmr.msra.gmra.mxu1 %vm1787_vm8, %v7665_v48  ;;  %v7721_v37 = vld [vmem:[%s9464_s5 + $0x1b4] sm:$0xf]  ;;  %v5999_v28 = vor.u32 %v7719_v51, %v5996_v52  ;;  %v6148_v52 = vld [vmem:[%s9464_s5 + $0xd8] sm:$0xf0] }
 0x2de   : > { %2101 = vmatpush.bf16.msrb.mxu1 %v6035_v50  ;;  %2129 = vmatpush.bf16.msrb.mxu3 %v6039_v56  ;;  %v6007_v48 = vor.u32 %v7721_v37, %v6004_v19  ;;  %v7699_v50 = vld [vmem:[%s9464_s5 + $0x104] sm:$0xf]  ;;  %v5995_v56 = vor.u32 %v7720_v35, %v5994_v46  ;;  %v6156_v19 = vld [vmem:[%s9464_s5 + $0xe8] sm:$0xf0]  ;;  %v6146_v46 = vld [vmem:[%s9464_s5 + $0xd0] sm:$0xf] }
 0x2df   : > { %v7694_v37 = vld [vmem:[%s9464_s5 + $0xe4] sm:$0xf]  ;;  %v7693_v35 = vld [vmem:[%s9464_s5 + $0xd4] sm:$0xf0]  ;;  %v7692_v51 = vld [vmem:[%s9464_s5 + $0xd4] sm:$0xf] }
 0x2e0   : > { %2089 = vmatpush.bf16.msrb.mxu0 %v5955_v62  ;;  %2117 = vmatpush.bf16.msrb.mxu2 %v5959_v63  ;;  %v5986_v62 = vld [vmem:[%s9464_s5 + $0x190] sm:$0xf]  ;;  %v7718_v63 = vld [vmem:[%s9464_s5 + $0x194] sm:$0xf0]  ;;  %v6159_v41 = vor.u32 %v7694_v37, %v6156_v19 }
 0x2e1   : > { %v5987_v8 = vor.u32 %v7718_v63, %v5986_v62  ;;  %v7690_v62 = vld [vmem:[%s9464_s5 + $0xc4] sm:$0xf]  ;;  %v6139_v63 = vor.u32 %v7691_v61, %v6138_v60  ;;  %v6114_v37 = vld [vmem:[%s9464_s5 + $0x90] sm:$0xf]  ;;  %v7685_v19 = vld [vmem:[%s9464_s5 + $0x94] sm:$0xf0] }
 0x2e2   : > { %2102 = vmatpush.bf16.msrb.mxu1 %v6027_v22  ;;  %2130 = vmatpush.bf16.msrb.mxu3 %v6031_v24  ;;  %v5915_v22 = vor.u32 %v7700_v49, %v5914_v47  ;;  %v5919_v24 = vor.u32 %v7699_v50, %v5916_v33  ;;  %v6066_v47 = vld [vmem:[%s9464_s5 + $0x30] sm:$0xf]  ;;  %v7673_v49 = vld [vmem:[%s9464_s5 + $0x34] sm:$0xf0]  ;;  %v7672_v50 = vld [vmem:[%s9464_s5 + $0x34] sm:$0xf]  ;;  %v6151_v33 = vor.u32 %v7692_v51, %v6148_v52 }
 0x2e3   : > { %v6067_v57 = vor.u32 %v7673_v49, %v6066_v47  ;;  %v6266_v52 = vld [vmem:[%s9464_s5 + $0x270] sm:$0xf] }
 0x2e4   : > { %2090 = vmatpush.bf16.msrb.mxu0 %v5947_v2  ;;  %2118 = vmatpush.bf16.msrb.mxu2 %v5951_v4  ;;  %v5991_v2 = vor.u32 %v7717_v30, %v5988_v39  ;;  %v6092_v4 = vld [vmem:[%s9464_s5 + $0x68] sm:$0xf0]  ;;  %v6250_v61 = vld [vmem:[%s9464_s5 + $0x250] sm:$0xf] }
 0x2e5   : > { %v6095_v34 = vor.u32 %v7678_v1, %v6092_v4  ;;  %v6140_v30 = vld [vmem:[%s9464_s5 + $0xc8] sm:$0xf0]  ;;  %v7689_v1 = vld [vmem:[%s9464_s5 + $0xb4] sm:$0xf0]  ;;  %v7688_v4 = vld [vmem:[%s9464_s5 + $0xb4] sm:$0xf] }
 0x2e6   : > { %2103 = vmatpush.bf16.msrb.mxu1 %v6019_v29  ;;  %2131 = vmatpush.bf16.msrb.mxu3 %v6023_v14  ;;  %v7715_v29 = vld [vmem:[%s9464_s5 + $0x184] sm:$0xf]  ;;  %v5980_v14 = vld [vmem:[%s9464_s5 + $0x188] sm:$0xf0]  ;;  %v6143_v39 = vor.u32 %v7690_v62, %v6140_v30  ;;  %v7743_v62 = vld [vmem:[%s9464_s5 + $0x254] sm:$0xf0] }
 0x2e7   : > { %v5983_v7 = vor.u32 %v7715_v29, %v5980_v14  ;;  %v6050_v29 = vld [vmem:[%s9464_s5 + $0x10] sm:$0xf]  ;;  %v7669_v14 = vld [vmem:[%s9464_s5 + $0x14] sm:$0xf0] }
 0x2e8   : > { %2091 = vmatpush.bf16.msrb.mxu0 %v5939_v38  ;;  %2119 = vmatpush.bf16.msrb.mxu2 %v5943_v3  ;;  %v6082_v38 = vld [vmem:[%s9464_s5 + $0x50] sm:$0xf]  ;;  %v5979_v3 = vor.u32 %v7716_v13, %v5978_v12  ;;  %v6132_v12 = vld [vmem:[%s9464_s5 + $0xb8] sm:$0xf0]  ;;  %v6051_v18 = vor.u32 %v7669_v14, %v6050_v29 }
 0x2e9   : > { %v6135_v13 = vor.u32 %v7688_v4, %v6132_v12  ;;  %v6234_v12 = vld [vmem:[%s9464_s5 + $0x230] sm:$0xf] }
 0x2ea   : > { %2104 = vmatpush.bf16.msrb.mxu1 %v6011_v42  ;;  %2132 = vmatpush.bf16.msrb.mxu3 %v6015_v43  ;;  %v7676_v42 = vld [vmem:[%s9464_s5 + $0x54] sm:$0xf]  ;;  %v6084_v43 = vld [vmem:[%s9464_s5 + $0x58] sm:$0xf0] }
 0x2ec   : > { %2092 = vmatpush.bf16.msrb.mxu0 %v5931_v54  ;;  %2120 = vmatpush.bf16.msrb.mxu2 %v5935_v17  ;;  %v6083_v54 = vor.u32 %v7677_v40, %v6082_v38  ;;  %v6087_v17 = vor.u32 %v7676_v42, %v6084_v43  ;;  %v7686_v38 = vld [vmem:[%s9464_s5 + $0xa4] sm:$0xf]  ;;  %v6042_v42 = vld [vmem:[%s9464_s5] sm:$0xf]  ;;  %v7667_v43 = vld [vmem:[%s9464_s5 + $0x4] sm:$0xf0] }
 0x2ee   : > { %2105 = vmatpush.bf16.msrb.mxu1 %v6003_v44  ;;  %2133 = vmatpush.bf16.msrb.mxu3 %v6007_v48  ;;  %v7674_v44 = vld [vmem:[%s9464_s5 + $0x44] sm:$0xf]  ;;  %v6076_v48 = vld [vmem:[%s9464_s5 + $0x48] sm:$0xf0] }
 0x2f0   : > { %2093 = vmatpush.bf16.msrb.mxu0 %v5923_v53  ;;  %2121 = vmatpush.bf16.msrb.mxu2 %v5927_v55  ;;  %v6075_v53 = vor.u32 %v7675_v9, %v6074_v6  ;;  %v6079_v55 = vor.u32 %v7674_v44, %v6076_v48  ;;  %v6116_v6 = vld [vmem:[%s9464_s5 + $0x98] sm:$0xf0]  ;;  %v6106_v44 = vld [vmem:[%s9464_s5 + $0x80] sm:$0xf]  ;;  %v7683_v48 = vld [vmem:[%s9464_s5 + $0x84] sm:$0xf0] }
 0x2f2   : > { %2106 = vmatpush.bf16.msrb.mxu1 %v5995_v56  ;;  %2134 = vmatpush.bf16.msrb.mxu3 %v5999_v28  ;;  %v6068_v56 = vld [vmem:[%s9464_s5 + $0x38] sm:$0xf0]  ;;  %v6147_v28 = vor.u32 %v7693_v35, %v6146_v46  ;;  %v6108_v46 = vld [vmem:[%s9464_s5 + $0x88] sm:$0xf0] }
 0x2f3   : > { %v6071_v11 = vor.u32 %v7672_v50, %v6068_v56  ;;  %v6258_v56 = vld [vmem:[%s9464_s5 + $0x260] sm:$0xf] }
 0x2f4   : > { %2094 = vmatpush.bf16.msrb.mxu0 %v5915_v22  ;;  %2122 = vmatpush.bf16.msrb.mxu2 %v5919_v24  ;;  %v6058_v22 = vld [vmem:[%s9464_s5 + $0x20] sm:$0xf]  ;;  %v7671_v24 = vld [vmem:[%s9464_s5 + $0x24] sm:$0xf0] }
 0x2f6   : > { %2107 = vmatpush.bf16.msrb.mxu1 %v5987_v8  ;;  %2135 = vmatpush.bf16.msrb.mxu3 %v5991_v2  ;;  %v6131_v2 = vor.u32 %v7689_v1, %v6130_v0 }
 0x2f8   : > { %2303 = vmatpush.bf16.msra.mxu0 %v6099_v10  ;;  %2331 = vmatpush.bf16.msra.mxu2 %v6103_v32  ;;  %v7670_v10 = vld [vmem:[%s9464_s5 + $0x24] sm:$0xf]  ;;  %v6059_v32 = vor.u32 %v7671_v24, %v6058_v22  ;;  %v6322_v22 = vld [vmem:[%s9464_s5 + $0x2e0] sm:$0xf]  ;;  %v7761_v24 = vld [vmem:[%s9464_s5 + $0x2e4] sm:$0xf0] }
 0x2f9   : > { %v6063_v8 = vor.u32 %v7670_v10, %v6060_v20  ;;  %v6251_v10 = vor.u32 %v7743_v62, %v6250_v61  ;;  %v7741_v20 = vld [vmem:[%s9464_s5 + $0x244] sm:$0xf0]  ;;  %v6323_v0 = vor.u32 %v7761_v24, %v6322_v22  ;;  %v6244_v61 = vld [vmem:[%s9464_s5 + $0x248] sm:$0xf0]  ;;  %v7738_v22 = vld [vmem:[%s9464_s5 + $0x234] sm:$0xf] }
 0x2fa   : > { %2108 = vmatpush.bf16.msrb.mxu1 %v5979_v3  ;;  %2136 = vmatpush.bf16.msrb.mxu3 %v5983_v7  ;;  %v6124_v7 = vld [vmem:[%s9464_s5 + $0xa8] sm:$0xf0]  ;;  %v6236_v24 = vld [vmem:[%s9464_s5 + $0x238] sm:$0xf0] }
 0x2fb   : > { %v6127_v40 = vor.u32 %v7686_v38, %v6124_v7  ;;  %v7755_v7 = vld [vmem:[%s9464_s5 + $0x2b4] sm:$0xf0] }
 0x2fc   : > { %2304 = vmatpush.bf16.msra.mxu0 %v6091_v31  ;;  %2332 = vmatpush.bf16.msra.mxu2 %v6095_v34  ;;  %v6122_v31 = vld [vmem:[%s9464_s5 + $0xa0] sm:$0xf]  ;;  %v7687_v34 = vld [vmem:[%s9464_s5 + $0xa4] sm:$0xf0] }
 0x2fd   : > { %v6123_v3 = vor.u32 %v7687_v34, %v6122_v31  ;;  %v6226_v31 = vld [vmem:[%s9464_s5 + $0x220] sm:$0xf]  ;;  %v7737_v34 = vld [vmem:[%s9464_s5 + $0x224] sm:$0xf0] }
 0x2fe   : > { %2317 = vmatpush.bf16.msra.mxu1 %v6163_v16  ;;  %2345 = vmatpush.bf16.msra.mxu3 %v6167_v45  ;;  %v7666_v16 = vld [vmem:[%s9464_s5 + $0x4] sm:$0xf]  ;;  %v6043_v45 = vor.u32 %v7667_v43, %v6042_v42  ;;  %v6227_v42 = vor.u32 %v7737_v34, %v6226_v31  ;;  %v6218_v43 = vld [vmem:[%s9464_s5 + $0x210] sm:$0xf] }
 0x2ff   : > { %v6047_v36 = vor.u32 %v7666_v16, %v6044_v59  ;;  %v7735_v16 = vld [vmem:[%s9464_s5 + $0x214] sm:$0xf0] }
 0x300   : > { %2305 = vmatpush.bf16.msra.mxu0 %v6083_v54  ;;  %2333 = vmatpush.bf16.msra.mxu2 %v6087_v17  ;;  %v7684_v54 = vld [vmem:[%s9464_s5 + $0x94] sm:$0xf]  ;;  %v6115_v17 = vor.u32 %v7685_v19, %v6114_v37  ;;  %v7753_v37 = vld [vmem:[%s9464_s5 + $0x2a4] sm:$0xf0]  ;;  %v6219_v19 = vor.u32 %v7735_v16, %v6218_v43 }
 0x301   : > { %v6119_v9 = vor.u32 %v7684_v54, %v6116_v6  ;;  %v6210_v54 = vld [vmem:[%s9464_s5 + $0x200] sm:$0xf]  ;;  %v7750_v16 = vld [vmem:[%s9464_s5 + $0x294] sm:$0xf] }
 0x302   : > { %2318 = vmatpush.bf16.msra.mxu1 %v6155_v25  ;;  %2346 = vmatpush.bf16.msra.mxu3 %v6159_v41  ;;  %v7682_v25 = vld [vmem:[%s9464_s5 + $0x84] sm:$0xf]  ;;  %v6107_v41 = vor.u32 %v7683_v48, %v6106_v44  ;;  %v7751_v44 = vld [vmem:[%s9464_s5 + $0x294] sm:$0xf0] }
 0x303   : > { %v6111_v35 = vor.u32 %v7682_v25, %v6108_v46  ;;  %v6274_v46 = vld [vmem:[%s9464_s5 + $0x280] sm:$0xf] }
 0x304   : > { %2306 = vmatpush.bf16.msra.mxu0 %v6075_v53  ;;  %2334 = vmatpush.bf16.msra.mxu2 %v6079_v55  ;;  %v7747_v53 = vld [vmem:[%s9464_s5 + $0x274] sm:$0xf0] }
 0x305   : > { %v6267_v49 = vor.u32 %v7747_v53, %v6266_v52  ;;  %v7746_v52 = vld [vmem:[%s9464_s5 + $0x274] sm:$0xf] }
 0x306   : > { %2319 = vmatpush.bf16.msra.mxu1 %v6147_v28  ;;  %2347 = vmatpush.bf16.msra.mxu3 %v6151_v33  ;;  %v7745_v28 = vld [vmem:[%s9464_s5 + $0x264] sm:$0xf0]  ;;  %v6330_v33 = vld [vmem:[%s9464_s5 + $0x2f0] sm:$0xf] }
 0x308   : > { %2307 = vmatpush.bf16.msra.mxu0 %v6067_v57  ;;  %2335 = vmatpush.bf16.msra.mxu2 %v6071_v11  ;;  %v7763_v57 = vld [vmem:[%s9464_s5 + $0x2f4] sm:$0xf0]  ;;  %v6259_v11 = vor.u32 %v7745_v28, %v6258_v56  ;;  %v6252_v56 = vld [vmem:[%s9464_s5 + $0x258] sm:$0xf0] }
 0x309   : > { %v6331_v30 = vor.u32 %v7763_v57, %v6330_v33  ;;  %v7760_v33 = vld [vmem:[%s9464_s5 + $0x2e4] sm:$0xf]  ;;  %v6324_v57 = vld [vmem:[%s9464_s5 + $0x2e8] sm:$0xf0] }
 0x30a   : > { %2320 = vmatpush.bf16.msra.mxu1 %v6139_v63  ;;  %2348 = vmatpush.bf16.msra.mxu3 %v6143_v39 }
 0x30c   : > { %2308 = vmatpush.bf16.msra.mxu0 %v6059_v32  ;;  %2336 = vmatpush.bf16.msra.mxu2 %v6063_v8  ;;  %v6242_v32 = vld [vmem:[%s9464_s5 + $0x240] sm:$0xf]  ;;  %v6314_v8 = vld [vmem:[%s9464_s5 + $0x2d0] sm:$0xf] }
 0x30d   : > { %v6243_v4 = vor.u32 %v7741_v20, %v6242_v32  ;;  %v7756_v32 = vld [vmem:[%s9464_s5 + $0x2c4] sm:$0xf]  ;;  %v6308_v20 = vld [vmem:[%s9464_s5 + $0x2c8] sm:$0xf0] }
 0x30e   : > { %2321 = vmatpush.bf16.msra.mxu1 %v6131_v2  ;;  %2349 = vmatpush.bf16.msra.mxu3 %v6135_v13  ;;  %v7759_v2 = vld [vmem:[%s9464_s5 + $0x2d4] sm:$0xf0] }
 0x30f   : > { %v7739_v13 = vld [vmem:[%s9464_s5 + $0x234] sm:$0xf0]  ;;  %v6315_v14 = vor.u32 %v7759_v2, %v6314_v8  ;;  %v6228_v8 = vld [vmem:[%s9464_s5 + $0x228] sm:$0xf0] }
 0x310   : > { %2309 = vmatpush.bf16.msra.mxu0 %v6051_v18  ;;  %2337 = vmatpush.bf16.msra.mxu2 %v6055_v27  ;;  %v7757_v18 = vld [vmem:[%s9464_s5 + $0x2c4] sm:$0xf0]  ;;  %v6235_v21 = vor.u32 %v7739_v13, %v6234_v12  ;;  %v7754_v12 = vld [vmem:[%s9464_s5 + $0x2b4] sm:$0xf]  ;;  %v6300_v13 = vld [vmem:[%s9464_s5 + $0x2b8] sm:$0xf0] }
 0x311   : > { %v6307_v38 = vor.u32 %v7757_v18, %v6306_v15  ;;  %v6220_v15 = vld [vmem:[%s9464_s5 + $0x218] sm:$0xf0] }
 0x312   : > { %2322 = vmatpush.bf16.msra.mxu1 %v6123_v3  ;;  %2350 = vmatpush.bf16.msra.mxu3 %v6127_v40  ;;  %v6298_v3 = vld [vmem:[%s9464_s5 + $0x2b0] sm:$0xf] }
 0x314   : > { %2310 = vmatpush.bf16.msra.mxu0 %v6043_v45  ;;  %2338 = vmatpush.bf16.msra.mxu2 %v6047_v36  ;;  %v6299_v45 = vor.u32 %v7755_v7, %v6298_v3  ;;  %v6290_v36 = vld [vmem:[%s9464_s5 + $0x2a0] sm:$0xf]  ;;  %v7732_v3 = vld [vmem:[%s9464_s5 + $0x204] sm:$0xf]  ;;  %v6212_v7 = vld [vmem:[%s9464_s5 + $0x208] sm:$0xf0] }
 0x315   : > { %v6291_v6 = vor.u32 %v7753_v37, %v6290_v36  ;;  %v7748_v37 = vld [vmem:[%s9464_s5 + $0x284] sm:$0xf] }
 0x316   : > { %2323 = vmatpush.bf16.msra.mxu1 %v6115_v17  ;;  %2351 = vmatpush.bf16.msra.mxu3 %v6119_v9  ;;  %v7733_v17 = vld [vmem:[%s9464_s5 + $0x204] sm:$0xf0]  ;;  %v6282_v9 = vld [vmem:[%s9464_s5 + $0x290] sm:$0xf] }
 0x317   : > { %v6211_v48 = vor.u32 %v7733_v17, %v6210_v54  ;;  %v6283_v25 = vor.u32 %v7751_v44, %v6282_v9 }
 0x31a   : > { %2324 = vmatpush.bf16.msra.mxu1 %v6107_v41  ;;  %2352 = vmatpush.bf16.msra.mxu3 %v6111_v35  ;;  %v7731_v41 = vld [vmem:[%s9463_s4 + $0x10] sm:$0xff]  ;;  %v7749_v35 = vld [vmem:[%s9464_s5 + $0x284] sm:$0xf0] }
 0x354   : > { %v1800_v60 = vpop.f32.mrf.mxu0 }
 0x35a   : > { %v1873_v51 = vpop.f32.mrf.mxu2  ;;  %v1814_v1 = vpop.f32.mrf.mxu1 }
 0x35c   : > { %v1802_v29 = vpop.f32.mrf.mxu0 }
 0x35d   : > { %v1819_v27 = vpack.c.bf16 %v1802_v29, %v1800_v60  ;;  %v7740_v60 = vld [vmem:[%s9464_s5 + $0x244] sm:$0xf]  ;;  %v6303_v29 = vor.u32 %v7754_v12, %v6300_v13  ;;  %v7775_v12 = vld [vmem:[%s9464_s5 + $0x354] sm:$0xf] }
 0x35e   : > { %v6247_v62 = vor.u32 %v7740_v60, %v6244_v61  ;;  %v6436_v60 = vld [vmem:[%s9464_s5 + $0x378] sm:$0xf0] }
 0x360   : > { %v1887_v55 = vpop.f32.mrf.mxu3 }
 0x362   : > { %v1875_v47 = vpop.f32.mrf.mxu2  ;;  %v1816_v40 = vpop.f32.mrf.mxu1 }
 0x363   : > { %v1892_v50 = vpack.c.bf16 %v1875_v47, %v1873_v51  ;;  %v1820_v59 = vpack.c.bf16 %v1816_v40, %v1814_v1  ;;  %v6275_v51 = vor.u32 %v7749_v35, %v6274_v46  ;;  %v6332_v47 = vld [vmem:[%s9464_s5 + $0x2f8] sm:$0xf0]  ;;  %v7736_v1 = vld [vmem:[%s9464_s5 + $0x224] sm:$0xf] }
 0x364   : > { %v6231_v2 = vor.u32 %v7736_v1, %v6228_v8  ;;  %v6500_v1 = vld [vmem:[%s9464_s5 + $0x3f8] sm:$0xf0] }
 0x365   : > { %2095 = vmatmul.bf16.vlgmr.msrb.gmra.mxu0 %v1892_v50  ;;  %2123 = vmatmul.bf16.vlgmr.msrb.gmra.mxu2 %v1892_v50  ;;  %v7742_v50 = vld [vmem:[%s9464_s5 + $0x254] sm:$0xf] }
 0x366   : > { %2376 = vmatpush.bf16.msrb.mxu0 %v8521_v23  ;;  %2593 = vmatpush.bf16.msrb.mxu2 %v6267_v49  ;;  %v6255_v28 = vor.u32 %v7742_v50, %v6252_v56  ;;  %v7764_v56 = vld [vmem:[%s9463_s4 + $0x18] sm:$0xff] }
 0x368   : > { %v1889_v63 = vpop.f32.mrf.mxu3 }
 0x369   : > { %v1893_v39 = vpack.c.bf16 %v1889_v63, %v1887_v55  ;;  %v7758_v63 = vld [vmem:[%s9464_s5 + $0x2d4] sm:$0xf] }
 0x36a   : > { %2377 = vmatpush.bf16.msrb.mxu0 %v8541_v26  ;;  %2594 = vmatpush.bf16.msrb.mxu2 %v6259_v11  ;;  %v6327_v11 = vor.u32 %v7760_v33, %v6324_v57  ;;  %v7780_v33 = vld [vmem:[%s9464_s5 + $0x374] sm:$0xf0]  ;;  %v7779_v57 = vld [vmem:[%s9464_s5 + $0x374] sm:$0xf] }
 0x36b   : > { %2109 = vmatmul.bf16.vlgmr.msrb.gmra.mxu1 %v1893_v39  ;;  %2137 = vmatmul.bf16.vlgmr.msrb.gmra.mxu3 %v1893_v39  ;;  %v6439_v61 = vor.u32 %v7779_v57, %v6436_v60  ;;  %v6396_v57 = vld [vmem:[%s9464_s5 + $0x328] sm:$0xf0]  ;;  %v7788_v60 = vld [vmem:[%s9464_s5 + $0x3b4] sm:$0xf0] }
 0x36c   : > { %2390 = vmatpush.bf16.msrb.mxu1 %v8558_v5  ;;  %2607 = vmatpush.bf16.msrb.mxu3 %v6331_v30  ;;  %v6316_v30 = vld [vmem:[%s9464_s5 + $0x2d8] sm:$0xf0] }
 0x36d   : > { %v6319_v39 = vor.u32 %v7758_v63, %v6316_v30  ;;  %v7778_v63 = vld [vmem:[%s9464_s5 + $0x364] sm:$0xf0]  ;;  %v7777_v30 = vld [vmem:[%s9464_s5 + $0x364] sm:$0xf] }
 0x36e   : > { %2595 = vmatpush.bf16.msrb.mxu2 %v6251_v10  ;;  %v6239_v10 = vor.u32 %v7738_v22, %v6236_v24  ;;  %v6428_v22 = vld [vmem:[%s9464_s5 + $0x368] sm:$0xf0]  ;;  %v6498_v24 = vld [vmem:[%s9464_s5 + $0x3f0] sm:$0xf] }
 0x370   : > { %2391 = vmatpush.bf16.msrb.mxu1 %v8590_v58  ;;  %2608 = vmatpush.bf16.msrb.mxu3 %v6323_v0  ;;  %v6311_v0 = vor.u32 %v7756_v32, %v6308_v20  ;;  %v6431_v32 = vor.u32 %v7777_v30, %v6428_v22  ;;  %v7795_v20 = vld [vmem:[%s9464_s5 + $0x3f4] sm:$0xf]  ;;  %v6468_v30 = vld [vmem:[%s9464_s5 + $0x3b8] sm:$0xf0]  ;;  %v6386_v22 = vld [vmem:[%s9464_s5 + $0x310] sm:$0xf] }
 0x371   : > { %v6503_v8 = vor.u32 %v7795_v20, %v6500_v1  ;;  %v6388_v20 = vld [vmem:[%s9464_s5 + $0x318] sm:$0xf0]  ;;  %v7786_v1 = vld [vmem:[%s9464_s5 + $0x3a4] sm:$0xf0] }
 0x372   : > { %2596 = vmatpush.bf16.msrb.mxu2 %v6243_v4 }
 0x374   : > { %2609 = vmatpush.bf16.msrb.mxu3 %v6315_v14  ;;  %v7734_v14 = vld [vmem:[%s9464_s5 + $0x214] sm:$0xf] }
 0x375   : > { %2311 = vmatmul.bf16.vlgmr.msra.gmra.mxu0 %v1819_v27  ;;  %2339 = vmatmul.bf16.vlgmr.msra.gmra.mxu2 %v1819_v27  ;;  %v6223_v18 = vor.u32 %v7734_v14, %v6220_v15  ;;  %v6292_v27 = vld [vmem:[%s9464_s5 + $0x2a8] sm:$0xf0]  ;;  %v6490_v14 = vld [vmem:[%s9464_s5 + $0x3e0] sm:$0xf]  ;;  %v7794_v15 = vld [vmem:[%s9464_s5 + $0x3e4] sm:$0xf0] }
 0x376   : > { %2597 = vmatpush.bf16.msrb.mxu2 %v6235_v21  ;;  %v7752_v21 = vld [vmem:[%s9464_s5 + $0x2a4] sm:$0xf] }
 0x377   : > { %v6295_v31 = vor.u32 %v7752_v21, %v6292_v27  ;;  %v7793_v21 = vld [vmem:[%s9464_s5 + $0x3e4] sm:$0xf]  ;;  %v6491_v27 = vor.u32 %v7794_v15, %v6490_v14  ;;  %v7766_v14 = vld [vmem:[%s9464_s5 + $0x304] sm:$0xf0] }
 0x378   : > { %2610 = vmatpush.bf16.msrb.mxu3 %v6307_v38  ;;  %v7765_v15 = vld [vmem:[%s9464_s5 + $0x304] sm:$0xf] }
 0x37a   : > { %2598 = vmatpush.bf16.msrb.mxu2 %v6227_v42  ;;  %v6215_v42 = vor.u32 %v7732_v3, %v6212_v7  ;;  %v7774_v3 = vld [vmem:[%s9464_s5 + $0x344] sm:$0xf0]  ;;  %v7773_v7 = vld [vmem:[%s9464_s5 + $0x344] sm:$0xf] }
 0x37b   : > { %2325 = vmatmul.bf16.vlgmr.msra.gmra.mxu1 %v1820_v59  ;;  %2353 = vmatmul.bf16.vlgmr.msra.gmra.mxu3 %v1820_v59 }
 0x37c   : > { %2611 = vmatpush.bf16.msrb.mxu3 %v6299_v45  ;;  %v6284_v45 = vld [vmem:[%s9464_s5 + $0x298] sm:$0xf0] }
 0x37d   : > { %v6287_v59 = vor.u32 %v7750_v16, %v6284_v45  ;;  %v6482_v16 = vld [vmem:[%s9464_s5 + $0x3d0] sm:$0xf]  ;;  %v7792_v45 = vld [vmem:[%s9464_s5 + $0x3d4] sm:$0xf0] }
 0x37e   : > { %2599 = vmatpush.bf16.msrb.mxu2 %v6219_v19  ;;  %v6276_v19 = vld [vmem:[%s9464_s5 + $0x288] sm:$0xf0] }
 0x37f   : > { %v6279_v17 = vor.u32 %v7748_v37, %v6276_v19  ;;  %v6483_v37 = vor.u32 %v7792_v45, %v6482_v16  ;;  %v6484_v19 = vld [vmem:[%s9464_s5 + $0x3d8] sm:$0xf0]  ;;  %v6442_v16 = vld [vmem:[%s9464_s5 + $0x380] sm:$0xf]  ;;  %v7782_v45 = vld [vmem:[%s9464_s5 + $0x384] sm:$0xf0] }
 0x380   : > { %2612 = vmatpush.bf16.msrb.mxu3 %v6291_v6 }
 0x382   : > { %2600 = vmatpush.bf16.msrb.mxu2 %v6211_v48 }
 0x384   : > { %2613 = vmatpush.bf16.msrb.mxu3 %v6283_v25 }
 0x385   : > { %6174 = vmatmul.msk.bf16.vlgmr.msrb.gmra.mxu0 %vm1787_vm8, %v7731_v41 }
 0x386   : > { %2670 = vmatpush.bf16.msra.mxu2 %v8521_v23  ;;  %v6268_v23 = vld [vmem:[%s9464_s5 + $0x278] sm:$0xf0] }
 0x387   : > { %v6271_v53 = vor.u32 %v7746_v52, %v6268_v23 }
 0x388   : > { %2614 = vmatpush.bf16.msrb.mxu3 %v6275_v51 }
 0x389   : > { %2621 = vmatpush.bf16.msra.mxu0 %v6271_v53 }
 0x38a   : > { %2671 = vmatpush.bf16.msra.mxu2 %v8541_v26  ;;  %v7744_v26 = vld [vmem:[%s9464_s5 + $0x264] sm:$0xf] }
 0x38b   : > { %6175 = vmatmul.msk.bf16.vlgmr.msrb.gmra.mxu1 %vm1787_vm8, %v7731_v41 }
 0x38c   : > { %2684 = vmatpush.bf16.msra.mxu3 %v8558_v5  ;;  %v6260_v5 = vld [vmem:[%s9464_s5 + $0x268] sm:$0xf0] }
 0x38d   : > { %v6263_v55 = vor.u32 %v7744_v26, %v6260_v5 }
 0x38f   : > { %2622 = vmatpush.bf16.msra.mxu0 %v6263_v55 }
 0x390   : > { %2685 = vmatpush.bf16.msra.mxu3 %v8590_v58  ;;  %v7762_v58 = vld [vmem:[%s9464_s5 + $0x2f4] sm:$0xf] }
 0x391   : > { %v6335_v49 = vor.u32 %v7762_v58, %v6332_v47 }
 0x393   : > { %2635 = vmatpush.bf16.msra.mxu1 %v6335_v49  ;;  %2623 = vmatpush.bf16.msra.mxu0 %v6255_v28  ;;  %v6434_v28 = vld [vmem:[%s9464_s5 + $0x370] sm:$0xf] }
 0x397   : > { %2636 = vmatpush.bf16.msra.mxu1 %v6327_v11  ;;  %2624 = vmatpush.bf16.msra.mxu0 %v6247_v62  ;;  %v6435_v11 = vor.u32 %v7780_v33, %v6434_v28  ;;  %v6426_v62 = vld [vmem:[%s9464_s5 + $0x360] sm:$0xf]  ;;  %v7769_v28 = vld [vmem:[%s9464_s5 + $0x324] sm:$0xf] }
 0x39b   : > { %2637 = vmatpush.bf16.msra.mxu1 %v6319_v39  ;;  %2625 = vmatpush.bf16.msra.mxu0 %v6239_v10  ;;  %v6427_v39 = vor.u32 %v7778_v63, %v6426_v62  ;;  %v7796_v10 = vld [vmem:[%s9464_s5 + $0x3f4] sm:$0xf0]  ;;  %v7787_v62 = vld [vmem:[%s9464_s5 + $0x3b4] sm:$0xf] }
 0x39f   : > { %2638 = vmatpush.bf16.msra.mxu1 %v6311_v0  ;;  %2626 = vmatpush.bf16.msra.mxu0 %v6231_v2  ;;  %v6499_v0 = vor.u32 %v7796_v10, %v6498_v24  ;;  %v6418_v2 = vld [vmem:[%s9464_s5 + $0x350] sm:$0xf]  ;;  %v7768_v24 = vld [vmem:[%s9464_s5 + $0x314] sm:$0xf0]  ;;  %v7767_v10 = vld [vmem:[%s9464_s5 + $0x314] sm:$0xf] }
 0x3a3   : > { %2639 = vmatpush.bf16.msra.mxu1 %v6303_v29  ;;  %2627 = vmatpush.bf16.msra.mxu0 %v6223_v18  ;;  %v6420_v29 = vld [vmem:[%s9464_s5 + $0x358] sm:$0xf0] }
 0x3a4   : > { %v6423_v18 = vor.u32 %v7775_v12, %v6420_v29  ;;  %v6460_v12 = vld [vmem:[%s9464_s5 + $0x3a8] sm:$0xf0]  ;;  %v6378_v29 = vld [vmem:[%s9464_s5 + $0x300] sm:$0xf] }
 0x3a7   : > { %2640 = vmatpush.bf16.msra.mxu1 %v6295_v31  ;;  %2628 = vmatpush.bf16.msra.mxu0 %v6215_v42  ;;  %v6492_v31 = vld [vmem:[%s9464_s5 + $0x3e8] sm:$0xf0] }
 0x3a8   : > { %v6412_v42 = vld [vmem:[%s9464_s5 + $0x348] sm:$0xf0] }
 0x3ab   : > { %2641 = vmatpush.bf16.msra.mxu1 %v6287_v59  ;;  %2887 = vmatpush.bf16.msrb.mxu0 %v6435_v11  ;;  %v6415_v59 = vor.u32 %v7773_v7, %v6412_v42  ;;  %v6466_v11 = vld [vmem:[%s9464_s5 + $0x3b0] sm:$0xf] }
 0x3ac   : > { %v6467_v63 = vor.u32 %v7788_v60, %v6466_v11 }
 0x3af   : > { %2642 = vmatpush.bf16.msra.mxu1 %v6279_v17  ;;  %2888 = vmatpush.bf16.msrb.mxu0 %v6427_v39  ;;  %v6402_v17 = vld [vmem:[%s9464_s5 + $0x330] sm:$0xf]  ;;  %v6471_v39 = vor.u32 %v7787_v62, %v6468_v30 }
 0x3b3   : > { %2901 = vmatpush.bf16.msrb.mxu1 %v6499_v0  ;;  %v6458_v0 = vld [vmem:[%s9464_s5 + $0x3a0] sm:$0xf] }
 0x3b7   : > { %2902 = vmatpush.bf16.msrb.mxu1 %v6491_v27 }
 0x3bb   : > { %2903 = vmatpush.bf16.msrb.mxu1 %v6483_v37  ;;  %v6444_v37 = vld [vmem:[%s9464_s5 + $0x388] sm:$0xf0] }
 0x3e2   : > { %v2096_v4 = vpop.f32.mrf.mxu0 }
 0x3e8   : > { %v2110_v34 = vpop.f32.mrf.mxu1  ;;  %v2124_v38 = vpop.f32.mrf.mxu2 }
 0x3e9   : > { %v2111_v40 = vadd.f32 %v2110_v34, %v2096_v4  ;;  %v7776_v4 = vld [vmem:[%s9464_s5 + $0x354] sm:$0xf0]  ;;  %v6495_v34 = vor.u32 %v7793_v21, %v6492_v31  ;;  %v6380_v21 = vld [vmem:[%s9464_s5 + $0x308] sm:$0xf0]  ;;  %v6450_v31 = vld [vmem:[%s9464_s5 + $0x390] sm:$0xf] }
 0x3ea   : > { %v9122_v43 = vpop.f32.mrf.mxu0  ;;  %v6419_v13 = vor.u32 %v7776_v4, %v6418_v2  ;;  %v7785_v2 = vld [vmem:[%s9464_s5 + $0x3a4] sm:$0xf]  ;;  %v6459_v4 = vor.u32 %v7786_v1, %v6458_v0 }
 0x3ec   : > { %2889 = vmatpush.bf16.msrb.mxu0 %v6419_v13  ;;  %v6463_v13 = vor.u32 %v7785_v2, %v6460_v12 }
 0x3ee   : > { %v2138_v36 = vpop.f32.mrf.mxu3 }
 0x3ef   : > { %v2139_v54 = vadd.f32 %v2138_v36, %v2124_v38  ;;  %v6410_v38 = vld [vmem:[%s9464_s5 + $0x340] sm:$0xf]  ;;  %v7791_v36 = vld [vmem:[%s9464_s5 + $0x3d4] sm:$0xf] }
 0x3f0   : > { %v9136_v6 = vpop.f32.mrf.mxu1  ;;  %v9138_v9 = vpop.f32.mrf.mxu2 }
 0x3f2   : > { %v2312_v44 = vpop.f32.mrf.mxu0 }
 0x3f3   : > { %v2313_v48 = vadd.f32 %v2312_v44, %v2111_v40  ;;  %v6411_v40 = vor.u32 %v7774_v3, %v6410_v38  ;;  %v7772_v44 = vld [vmem:[%s9464_s5 + $0x334] sm:$0xf0]  ;;  %v6383_v38 = vor.u32 %v7765_v15, %v6380_v21  ;;  %v7783_v3 = vld [vmem:[%s9464_s5 + $0x394] sm:$0xf] }
 0x3f4   : > { %v6567_v21 = vld [vmem:[#allocation4 + $0x170] sm:$0xf] }
 0x3f5   : > { %2890 = vmatpush.bf16.msrb.mxu0 %v6411_v40  ;;  %v6452_v40 = vld [vmem:[%s9464_s5 + $0x398] sm:$0xf0] }
 0x3f6   : > { %v9140_v25 = vpop.f32.mrf.mxu3  ;;  %v6455_v42 = vor.u32 %v7783_v3, %v6452_v40 }
 0x3f7   : > { %v2141_v0 = vadd.f32 %v9140_v25, %v9138_v9 }
 0x3f8   : > { %v2326_v41 = vpop.f32.mrf.mxu1  ;;  %v2340_v46 = vpop.f32.mrf.mxu2 }
 0x3f9   : > { %v9142_v35 = vadd.f32 %v2326_v41, %v2313_v48  ;;  %v2341_v51 = vadd.f32 %v2340_v46, %v2139_v54  ;;  %v6487_v54 = vor.u32 %v7791_v36, %v6484_v19  ;;  %v7771_v48 = vld [vmem:[%s9464_s5 + $0x334] sm:$0xf]  ;;  %v6403_v41 = vor.u32 %v7772_v44, %v6402_v17  ;;  %v6404_v46 = vld [vmem:[%s9464_s5 + $0x338] sm:$0xf0] }
 0x3fa   : > { %v9144_v52 = vpop.f32.mrf.mxu0  ;;  %v6443_v36 = vor.u32 %v7782_v45, %v6442_v16 }
 0x3fb   : > { %2891 = vmatpush.bf16.msrb.mxu0 %v6403_v41 }
 0x3fe   : > { %v2354_v23 = vpop.f32.mrf.mxu3 }
 0x3ff   : > { %v9146_v53 = vadd.f32 %v2354_v23, %v2341_v51  ;;  %v6474_v51 = vld [vmem:[%s9464_s5 + $0x3c0] sm:$0xf]  ;;  %v7790_v23 = vld [vmem:[%s9464_s5 + $0x3c4] sm:$0xf0] }
 0x400   : > { %v9148_v26 = vpop.f32.mrf.mxu1  ;;  %v9323_v27 = vpop.f32.mrf.mxu2 }
 0x402   : > { %v2379_v5 = vpop.f32.mrf.mxu0 }
 0x406   : > { %v2356_v19 = vpop.f32.mrf.mxu3 }
 0x408   : > { %v2393_v55 = vpop.f32.mrf.mxu1 }
 0x40a   : > { %v2381_v58 = vpop.f32.mrf.mxu0 }
 0x40b   : > { %v2398_v47 = vpack.c.bf16 %v2381_v58, %v2379_v5  ;;  %v6407_v5 = vor.u32 %v7771_v48, %v6404_v46  ;;  %v6475_v58 = vor.u32 %v7790_v23, %v6474_v51 }
 0x40d   : > { %2601 = vmatmul.bf16.vlgmr.msrb.gmra.mxu2 %v2398_v47  ;;  %2629 = vmatmul.bf16.vlgmr.msra.gmra.mxu0 %v2398_v47  ;;  %v6476_v47 = vld [vmem:[%s9464_s5 + $0x3c8] sm:$0xf0] }
 0x40e   : > { %2915 = vmatpush.bf16.msrb.mxu2 %v6439_v61  ;;  %2904 = vmatpush.bf16.msrb.mxu1 %v6475_v58  ;;  %v6399_v61 = vor.u32 %v7769_v28, %v6396_v57 }
 0x410   : > { %v2395_v49 = vpop.f32.mrf.mxu1 }
 0x411   : > { %v2399_v50 = vpack.c.bf16 %v2395_v49, %v2393_v55  ;;  %v7789_v55 = vld [vmem:[%s9464_s5 + $0x3c4] sm:$0xf] }
 0x412   : > { %2916 = vmatpush.bf16.msrb.mxu2 %v6431_v32  ;;  %v6479_v49 = vor.u32 %v7789_v55, %v6476_v47  ;;  %2905 = vmatpush.bf16.msrb.mxu1 %v6467_v63  ;;  %v6387_v32 = vor.u32 %v7768_v24, %v6386_v22 }
 0x413   : > { %2615 = vmatmul.bf16.vlgmr.msrb.gmra.mxu3 %v2399_v50  ;;  %2643 = vmatmul.bf16.vlgmr.msra.gmra.mxu1 %v2399_v50  ;;  %v6394_v50 = vld [vmem:[%s9464_s5 + $0x320] sm:$0xf] }
 0x414   : > { %2929 = vmatpush.bf16.msrb.mxu3 %v6503_v8  ;;  %v6391_v8 = vor.u32 %v7767_v10, %v6388_v20 }
 0x416   : > { %2917 = vmatpush.bf16.msrb.mxu2 %v6423_v18  ;;  %2906 = vmatpush.bf16.msrb.mxu1 %v6459_v4  ;;  %v6379_v18 = vor.u32 %v7766_v14, %v6378_v29 }
 0x418   : > { %2930 = vmatpush.bf16.msrb.mxu3 %v6495_v34  ;;  %v7784_v34 = vld [vmem:[%s9464_s5 + $0x394] sm:$0xf0] }
 0x419   : > { %v6451_v7 = vor.u32 %v7784_v34, %v6450_v31  ;;  %v7844_v31 = vld [vmem:[#allocation4 + $0x174] sm:$0xf0] }
 0x41a   : > { %2918 = vmatpush.bf16.msrb.mxu2 %v6415_v59  ;;  %v7781_v59 = vld [vmem:[%s9464_s5 + $0x384] sm:$0xf] }
 0x41b   : > { %2907 = vmatpush.bf16.msrb.mxu1 %v6451_v7 }
 0x41c   : > { %2931 = vmatpush.bf16.msrb.mxu3 %v6487_v54  ;;  %v6447_v54 = vor.u32 %v7781_v59, %v6444_v37 }
 0x41d   : > { %6342 = vmatmul.msk.bf16.vlgmr.msra.gmra.mxu2 %vm1787_vm8, %v7764_v56 }
 0x41e   : > { %2919 = vmatpush.bf16.msrb.mxu2 %v6407_v5 }
 0x41f   : > { %2908 = vmatpush.bf16.msrb.mxu1 %v6443_v36  ;;  %v6559_v36 = vld [vmem:[#allocation4 + $0x160] sm:$0xf] }
 0x420   : > { %2932 = vmatpush.bf16.msrb.mxu3 %v6479_v49 }
 0x422   : > { %2920 = vmatpush.bf16.msrb.mxu2 %v6399_v61  ;;  %v2947_v61 = vld [vmem:[%s9465_s6] sm:$0x3] }
 0x423   : > { %6343 = vmatmul.msk.bf16.vlgmr.msra.gmra.mxu3 %vm1787_vm8, %v7764_v56  ;;  %v7770_v56 = vld [vmem:[%s9464_s5 + $0x324] sm:$0xf0]  ;;  %v2949_v24 = vperm.slane %v2947_v61, 0  ;;  %v2950_v29 = vperm.slane %v2947_v61, 1  ;;  %vm5281_vm8 = vcmask 0  }
 0x424   : > { %v6395_v33 = vor.u32 %v7770_v56, %v6394_v50  ;;  %2933 = vmatpush.bf16.msrb.mxu3 %v6471_v39  ;;  %v6623_v61 = vld [vmem:[#allocation4 + $0x1e0] sm:$0xf] }
 0x426   : > { %2892 = vmatpush.bf16.msrb.mxu0 %v6395_v33  ;;  %2921 = vmatpush.bf16.msrb.mxu2 %v6391_v8 }
 0x428   : > { %2934 = vmatpush.bf16.msrb.mxu3 %v6463_v13 }
 0x42a   : > { %2893 = vmatpush.bf16.msrb.mxu0 %v6387_v32  ;;  %2922 = vmatpush.bf16.msrb.mxu2 %v6383_v38  ;;  %v7843_v38 = vld [vmem:[#allocation4 + $0x174] sm:$0xf] }
 0x42c   : > { %2935 = vmatpush.bf16.msrb.mxu3 %v6455_v42 }
 0x42e   : > { %2894 = vmatpush.bf16.msrb.mxu0 %v6379_v18 }
 0x430   : > { %2936 = vmatpush.bf16.msrb.mxu3 %v6447_v54  ;;  %v2971_v54 = vld [vmem:[%s9466_s7] sm:$0xf] }
 0x48a   : > { %v2630_v50 = vpop.f32.mrf.mxu0 }
 0x490   : > { %v2602_v17 = vpop.f32.mrf.mxu2  ;;  %v2644_v56 = vpop.f32.mrf.mxu1 }
 0x491   : > { %v2645_v30 = vadd.f32 %v2644_v56, %v2630_v50  ;;  %v6551_v56 = vld [vmem:[#allocation4 + $0x150] sm:$0xf] }
 0x492   : > { %v2632_v28 = vpop.f32.mrf.mxu0 }
 0x496   : > { %v2616_v44 = vpop.f32.mrf.mxu3 }
 0x497   : > { %v2617_v48 = vadd.f32 %v2616_v44, %v2602_v17  ;;  %v7842_v17 = vld [vmem:[#allocation4 + $0x164] sm:$0xf0]  ;;  %v7841_v44 = vld [vmem:[#allocation4 + $0x164] sm:$0xf] }
 0x498   : > { %v2604_v41 = vpop.f32.mrf.mxu2  ;;  %v2646_v33 = vpop.f32.mrf.mxu1 }
 0x499   : > { %v2649_v46 = vadd.f32 %v2617_v48, %v9142_v35  ;;  %v2113_v35 = vadd.f32 %v9136_v6, %v9122_v43  ;;  %v2650_v6 = vadd.f32 %v2645_v30, %v9146_v53  ;;  %v2647_v12 = vadd.f32 %v2646_v33, %v2632_v28  ;;  %v6569_v53 = vld [vmem:[#allocation4 + $0x178] sm:$0xf0]  ;;  %v6561_v48 = vld [vmem:[#allocation4 + $0x168] sm:$0xf0]  ;;  %v7840_v28 = vld [vmem:[#allocation4 + $0x154] sm:$0xf0] }
 0x49a   : > { %v6572_v59 = vor.u32 %v7843_v38, %v6569_v53  ;;  %v7857_v30 = vld [vmem:[#allocation4 + $0x1e4] sm:$0xf]  ;;  %v6527_v53 = vld [vmem:[#allocation4 + $0x120] sm:$0xf] }
 0x49b   : > { %v2315_v62 = vadd.f32 %v9144_v52, %v2113_v35  ;;  %v2343_v52 = vadd.f32 %v9323_v27, %v2141_v0  ;;  %v6568_v27 = vor.u32 %v7844_v31, %v6567_v21  ;;  %v6553_v35 = vld [vmem:[#allocation4 + $0x158] sm:$0xf0]  ;;  %v6607_v21 = vld [vmem:[#allocation4 + $0x1c0] sm:$0xf]  ;;  %v7854_v31 = vld [vmem:[#allocation4 + $0x1c4] sm:$0xf0] }
 0x49d   : > { %v2329_v32 = vadd.f32 %v9148_v26, %v2315_v62  ;;  %v2357_v15 = vadd.f32 %v2356_v19, %v2343_v52  ;;  %v6506_v19 = vld [vmem:[%s9466_s7 + $0x4] sm:$0xf] }
 0x49e   : > { %v2618_v51 = vpop.f32.mrf.mxu3 }
 0x49f   : > { %v2619_v39 = vadd.f32 %v2618_v51, %v2604_v41  ;;  %v2652_v34 = vadd.f32 %v2647_v12, %v2357_v15  ;;  %v6631_v51 = vld [vmem:[#allocation4 + $0x1f0] sm:$0xf] }
 0x4a0   : > { %v2673_v23 = vpop.f32.mrf.mxu2 }
 0x4a1   : > { %v2651_v8 = vadd.f32 %v2619_v39, %v2329_v32  ;;  %v6625_v39 = vld [vmem:[#allocation4 + $0x1e8] sm:$0xf0]  ;;  %v7838_v32 = vld [vmem:[#allocation4 + $0x144] sm:$0xf0] }
 0x4a2   : > { %v6628_v0 = vor.u32 %v7857_v30, %v6625_v39  ;;  %v6583_v30 = vld [vmem:[#allocation4 + $0x190] sm:$0xf]  ;;  %v7848_v39 = vld [vmem:[#allocation4 + $0x194] sm:$0xf0] }
 0x4a6   : > { %v2687_v5 = vpop.f32.mrf.mxu3 }
 0x4a8   : > { %v2675_v55 = vpop.f32.mrf.mxu2 }
 0x4a9   : > { %v2692_v58 = vpack.c.bf16 %v2675_v55, %v2673_v23  ;;  %v7860_v23 = vld [vmem:[#allocation4 + $0x1f4] sm:$0xf0]  ;;  %v6633_v55 = vld [vmem:[#allocation4 + $0x1f8] sm:$0xf0] }
 0x4aa   : > { %v6632_v50 = vor.u32 %v7860_v23, %v6631_v51  ;;  %v6521_v51 = vld [vmem:[#allocation4 + $0x118] sm:$0xf0]  ;;  %v6591_v23 = vld [vmem:[#allocation4 + $0x1a0] sm:$0xf] }
 0x4ab   : > { %2895 = vmatmul.bf16.vlgmr.msrb.gmra.mxu0 %v2692_v58  ;;  %2923 = vmatmul.bf16.vlgmr.msrb.gmra.mxu2 %v2692_v58 }
 0x4ae   : > { %v2689_v47 = vpop.f32.mrf.mxu3 }
 0x4af   : > { %v2693_v49 = vpack.c.bf16 %v2689_v47, %v2687_v5  ;;  %v7859_v5 = vld [vmem:[#allocation4 + $0x1f4] sm:$0xf]  ;;  %v6560_v47 = vor.u32 %v7842_v17, %v6559_v36  ;;  %v6601_v36 = vld [vmem:[#allocation4 + $0x1b8] sm:$0xf0]  ;;  %v6519_v17 = vld [vmem:[#allocation4 + $0x110] sm:$0xf] }
 0x4b1   : > { %2909 = vmatmul.bf16.vlgmr.msrb.gmra.mxu1 %v2693_v49  ;;  %2937 = vmatmul.bf16.vlgmr.msrb.gmra.mxu3 %v2693_v49  ;;  %v6564_v49 = vor.u32 %v7841_v44, %v6561_v48  ;;  %v7832_v44 = vld [vmem:[#allocation4 + $0x114] sm:$0xf0] }
 0x528   : > { %v2896_v57 = vpop.f32.mrf.mxu0 }
 0x52e   : > { %v2910_v11 = vpop.f32.mrf.mxu1  ;;  %v2924_v63 = vpop.f32.mrf.mxu2 }
 0x52f   : > { %v2911_v60 = vadd.f32 %v2910_v11, %v2896_v57  ;;  %v6636_v11 = vor.u32 %v7859_v5, %v6633_v55  ;;  %v7850_v5 = vld [vmem:[#allocation4 + $0x1a4] sm:$0xf0]  ;;  %v7849_v55 = vld [vmem:[#allocation4 + $0x1a4] sm:$0xf] }
 0x530   : > { %v2898_v1 = vpop.f32.mrf.mxu0 }
 0x531   : > { %v2943_v22 = vadd.f32 %v2911_v60, %v2649_v46  ;;  %v7839_v60 = vld [vmem:[#allocation4 + $0x154] sm:$0xf] }
 0x533   : > { %v2953_v2 = vadd.f32 %v2949_v24, %v2943_v22  ;;  %v6552_v22 = vor.u32 %v7840_v28, %v6551_v56  ;;  %v7830_v56 = vld [vmem:[#allocation4 + $0x104] sm:$0xf0]  ;;  %v7829_v28 = vld [vmem:[#allocation4 + $0x104] sm:$0xf] }
 0x534   : > { %v2938_v10 = vpop.f32.mrf.mxu3 }
 0x535   : > { %v2939_v20 = vadd.f32 %v2938_v10, %v2924_v63  ;;  %v2961_v18 = vmul.f32 0.2, %v2953_v2  ;;  %vm2957_vm10 = vcmp.ge.f32.partialorder %v2953_v2, 0.0  ;;  %v7858_v63 = vld [vmem:[#allocation4 + $0x1e4] sm:$0xf0] }
 0x536   : > { %v2912_v43 = vpop.f32.mrf.mxu1  ;;  %v2926_v9 = vpop.f32.mrf.mxu2  ;;  %v6543_v10 = vld [vmem:[#allocation4 + $0x140] sm:$0xf] }
 0x537   : > { %v2913_v4 = vadd.f32 %v2912_v43, %v2898_v1  ;;  %v2944_v13 = vadd.f32 %v2939_v20, %v2650_v6  ;;  %v2965_v16 = vsel %vm2957_vm10, %v2953_v2, %v2961_v18  ;;  %v6624_v20 = vor.u32 %v7858_v63, %v6623_v61  ;;  %v7837_v1 = vld [vmem:[#allocation4 + $0x144] sm:$0xf]  ;;  %v6545_v43 = vld [vmem:[#allocation4 + $0x148] sm:$0xf0]  ;;  %v6615_v6 = vld [vmem:[#allocation4 + $0x1d0] sm:$0xf] }
 0x538   : > { %v7855_v2 = vld [vmem:[#allocation4 + $0x1d4] sm:$0xf]  ;;  %v6544_v52 = vor.u32 %v7838_v32, %v6543_v10  ;;  %v6548_v12 = vor.u32 %v7837_v1, %v6545_v43  ;;  %v6697_v63 = vld [vmem:[#allocation4 + $0x78] sm:$0xf0]  ;;  %v6687_v1 = vld [vmem:[#allocation4 + $0x60] sm:$0xf] }
 0x539   : > { %v2945_v14 = vadd.f32 %v2913_v4, %v2651_v8  ;;  %v2954_v3 = vadd.f32 %v2950_v29, %v2944_v13  ;;  %v7856_v8 = vld [vmem:[#allocation4 + $0x1d4] sm:$0xf0]  ;;  %v6617_v4 = vld [vmem:[#allocation4 + $0x1d8] sm:$0xf0]  ;;  %v6535_v13 = vld [vmem:[#allocation4 + $0x130] sm:$0xf] }
 0x53a   : > { %v6620_v15 = vor.u32 %v7855_v2, %v6617_v4  ;;  %v7835_v18 = vld [vmem:[#allocation4 + $0x134] sm:$0xf]  ;;  %v7810_v43 = vld [vmem:[#allocation4 + $0x64] sm:$0xf0]  ;;  %v6689_v4 = vld [vmem:[#allocation4 + $0x68] sm:$0xf0] }
 0x53b   : > { %v2955_v26 = vadd.f32 %v2949_v24, %v2945_v14  ;;  %v2962_v41 = vmul.f32 0.2, %v2954_v3  ;;  %vm2958_vm12 = vcmp.ge.f32.partialorder %v2954_v3, 0.0  ;;  %v6556_v24 = vor.u32 %v7839_v60, %v6553_v35  ;;  %v6695_v60 = vld [vmem:[#allocation4 + $0x70] sm:$0xf] }
 0x53c   : > { %v2940_v25 = vpop.f32.mrf.mxu3  ;;  %v6616_v14 = vor.u32 %v7856_v8, %v6615_v6  ;;  %v7812_v35 = vld [vmem:[#allocation4 + $0x74] sm:$0xf0]  ;;  %v7811_v61 = vld [vmem:[#allocation4 + $0x74] sm:$0xf]  ;;  %v7809_v6 = vld [vmem:[#allocation4 + $0x64] sm:$0xf]  ;;  %v6584_v8 = vor.u32 %v7848_v39, %v6583_v30 }
 0x53d   : > { %vm2959_vm11 = vcmp.ge.f32.partialorder %v2955_v26, 0.0  ;;  %v2963_v7 = vmul.f32 0.2, %v2955_v26  ;;  %v2941_v40 = vadd.f32 %v2940_v25, %v2926_v9  ;;  %v2966_v33 = vsel %vm2958_vm12, %v2954_v3, %v2962_v41  ;;  %v6609_v9 = vld [vmem:[#allocation4 + $0x1c8] sm:$0xf0] }
 0x53e   : > { %v7834_v3 = vld [vmem:[#allocation4 + $0x124] sm:$0xf0]  ;;  %v6655_v30 = vld [vmem:[#allocation4 + $0x20] sm:$0xf] }
 0x53f   : > { %v2946_v42 = vadd.f32 %v2941_v40, %v2652_v34  ;;  %v2967_v45 = vsel %vm2959_vm11, %v2955_v26, %v2963_v7  ;;  %v6537_v26 = vld [vmem:[#allocation4 + $0x138] sm:$0xf0]  ;;  %v7853_v34 = vld [vmem:[#allocation4 + $0x1c4] sm:$0xf]  ;;  %v6608_v7 = vor.u32 %v7854_v31, %v6607_v21  ;;  %v6688_v21 = vor.u32 %v7810_v43, %v6687_v1  ;;  %v7802_v39 = vld [vmem:[#allocation4 + $0x24] sm:$0xf0] }
 0x540   : > { %v9361_v37 = vpack.c.bf16 %v2967_v45, %v2965_v16  ;;  %v6540_v38 = vor.u32 %v7835_v18, %v6537_v26  ;;  %v6612_v40 = vor.u32 %v7853_v34, %v6609_v9  ;;  %v6599_v16 = vld [vmem:[#allocation4 + $0x1b0] sm:$0xf]  ;;  %v7852_v45 = vld [vmem:[#allocation4 + $0x1b4] sm:$0xf0]  ;;  %v7827_v18 = vld [vmem:[#allocation4 + $0xf4] sm:$0xf]  ;;  %v6692_v31 = vor.u32 %v7809_v6, %v6689_v4 }
 0x541   : > { %v2956_v46 = vadd.f32 %v2950_v29, %v2946_v42  ;;  %v7836_v29 = vld [vmem:[#allocation4 + $0x134] sm:$0xf0]  ;;  %v6529_v42 = vld [vmem:[#allocation4 + $0x128] sm:$0xf0]  ;;  %v6600_v48 = vor.u32 %v7852_v45, %v6599_v16  ;;  %v6761_v26 = vld [vmem:[#allocation4 + $0xf8] sm:$0xf0]  ;;  %v6656_v6 = vor.u32 %v7802_v39, %v6655_v30 }
 0x542   : > { %2983 = vmatpush.bf16.msra.mxu0 %v9361_v37  ;;  %3048 = vmatpush.bf16.msra.mxu2 %v9361_v37  ;;  %v6536_v25 = vor.u32 %v7836_v29, %v6535_v13  ;;  %v7845_v13 = vld [vmem:[#allocation4 + $0x184] sm:$0xf]  ;;  %v6577_v29 = vld [vmem:[#allocation4 + $0x188] sm:$0xf0]  ;;  %v6679_v34 = vld [vmem:[#allocation4 + $0x50] sm:$0xf] }
 0x543   : > { %vm2960_vm14 = vcmp.ge.f32.partialorder %v2956_v46, 0.0  ;;  %v2964_v58 = vmul.f32 0.2, %v2956_v46  ;;  %v7825_v16 = vld [vmem:[#allocation4 + $0xe4] sm:$0xf] }
 0x544   : > { %v6753_v45 = vld [vmem:[#allocation4 + $0xe8] sm:$0xf0]  ;;  %v7819_v1 = vld [vmem:[#allocation4 + $0xb4] sm:$0xf]  ;;  %v6729_v43 = vld [vmem:[#allocation4 + $0xb8] sm:$0xf0] }
 0x545   : > { %6507 = vmatmul.msk.bf16.vlgmr.msra.gmra.mxu2 %vm2972_vm13, %v6506_v19  ;;  %v2968_v57 = vsel %vm2960_vm14, %v2956_v46, %v2964_v58  ;;  %6504 = vmatmul.msk.bf16.vlgmr.msra.gmra.mxu0 %vm2972_vm13, %v2971_v54  ;;  %v7831_v46 = vld [vmem:[#allocation4 + $0x114] sm:$0xf]  ;;  %v6593_v58 = vld [vmem:[#allocation4 + $0x1a8] sm:$0xf0]  ;;  %v7800_v4 = vld [vmem:[#allocation4 + $0x14] sm:$0xf0] }
 0x546   : > { %3262 = vmatpush.bf16.msrb.mxu0 %v6568_v27  ;;  %3288 = vmatpush.bf16.msrb.mxu2 %v6572_v59  ;;  %v9374_v62 = vpack.c.bf16 %v2968_v57, %v2966_v33  ;;  %v7833_v27 = vld [vmem:[#allocation4 + $0x124] sm:$0xf]  ;;  %v7851_v59 = vld [vmem:[#allocation4 + $0x1b4] sm:$0xf]  ;;  %v6592_v33 = vor.u32 %v7850_v5, %v6591_v23  ;;  %v6596_v57 = vor.u32 %v7849_v55, %v6593_v58  ;;  %v6745_v5 = vld [vmem:[#allocation4 + $0xd8] sm:$0xf0] }
 0x547   : > { %v6604_v41 = vor.u32 %v7851_v59, %v6601_v36  ;;  %v7823_v23 = vld [vmem:[#allocation4 + $0xd4] sm:$0xf]  ;;  %v6882_v30 = vld [vmem:[#allocation4 + $0x2e0] sm:$0xf]  ;;  %v7890_v39 = vld [vmem:[#allocation4 + $0x2e4] sm:$0xf0] }
 0x548   : > { %2996 = vmatpush.bf16.msra.mxu1 %v9374_v62  ;;  %3061 = vmatpush.bf16.msra.mxu3 %v9374_v62 }
 0x54a   : > { %3263 = vmatpush.bf16.msrb.mxu0 %v6560_v47  ;;  %3289 = vmatpush.bf16.msrb.mxu2 %v6564_v49  ;;  %v6520_v47 = vor.u32 %v7832_v44, %v6519_v17  ;;  %v6524_v49 = vor.u32 %v7831_v46, %v6521_v51  ;;  %v7805_v17 = vld [vmem:[#allocation4 + $0x44] sm:$0xf]  ;;  %v6673_v44 = vld [vmem:[#allocation4 + $0x48] sm:$0xf0]  ;;  %v6743_v46 = vld [vmem:[#allocation4 + $0xd0] sm:$0xf] }
 0x54b   : > { %6508 = vmatmul.msk.bf16.vlgmr.msra.gmra.mxu3 %vm2972_vm13, %v6506_v19  ;;  %6505 = vmatmul.msk.bf16.vlgmr.msra.gmra.mxu1 %vm2972_vm13, %v2971_v54  ;;  %v6528_v19 = vor.u32 %v7834_v3, %v6527_v53  ;;  %v6532_v54 = vor.u32 %v7833_v27, %v6529_v42  ;;  %v7807_v53 = vld [vmem:[#allocation4 + $0x54] sm:$0xf]  ;;  %v6681_v3 = vld [vmem:[#allocation4 + $0x58] sm:$0xf0]  ;;  %v6751_v27 = vld [vmem:[#allocation4 + $0xe0] sm:$0xf]  ;;  %v6676_v58 = vor.u32 %v7805_v17, %v6673_v44 }
 0x54c   : > { %3275 = vmatpush.bf16.msrb.mxu1 %v6632_v50  ;;  %3301 = vmatpush.bf16.msrb.mxu3 %v6636_v11  ;;  %v6511_v50 = vld [vmem:[#allocation4 + $0x100] sm:$0xf]  ;;  %v6513_v11 = vld [vmem:[#allocation4 + $0x108] sm:$0xf0]  ;;  %v7826_v42 = vld [vmem:[#allocation4 + $0xe4] sm:$0xf0]  ;;  %v6684_v36 = vor.u32 %v7807_v53, %v6681_v3 }
 0x54d   : > { %v6512_v10 = vor.u32 %v7830_v56, %v6511_v50  ;;  %v6516_v32 = vor.u32 %v7829_v28, %v6513_v11  ;;  %v7824_v51 = vld [vmem:[#allocation4 + $0xd4] sm:$0xf0]  ;;  %v7803_v50 = vld [vmem:[#allocation4 + $0x34] sm:$0xf]  ;;  %v6665_v56 = vld [vmem:[#allocation4 + $0x38] sm:$0xf0] }
 0x54e   : > { %3264 = vmatpush.bf16.msrb.mxu0 %v6552_v22  ;;  %3290 = vmatpush.bf16.msrb.mxu2 %v6556_v24  ;;  %v7847_v22 = vld [vmem:[#allocation4 + $0x194] sm:$0xf]  ;;  %v6585_v24 = vld [vmem:[#allocation4 + $0x198] sm:$0xf0]  ;;  %v6744_v28 = vor.u32 %v7824_v51, %v6743_v46  ;;  %v7822_v11 = vld [vmem:[#allocation4 + $0xc4] sm:$0xf0] }
 0x54f   : > { %v6588_v2 = vor.u32 %v7847_v22, %v6585_v24  ;;  %v7801_v22 = vld [vmem:[#allocation4 + $0x24] sm:$0xf]  ;;  %v6657_v24 = vld [vmem:[#allocation4 + $0x28] sm:$0xf0]  ;;  %v6826_v51 = vld [vmem:[#allocation4 + $0x270] sm:$0xf] }
 0x550   : > { %3276 = vmatpush.bf16.msrb.mxu1 %v6624_v20  ;;  %3302 = vmatpush.bf16.msrb.mxu3 %v6628_v0  ;;  %v6696_v20 = vor.u32 %v7812_v35, %v6695_v60  ;;  %v6700_v0 = vor.u32 %v7811_v61, %v6697_v63  ;;  %v7821_v60 = vld [vmem:[#allocation4 + $0xc4] sm:$0xf]  ;;  %v6737_v35 = vld [vmem:[#allocation4 + $0xc8] sm:$0xf0]  ;;  %v6668_v63 = vor.u32 %v7803_v50, %v6665_v56  ;;  %v7874_v50 = vld [vmem:[#allocation4 + $0x264] sm:$0xf0] }
 0x551   : > { %v7797_v53 = vld [vmem:[#allocation4 + $0x4] sm:$0xf] }
 0x552   : > { %3265 = vmatpush.bf16.msrb.mxu0 %v6544_v52  ;;  %3291 = vmatpush.bf16.msrb.mxu2 %v6548_v12  ;;  %v6575_v52 = vld [vmem:[#allocation4 + $0x180] sm:$0xf]  ;;  %v7846_v12 = vld [vmem:[#allocation4 + $0x184] sm:$0xf0]  ;;  %v7813_v17 = vld [vmem:[#allocation4 + $0x84] sm:$0xf] }
 0x553   : > { %v6576_v9 = vor.u32 %v7846_v12, %v6575_v52  ;;  %v7799_v52 = vld [vmem:[#allocation4 + $0x14] sm:$0xf]  ;;  %v6649_v12 = vld [vmem:[#allocation4 + $0x18] sm:$0xf0] }
 0x554   : > { %3277 = vmatpush.bf16.msrb.mxu1 %v6616_v14  ;;  %3303 = vmatpush.bf16.msrb.mxu3 %v6620_v15  ;;  %v6759_v14 = vld [vmem:[#allocation4 + $0xf0] sm:$0xf]  ;;  %v7828_v15 = vld [vmem:[#allocation4 + $0xf4] sm:$0xf0] }
 0x556   : > { %3266 = vmatpush.bf16.msrb.mxu0 %v6536_v25  ;;  %3292 = vmatpush.bf16.msrb.mxu2 %v6540_v38  ;;  %v6580_v25 = vor.u32 %v7845_v13, %v6577_v29  ;;  %v7808_v38 = vld [vmem:[#allocation4 + $0x54] sm:$0xf0]  ;;  %v6732_v29 = vor.u32 %v7819_v1, %v6729_v43  ;;  %v6874_v1 = vld [vmem:[#allocation4 + $0x2d0] sm:$0xf] }
 0x557   : > { %v6680_v59 = vor.u32 %v7808_v38, %v6679_v34  ;;  %v6721_v34 = vld [vmem:[#allocation4 + $0xa8] sm:$0xf0]  ;;  %v7798_v38 = vld [vmem:[#allocation4 + $0x4] sm:$0xf0]  ;;  %v7888_v43 = vld [vmem:[#allocation4 + $0x2d4] sm:$0xf0] }
 0x558   : > { %3278 = vmatpush.bf16.msrb.mxu1 %v6608_v7  ;;  %3304 = vmatpush.bf16.msrb.mxu3 %v6612_v40  ;;  %v6760_v7 = vor.u32 %v7828_v15, %v6759_v14  ;;  %v6764_v40 = vor.u32 %v7827_v18, %v6761_v26  ;;  %v6652_v15 = vor.u32 %v7799_v52, %v6649_v12  ;;  %v6719_v18 = vld [vmem:[#allocation4 + $0xa0] sm:$0xf]  ;;  %v7818_v26 = vld [vmem:[#allocation4 + $0xa4] sm:$0xf0] }
 0x55a   : > { %3267 = vmatpush.bf16.msrb.mxu0 %v6528_v19  ;;  %3293 = vmatpush.bf16.msrb.mxu2 %v6532_v54  ;;  %v6671_v19 = vld [vmem:[#allocation4 + $0x40] sm:$0xf]  ;;  %v7806_v54 = vld [vmem:[#allocation4 + $0x44] sm:$0xf0] }
 0x55b   : > { %v6672_v55 = vor.u32 %v7806_v54, %v6671_v19  ;;  %v6703_v19 = vld [vmem:[#allocation4 + $0x80] sm:$0xf]  ;;  %v7814_v54 = vld [vmem:[#allocation4 + $0x84] sm:$0xf0] }
 0x55c   : > { %3279 = vmatpush.bf16.msrb.mxu1 %v6600_v48  ;;  %3305 = vmatpush.bf16.msrb.mxu3 %v6604_v41  ;;  %v6752_v48 = vor.u32 %v7826_v42, %v6751_v27  ;;  %v6756_v41 = vor.u32 %v7825_v16, %v6753_v45  ;;  %v6711_v27 = vld [vmem:[#allocation4 + $0x90] sm:$0xf]  ;;  %v7816_v42 = vld [vmem:[#allocation4 + $0x94] sm:$0xf0]  ;;  %v7815_v16 = vld [vmem:[#allocation4 + $0x94] sm:$0xf]  ;;  %v6704_v44 = vor.u32 %v7814_v54, %v6703_v19 }
 0x55d   : > { %v6712_v45 = vor.u32 %v7816_v42, %v6711_v27  ;;  %v6770_v27 = vld [vmem:[#allocation4 + $0x200] sm:$0xf]  ;;  %v7862_v42 = vld [vmem:[#allocation4 + $0x204] sm:$0xf0] }
 0x55e   : > { %3268 = vmatpush.bf16.msrb.mxu0 %v6520_v47  ;;  %3294 = vmatpush.bf16.msrb.mxu2 %v6524_v49  ;;  %v6663_v47 = vld [vmem:[#allocation4 + $0x30] sm:$0xf]  ;;  %v7804_v49 = vld [vmem:[#allocation4 + $0x34] sm:$0xf0]  ;;  %v6834_v54 = vld [vmem:[#allocation4 + $0x280] sm:$0xf] }
 0x55f   : > { %v6664_v61 = vor.u32 %v7804_v49, %v6663_v47  ;;  %v6818_v49 = vld [vmem:[#allocation4 + $0x260] sm:$0xf] }
 0x560   : > { %3280 = vmatpush.bf16.msrb.mxu1 %v6592_v33  ;;  %3306 = vmatpush.bf16.msrb.mxu3 %v6596_v57  ;;  %v6748_v33 = vor.u32 %v7823_v23, %v6745_v5  ;;  %v6735_v57 = vld [vmem:[#allocation4 + $0xc0] sm:$0xf]  ;;  %v7876_v23 = vld [vmem:[#allocation4 + $0x274] sm:$0xf0] }
 0x562   : > { %3269 = vmatpush.bf16.msrb.mxu0 %v6512_v10  ;;  %3295 = vmatpush.bf16.msrb.mxu2 %v6516_v32  ;;  %v6736_v10 = vor.u32 %v7822_v11, %v6735_v57  ;;  %v6740_v32 = vor.u32 %v7821_v60, %v6737_v35  ;;  %v6819_v57 = vor.u32 %v7874_v50, %v6818_v49  ;;  %v6810_v11 = vld [vmem:[#allocation4 + $0x250] sm:$0xf]  ;;  %v7872_v60 = vld [vmem:[#allocation4 + $0x254] sm:$0xf0]  ;;  %v6812_v50 = vld [vmem:[#allocation4 + $0x258] sm:$0xf0] }
 0x564   : > { %3281 = vmatpush.bf16.msrb.mxu1 %v6584_v8  ;;  %3307 = vmatpush.bf16.msrb.mxu3 %v6588_v2  ;;  %v6660_v8 = vor.u32 %v7801_v22, %v6657_v24  ;;  %v6647_v2 = vld [vmem:[#allocation4 + $0x10] sm:$0xf]  ;;  %v6811_v22 = vor.u32 %v7872_v60, %v6810_v11  ;;  %v6876_v11 = vld [vmem:[#allocation4 + $0x2d8] sm:$0xf0]  ;;  %v7869_v60 = vld [vmem:[#allocation4 + $0x244] sm:$0xf] }
 0x565   : > { %v6648_v14 = vor.u32 %v7800_v4, %v6647_v2  ;;  %v7868_v2 = vld [vmem:[#allocation4 + $0x234] sm:$0xf0]  ;;  %v6875_v4 = vor.u32 %v7888_v43, %v6874_v1  ;;  %v7883_v1 = vld [vmem:[#allocation4 + $0x2b4] sm:$0xf]  ;;  %v6860_v43 = vld [vmem:[#allocation4 + $0x2b8] sm:$0xf0] }
 0x566   : > { %3474 = vmatpush.bf16.msra.mxu0 %v6696_v20  ;;  %3500 = vmatpush.bf16.msra.mxu2 %v6700_v0  ;;  %v6727_v20 = vld [vmem:[#allocation4 + $0xb0] sm:$0xf]  ;;  %v7820_v0 = vld [vmem:[#allocation4 + $0xb4] sm:$0xf0] }
 0x567   : > { %v6728_v13 = vor.u32 %v7820_v0, %v6727_v20  ;;  %v7870_v20 = vld [vmem:[#allocation4 + $0x244] sm:$0xf0]  ;;  %v6883_v0 = vor.u32 %v7890_v39, %v6882_v30  ;;  %v7867_v30 = vld [vmem:[#allocation4 + $0x234] sm:$0xf]  ;;  %v6796_v39 = vld [vmem:[#allocation4 + $0x238] sm:$0xf0] }
 0x568   : > { %3282 = vmatpush.bf16.msrb.mxu1 %v6576_v9  ;;  %3308 = vmatpush.bf16.msrb.mxu3 %v6580_v25  ;;  %v6639_v25 = vld [vmem:[#allocation4] sm:$0xf] }
 0x569   : > { %v6640_v3 = vor.u32 %v7798_v38, %v6639_v25  ;;  %v6778_v25 = vld [vmem:[#allocation4 + $0x210] sm:$0xf]  ;;  %v7864_v38 = vld [vmem:[#allocation4 + $0x214] sm:$0xf0] }
 0x56a   : > { %3475 = vmatpush.bf16.msra.mxu0 %v6688_v21  ;;  %3501 = vmatpush.bf16.msra.mxu2 %v6692_v31  ;;  %v7817_v21 = vld [vmem:[#allocation4 + $0xa4] sm:$0xf]  ;;  %v6720_v31 = vor.u32 %v7818_v26, %v6719_v18  ;;  %v7866_v18 = vld [vmem:[#allocation4 + $0x224] sm:$0xf0] }
 0x56b   : > { %v6724_v9 = vor.u32 %v7817_v21, %v6721_v34  ;;  %v6858_v21 = vld [vmem:[#allocation4 + $0x2b0] sm:$0xf] }
 0x56c   : > { %3487 = vmatpush.bf16.msra.mxu1 %v6760_v7  ;;  %3513 = vmatpush.bf16.msra.mxu3 %v6764_v40  ;;  %v6641_v7 = vld [vmem:[#allocation4 + $0x8] sm:$0xf0] }
 0x56d   : > { %v6644_v40 = vor.u32 %v7797_v53, %v6641_v7  ;;  %v7882_v7 = vld [vmem:[#allocation4 + $0x2a4] sm:$0xf0] }
 0x56e   : > { %3476 = vmatpush.bf16.msra.mxu0 %v6680_v59  ;;  %3502 = vmatpush.bf16.msra.mxu2 %v6684_v36  ;;  %v6713_v59 = vld [vmem:[#allocation4 + $0x98] sm:$0xf0] }
 0x56f   : > { %v6716_v36 = vor.u32 %v7815_v16, %v6713_v59  ;;  %v7880_v59 = vld [vmem:[#allocation4 + $0x294] sm:$0xf0] }
 0x570   : > { %3488 = vmatpush.bf16.msra.mxu1 %v6752_v48  ;;  %3514 = vmatpush.bf16.msra.mxu3 %v6756_v41  ;;  %v6705_v48 = vld [vmem:[#allocation4 + $0x88] sm:$0xf0] }
 0x571   : > { %v6708_v41 = vor.u32 %v7813_v17, %v6705_v48  ;;  %v7878_v17 = vld [vmem:[#allocation4 + $0x284] sm:$0xf0] }
 0x572   : > { %3477 = vmatpush.bf16.msra.mxu0 %v6672_v55  ;;  %3503 = vmatpush.bf16.msra.mxu2 %v6676_v58  ;;  %v6827_v55 = vor.u32 %v7876_v23, %v6826_v51  ;;  %v6835_v48 = vor.u32 %v7878_v17, %v6834_v54  ;;  %v7873_v23 = vld [vmem:[#allocation4 + $0x264] sm:$0xf] }
 0x574   : > { %3489 = vmatpush.bf16.msra.mxu1 %v6744_v28  ;;  %3515 = vmatpush.bf16.msra.mxu3 %v6748_v33  ;;  %v6890_v28 = vld [vmem:[#allocation4 + $0x2f0] sm:$0xf]  ;;  %v7892_v33 = vld [vmem:[#allocation4 + $0x2f4] sm:$0xf0] }
 0x576   : > { %3478 = vmatpush.bf16.msra.mxu0 %v6664_v61  ;;  %3504 = vmatpush.bf16.msra.mxu2 %v6668_v63  ;;  %v6891_v61 = vor.u32 %v7892_v33, %v6890_v28  ;;  %v7889_v28 = vld [vmem:[#allocation4 + $0x2e4] sm:$0xf]  ;;  %v6884_v33 = vld [vmem:[#allocation4 + $0x2e8] sm:$0xf0] }
 0x578   : > { %3490 = vmatpush.bf16.msra.mxu1 %v6736_v10  ;;  %3516 = vmatpush.bf16.msra.mxu3 %v6740_v32  ;;  %v6802_v32 = vld [vmem:[#allocation4 + $0x240] sm:$0xf] }
 0x57a   : > { %3479 = vmatpush.bf16.msra.mxu0 %v6656_v6  ;;  %3505 = vmatpush.bf16.msra.mxu2 %v6660_v8  ;;  %v6803_v6 = vor.u32 %v7870_v20, %v6802_v32  ;;  %v6794_v8 = vld [vmem:[#allocation4 + $0x230] sm:$0xf]  ;;  %v7865_v20 = vld [vmem:[#allocation4 + $0x224] sm:$0xf] }
 0x57c   : > { %3491 = vmatpush.bf16.msra.mxu1 %v6728_v13  ;;  %3517 = vmatpush.bf16.msra.mxu3 %v6732_v29  ;;  %v6866_v13 = vld [vmem:[#allocation4 + $0x2c0] sm:$0xf]  ;;  %v7886_v29 = vld [vmem:[#allocation4 + $0x2c4] sm:$0xf0] }
 0x57d   : > { %v6867_v26 = vor.u32 %v7886_v29, %v6866_v13  ;;  %v6852_v13 = vld [vmem:[#allocation4 + $0x2a8] sm:$0xf0] }
 0x57e   : > { %3480 = vmatpush.bf16.msra.mxu0 %v6648_v14  ;;  %3506 = vmatpush.bf16.msra.mxu2 %v6652_v15  ;;  %v6795_v14 = vor.u32 %v7868_v2, %v6794_v8  ;;  %v6786_v15 = vld [vmem:[#allocation4 + $0x220] sm:$0xf]  ;;  %v6863_v8 = vor.u32 %v7883_v1, %v6860_v43  ;;  %v7863_v2 = vld [vmem:[#allocation4 + $0x214] sm:$0xf] }
 0x57f   : > { %v6787_v34 = vor.u32 %v7866_v18, %v6786_v15  ;;  %v6844_v15 = vld [vmem:[#allocation4 + $0x298] sm:$0xf0]  ;;  %v7861_v18 = vld [vmem:[#allocation4 + $0x204] sm:$0xf] }
 0x580   : > { %3492 = vmatpush.bf16.msra.mxu1 %v6720_v31  ;;  %3518 = vmatpush.bf16.msra.mxu3 %v6724_v9  ;;  %v7884_v31 = vld [vmem:[#allocation4 + $0x2b4] sm:$0xf0] }
 0x581   : > { %v6859_v53 = vor.u32 %v7884_v31, %v6858_v21  ;;  %v6772_v21 = vld [vmem:[#allocation4 + $0x208] sm:$0xf0] }
 0x582   : > { %3481 = vmatpush.bf16.msra.mxu0 %v6640_v3  ;;  %3507 = vmatpush.bf16.msra.mxu2 %v6644_v40  ;;  %v6850_v3 = vld [vmem:[#allocation4 + $0x2a0] sm:$0xf]  ;;  %v6779_v40 = vor.u32 %v7864_v38, %v6778_v25  ;;  %v6836_v25 = vld [vmem:[#allocation4 + $0x288] sm:$0xf0] }
 0x583   : > { %v6851_v16 = vor.u32 %v7882_v7, %v6850_v3 }
 0x584   : > { %3493 = vmatpush.bf16.msra.mxu1 %v6712_v45  ;;  %3519 = vmatpush.bf16.msra.mxu3 %v6716_v36  ;;  %v6842_v45 = vld [vmem:[#allocation4 + $0x290] sm:$0xf]  ;;  %v6771_v36 = vor.u32 %v7862_v42, %v6770_v27 }
 0x585   : > { %v6843_v19 = vor.u32 %v7880_v59, %v6842_v45 }
 0x588   : > { %3494 = vmatpush.bf16.msra.mxu1 %v6704_v44  ;;  %3520 = vmatpush.bf16.msra.mxu3 %v6708_v41  ;;  %v6765_v44 = vld [vmem:[%s9466_s7 + $0x8] sm:$0xf]  ;;  %v7875_v41 = vld [vmem:[#allocation4 + $0x274] sm:$0xf] }
 0x5c2   : > { %v2985_v46 = vpop.f32.mrf.mxu0 }
 0x5c3   : > { %v3002_v12 = vpack.c.bf16 %v2985_v46, %v2985_v46  ;;  %v6828_v46 = vld [vmem:[#allocation4 + $0x278] sm:$0xf0] }
 0x5c4   : > { %v6831_v51 = vor.u32 %v7875_v41, %v6828_v46  ;;  %v6957_v46 = vld [vmem:[#allocation4 + $0x370] sm:$0xf] }
 0x5c8   : > { %v3050_v5 = vpop.f32.mrf.mxu2  ;;  %v2998_v58 = vpop.f32.mrf.mxu1 }
 0x5c9   : > { %v3067_v47 = vpack.c.bf16 %v3050_v5, %v3050_v5  ;;  %v3003_v9 = vpack.c.bf16 %v2998_v58, %v2998_v58  ;;  %v6820_v5 = vld [vmem:[#allocation4 + $0x268] sm:$0xf0]  ;;  %v6892_v58 = vld [vmem:[#allocation4 + $0x2f8] sm:$0xf0] }
 0x5ca   : > { %v2987_v56 = vpop.f32.mrf.mxu0 }
 0x5cb   : > { %3270 = vmatmul.bf16.vlgmr.msrb.gmra.mxu0 %v3067_v47  ;;  %3296 = vmatmul.bf16.vlgmr.msrb.gmra.mxu2 %v3067_v47  ;;  %v6823_v47 = vor.u32 %v7873_v23, %v6820_v5  ;;  %v7021_v23 = vld [vmem:[#allocation4 + $0x3f0] sm:$0xf] }
 0x5cc   : > { %3538 = vmatpush.bf16.msrb.mxu0 %v9361_v37  ;;  %3752 = vmatpush.bf16.msrb.mxu2 %v6827_v55  ;;  %v7891_v55 = vld [vmem:[#allocation4 + $0x2f4] sm:$0xf] }
 0x5cd   : > { %v6895_v49 = vor.u32 %v7891_v55, %v6892_v58  ;;  %v7924_v55 = vld [vmem:[#allocation4 + $0x3f4] sm:$0xf0] }
 0x5ce   : > { %v3063_v35 = vpop.f32.mrf.mxu3  ;;  %v7022_v58 = vor.u32 %v7924_v55, %v7021_v23  ;;  %v7898_v55 = vld [vmem:[#allocation4 + $0x324] sm:$0xf0] }
 0x5cf   : > { %v3068_v63 = vpack.c.bf16 %v3063_v35, %v3063_v35 }
 0x5d0   : > { %3753 = vmatpush.bf16.msrb.mxu2 %v6819_v57  ;;  %v3052_v24 = vpop.f32.mrf.mxu2  ;;  %v3000_v10 = vpop.f32.mrf.mxu1  ;;  %v7887_v57 = vld [vmem:[#allocation4 + $0x2d4] sm:$0xf] }
 0x5d1   : > { %3283 = vmatmul.bf16.vlgmr.msrb.gmra.mxu1 %v3068_v63  ;;  %3309 = vmatmul.bf16.vlgmr.msrb.gmra.mxu3 %v3068_v63  ;;  %v6879_v35 = vor.u32 %v7887_v57, %v6876_v11  ;;  %v7885_v24 = vld [vmem:[#allocation4 + $0x2c4] sm:$0xf]  ;;  %v6868_v10 = vld [vmem:[#allocation4 + $0x2c8] sm:$0xf0] }
 0x5d2   : > { %3551 = vmatpush.bf16.msrb.mxu1 %v9374_v62  ;;  %3765 = vmatpush.bf16.msrb.mxu3 %v6891_v61  ;;  %v6804_v61 = vld [vmem:[#allocation4 + $0x248] sm:$0xf0]  ;;  %v6871_v32 = vor.u32 %v7885_v24, %v6868_v10  ;;  %v7923_v24 = vld [vmem:[#allocation4 + $0x3f4] sm:$0xf]  ;;  %v7023_v10 = vld [vmem:[#allocation4 + $0x3f8] sm:$0xf0] }
 0x5d3   : > { %v6807_v63 = vor.u32 %v7869_v60, %v6804_v61  ;;  %v7026_v1 = vor.u32 %v7923_v24, %v7023_v10  ;;  %v7913_v24 = vld [vmem:[#allocation4 + $0x3a4] sm:$0xf] }
 0x5d4   : > { %3754 = vmatpush.bf16.msrb.mxu2 %v6811_v22  ;;  %v6799_v22 = vor.u32 %v7867_v30, %v6796_v39  ;;  %v7905_v39 = vld [vmem:[#allocation4 + $0x364] sm:$0xf] }
 0x5d6   : > { %3766 = vmatpush.bf16.msrb.mxu3 %v6883_v0  ;;  %v3065_v52 = vpop.f32.mrf.mxu3  ;;  %v6788_v0 = vld [vmem:[#allocation4 + $0x228] sm:$0xf0] }
 0x5d8   : > { %3755 = vmatpush.bf16.msrb.mxu2 %v6803_v6  ;;  %v6791_v6 = vor.u32 %v7865_v20, %v6788_v0 }
 0x5da   : > { %3767 = vmatpush.bf16.msrb.mxu3 %v6875_v4  ;;  %v6780_v4 = vld [vmem:[#allocation4 + $0x218] sm:$0xf0] }
 0x5db   : > { %3482 = vmatmul.bf16.vlgmr.msra.gmra.mxu0 %v3002_v12  ;;  %3508 = vmatmul.bf16.vlgmr.msra.gmra.mxu2 %v3002_v12  ;;  %v6783_v52 = vor.u32 %v7863_v2, %v6780_v4  ;;  %v7881_v12 = vld [vmem:[#allocation4 + $0x2a4] sm:$0xf] }
 0x5dc   : > { %3756 = vmatpush.bf16.msrb.mxu2 %v6795_v14  ;;  %3778 = vmatpush.bf16.msra.mxu0 %v6831_v51  ;;  %v6855_v29 = vor.u32 %v7881_v12, %v6852_v13  ;;  %v7879_v14 = vld [vmem:[#allocation4 + $0x294] sm:$0xf]  ;;  %v7908_v51 = vld [vmem:[#allocation4 + $0x374] sm:$0xf0]  ;;  %v6896_v12 = vld [vmem:[%s9466_s7 + $0xc] sm:$0xf] }
 0x5dd   : > { %v6958_v5 = vor.u32 %v7908_v51, %v6957_v46  ;;  %v6941_v13 = vld [vmem:[#allocation4 + $0x350] sm:$0xf]  ;;  %v6999_v51 = vld [vmem:[#allocation4 + $0x3c8] sm:$0xf0] }
 0x5de   : > { %3768 = vmatpush.bf16.msrb.mxu3 %v6867_v26  ;;  %v6847_v26 = vor.u32 %v7879_v14, %v6844_v15  ;;  %v7903_v14 = vld [vmem:[#allocation4 + $0x354] sm:$0xf] }
 0x5e0   : > { %3757 = vmatpush.bf16.msrb.mxu2 %v6787_v34  ;;  %3779 = vmatpush.bf16.msra.mxu0 %v6823_v47  ;;  %v6775_v34 = vor.u32 %v7861_v18, %v6772_v21  ;;  %v6949_v47 = vld [vmem:[#allocation4 + $0x360] sm:$0xf]  ;;  %v6943_v18 = vld [vmem:[#allocation4 + $0x358] sm:$0xf0] }
 0x5e1   : > { %3495 = vmatmul.bf16.vlgmr.msra.gmra.mxu1 %v3003_v9  ;;  %3521 = vmatmul.bf16.vlgmr.msra.gmra.mxu3 %v3003_v9  ;;  %v7877_v9 = vld [vmem:[#allocation4 + $0x284] sm:$0xf]  ;;  %v6933_v21 = vld [vmem:[#allocation4 + $0x340] sm:$0xf] }
 0x5e2   : > { %3769 = vmatpush.bf16.msrb.mxu3 %v6859_v53  ;;  %3791 = vmatpush.bf16.msra.mxu1 %v6895_v49  ;;  %v6839_v38 = vor.u32 %v7877_v9, %v6836_v25  ;;  %v6935_v25 = vld [vmem:[#allocation4 + $0x348] sm:$0xf0] }
 0x5e4   : > { %3758 = vmatpush.bf16.msrb.mxu2 %v6779_v40 }
 0x5e6   : > { %3770 = vmatpush.bf16.msrb.mxu3 %v6851_v16 }
 0x5e8   : > { %3759 = vmatpush.bf16.msrb.mxu2 %v6771_v36 }
 0x5ea   : > { %3771 = vmatpush.bf16.msrb.mxu3 %v6843_v19 }
 0x5eb   : > { %6766 = vmatmul.msk.bf16.vlgmr.msrb.gmra.mxu0 %vm2972_vm13, %v6765_v44 }
 0x5ec   : > { %3818 = vmatpush.bf16.msra.mxu2 %v9361_v37  ;;  %v7871_v37 = vld [vmem:[#allocation4 + $0x254] sm:$0xf] }
 0x5ed   : > { %v6815_v56 = vor.u32 %v7871_v37, %v6812_v50  ;;  %v7906_v37 = vld [vmem:[#allocation4 + $0x364] sm:$0xf0]  ;;  %v7013_v50 = vld [vmem:[#allocation4 + $0x3e0] sm:$0xf] }
 0x5ee   : > { %3772 = vmatpush.bf16.msrb.mxu3 %v6835_v48  ;;  %v6950_v57 = vor.u32 %v7906_v37, %v6949_v47  ;;  %v6989_v37 = vld [vmem:[#allocation4 + $0x3b0] sm:$0xf] }
 0x5ef   : > { %3780 = vmatpush.bf16.msra.mxu0 %v6815_v56  ;;  %v7922_v56 = vld [vmem:[#allocation4 + $0x3e4] sm:$0xf0] }
 0x5f0   : > { %v7014_v11 = vor.u32 %v7922_v56, %v7013_v50  ;;  %v7916_v50 = vld [vmem:[#allocation4 + $0x3b4] sm:$0xf0]  ;;  %v7915_v56 = vld [vmem:[#allocation4 + $0x3b4] sm:$0xf] }
 0x5f1   : > { %6767 = vmatmul.msk.bf16.vlgmr.msrb.gmra.mxu1 %vm2972_vm13, %v6765_v44 }
 0x5f2   : > { %3831 = vmatpush.bf16.msra.mxu3 %v9374_v62  ;;  %v6887_v62 = vor.u32 %v7889_v28, %v6884_v33  ;;  %v7907_v33 = vld [vmem:[#allocation4 + $0x374] sm:$0xf] }
 0x5f3   : > { %3781 = vmatpush.bf16.msra.mxu0 %v6807_v63 }
 0x5f4   : > { %3792 = vmatpush.bf16.msra.mxu1 %v6887_v62  ;;  %v6959_v62 = vld [vmem:[#allocation4 + $0x378] sm:$0xf0] }
 0x5f5   : > { %v6962_v63 = vor.u32 %v7907_v33, %v6959_v62  ;;  %v6990_v62 = vor.u32 %v7916_v50, %v6989_v37  ;;  %v7090_v50 = vld [vmem:[#allocation6 + $0x170] sm:$0xf] }
 0x5f7   : > { %3782 = vmatpush.bf16.msra.mxu0 %v6799_v22  ;;  %v6951_v22 = vld [vmem:[#allocation4 + $0x368] sm:$0xf0] }
 0x5f8   : > { %3793 = vmatpush.bf16.msra.mxu1 %v6879_v35  ;;  %v6954_v20 = vor.u32 %v7905_v39, %v6951_v22  ;;  %v6981_v39 = vld [vmem:[#allocation4 + $0x3a0] sm:$0xf]  ;;  %v7914_v22 = vld [vmem:[#allocation4 + $0x3a4] sm:$0xf0] }
 0x5fb   : > { %3783 = vmatpush.bf16.msra.mxu0 %v6791_v6  ;;  %v7921_v6 = vld [vmem:[#allocation4 + $0x3e4] sm:$0xf] }
 0x5fc   : > { %3794 = vmatpush.bf16.msra.mxu1 %v6871_v32 }
 0x5ff   : > { %3784 = vmatpush.bf16.msra.mxu0 %v6783_v52 }
 0x600   : > { %3795 = vmatpush.bf16.msra.mxu1 %v6863_v8  ;;  %v7015_v8 = vld [vmem:[#allocation4 + $0x3e8] sm:$0xf0] }
 0x601   : > { %v7018_v4 = vor.u32 %v7921_v6, %v7015_v8  ;;  %v7911_v6 = vld [vmem:[#allocation4 + $0x394] sm:$0xf] }
 0x603   : > { %3785 = vmatpush.bf16.msra.mxu0 %v6775_v34  ;;  %v7901_v34 = vld [vmem:[#allocation4 + $0x344] sm:$0xf] }
 0x604   : > { %3796 = vmatpush.bf16.msra.mxu1 %v6855_v29  ;;  %v7904_v29 = vld [vmem:[#allocation4 + $0x354] sm:$0xf0] }
 0x605   : > { %v6942_v15 = vor.u32 %v7904_v29, %v6941_v13  ;;  %v7893_v29 = vld [vmem:[#allocation4 + $0x304] sm:$0xf] }
 0x607   : > { %4032 = vmatpush.bf16.msrb.mxu0 %v6958_v5  ;;  %v6917_v5 = vld [vmem:[#allocation4 + $0x320] sm:$0xf] }
 0x608   : > { %3797 = vmatpush.bf16.msra.mxu1 %v6847_v26  ;;  %v6946_v26 = vor.u32 %v7903_v14, %v6943_v18  ;;  %v6918_v47 = vor.u32 %v7898_v55, %v6917_v5  ;;  %v6903_v14 = vld [vmem:[#allocation4 + $0x308] sm:$0xf0]  ;;  %v6965_v18 = vld [vmem:[#allocation4 + $0x380] sm:$0xf] }
 0x60b   : > { %4033 = vmatpush.bf16.msrb.mxu0 %v6950_v57  ;;  %v6991_v57 = vld [vmem:[#allocation4 + $0x3b8] sm:$0xf0] }
 0x60c   : > { %3798 = vmatpush.bf16.msra.mxu1 %v6839_v38  ;;  %v7005_v38 = vld [vmem:[#allocation4 + $0x3d0] sm:$0xf] }
 0x60f   : > { %4034 = vmatpush.bf16.msrb.mxu0 %v6942_v15  ;;  %v6906_v15 = vor.u32 %v7893_v29, %v6903_v14 }
 0x610   : > { %4045 = vmatpush.bf16.msrb.mxu1 %v7022_v58  ;;  %v7897_v58 = vld [vmem:[#allocation4 + $0x324] sm:$0xf] }
 0x614   : > { %4046 = vmatpush.bf16.msrb.mxu1 %v7014_v11  ;;  %v6994_v11 = vor.u32 %v7915_v56, %v6991_v57  ;;  %v7972_v56 = vld [vmem:[#allocation6 + $0x174] sm:$0xf0] }
 0x648   : > { %v3271_v31 = vpop.f32.mrf.mxu0 }
 0x64e   : > { %v3284_v53 = vpop.f32.mrf.mxu1  ;;  %v3297_v3 = vpop.f32.mrf.mxu2 }
 0x64f   : > { %v3285_v7 = vadd.f32 %v3284_v53, %v3271_v31  ;;  %v7902_v31 = vld [vmem:[#allocation4 + $0x344] sm:$0xf0]  ;;  %v7920_v53 = vld [vmem:[#allocation4 + $0x3d4] sm:$0xf0] }
 0x650   : > { %v3273_v40 = vpop.f32.mrf.mxu0  ;;  %v6934_v9 = vor.u32 %v7902_v31, %v6933_v21  ;;  %v7909_v21 = vld [vmem:[#allocation4 + $0x384] sm:$0xf] }
 0x651   : > { %v7006_v40 = vor.u32 %v7920_v53, %v7005_v38 }
 0x652   : > { %4035 = vmatpush.bf16.msrb.mxu0 %v6934_v9 }
 0x653   : > { %4047 = vmatpush.bf16.msrb.mxu1 %v7006_v40 }
 0x654   : > { %v3310_v27 = vpop.f32.mrf.mxu3 }
 0x655   : > { %v3311_v42 = vadd.f32 %v3310_v27, %v3297_v3  ;;  %v7919_v3 = vld [vmem:[#allocation4 + $0x3d4] sm:$0xf]  ;;  %v7007_v27 = vld [vmem:[#allocation4 + $0x3d8] sm:$0xf0] }
 0x656   : > { %v3286_v16 = vpop.f32.mrf.mxu1  ;;  %v3299_v45 = vpop.f32.mrf.mxu2 }
 0x657   : > { %v6925_v16 = vld [vmem:[#allocation4 + $0x330] sm:$0xf]  ;;  %v7900_v45 = vld [vmem:[#allocation4 + $0x334] sm:$0xf0] }
 0x658   : > { %v3483_v59 = vpop.f32.mrf.mxu0 }
 0x659   : > { %v3484_v36 = vadd.f32 %v3483_v59, %v3285_v7  ;;  %v6938_v7 = vor.u32 %v7901_v34, %v6935_v25  ;;  %v7899_v59 = vld [vmem:[#allocation4 + $0x334] sm:$0xf]  ;;  %v6967_v34 = vld [vmem:[#allocation4 + $0x388] sm:$0xf0] }
 0x65a   : > { %v6970_v9 = vor.u32 %v7909_v21, %v6967_v34  ;;  %v7968_v21 = vld [vmem:[#allocation6 + $0x154] sm:$0xf0] }
 0x65c   : > { %v3312_v19 = vpop.f32.mrf.mxu3 }
 0x65d   : > { %v6927_v19 = vld [vmem:[#allocation4 + $0x338] sm:$0xf0] }
 0x65e   : > { %v3496_v54 = vpop.f32.mrf.mxu1  ;;  %v3509_v17 = vpop.f32.mrf.mxu2 }
 0x65f   : > { %v9389_v44 = vadd.f32 %v3496_v54, %v3484_v36  ;;  %v3510_v48 = vadd.f32 %v3509_v17, %v3311_v42  ;;  %v7010_v42 = vor.u32 %v7919_v3, %v7007_v27  ;;  %v6926_v36 = vor.u32 %v7900_v45, %v6925_v16  ;;  %v6997_v54 = vld [vmem:[#allocation4 + $0x3c0] sm:$0xf]  ;;  %v7918_v17 = vld [vmem:[#allocation4 + $0x3c4] sm:$0xf0] }
 0x660   : > { %v3485_v41 = vpop.f32.mrf.mxu0  ;;  %v6998_v46 = vor.u32 %v7918_v17, %v6997_v54 }
 0x661   : > { %v6930_v41 = vor.u32 %v7899_v59, %v6927_v19  ;;  %4036 = vmatpush.bf16.msrb.mxu0 %v6926_v36 }
 0x662   : > { %4048 = vmatpush.bf16.msrb.mxu1 %v6998_v46 }
 0x664   : > { %v3522_v49 = vpop.f32.mrf.mxu3 }
 0x665   : > { %v9391_v28 = vadd.f32 %v3522_v49, %v3510_v48  ;;  %v7917_v48 = vld [vmem:[#allocation4 + $0x3c4] sm:$0xf]  ;;  %v6919_v49 = vld [vmem:[#allocation4 + $0x328] sm:$0xf0]  ;;  %4037 = vmatpush.bf16.msrb.mxu0 %v6918_v47 }
 0x666   : > { %v3498_v60 = vpop.f32.mrf.mxu1  ;;  %v3511_v35 = vpop.f32.mrf.mxu2  ;;  %v7002_v23 = vor.u32 %v7917_v48, %v6999_v51  ;;  %v6922_v33 = vor.u32 %v7897_v58, %v6919_v49  ;;  %4049 = vmatpush.bf16.msrb.mxu1 %v6990_v62 }
 0x667   : > { %v6909_v60 = vld [vmem:[#allocation4 + $0x310] sm:$0xf]  ;;  %v7896_v35 = vld [vmem:[#allocation4 + $0x314] sm:$0xf0] }
 0x668   : > { %v3540_v61 = vpop.f32.mrf.mxu0 }
 0x669   : > { %v3557_v30 = vpack.c.bf16 %v3540_v61, %v3540_v61  ;;  %v7895_v61 = vld [vmem:[#allocation4 + $0x314] sm:$0xf] }
 0x66b   : > { %3760 = vmatmul.bf16.vlgmr.msrb.gmra.mxu2 %v3557_v30  ;;  %3786 = vmatmul.bf16.vlgmr.msra.gmra.mxu0 %v3557_v30  ;;  %v6911_v30 = vld [vmem:[#allocation4 + $0x318] sm:$0xf0] }
 0x66c   : > { %v3524_v32 = vpop.f32.mrf.mxu3  ;;  %4058 = vmatpush.bf16.msrb.mxu2 %v6962_v63  ;;  %v6910_v63 = vor.u32 %v7896_v35, %v6909_v60  ;;  %v6914_v10 = vor.u32 %v7895_v61, %v6911_v30  ;;  %v7092_v60 = vld [vmem:[#allocation6 + $0x178] sm:$0xf0] }
 0x66d   : > { %v6982_v32 = vor.u32 %v7914_v22, %v6981_v39  ;;  %v7091_v22 = vor.u32 %v7972_v56, %v7090_v50  ;;  %v7982_v50 = vld [vmem:[#allocation6 + $0x1c4] sm:$0xf0]  ;;  %v7981_v56 = vld [vmem:[#allocation6 + $0x1c4] sm:$0xf] }
 0x66e   : > { %v3553_v0 = vpop.f32.mrf.mxu1  ;;  %4038 = vmatpush.bf16.msrb.mxu0 %v6910_v63 }
 0x66f   : > { %v3558_v43 = vpack.c.bf16 %v3553_v0, %v3553_v0  ;;  %4050 = vmatpush.bf16.msrb.mxu1 %v6982_v32  ;;  %v7970_v32 = vld [vmem:[#allocation6 + $0x164] sm:$0xf0] }
 0x670   : > { %v3542_v2 = vpop.f32.mrf.mxu0  ;;  %4059 = vmatpush.bf16.msrb.mxu2 %v6954_v20  ;;  %v6983_v20 = vld [vmem:[#allocation4 + $0x3a8] sm:$0xf0] }
 0x671   : > { %3773 = vmatmul.bf16.vlgmr.msrb.gmra.mxu3 %v3558_v43  ;;  %3799 = vmatmul.bf16.vlgmr.msra.gmra.mxu1 %v3558_v43  ;;  %v6986_v0 = vor.u32 %v7913_v24, %v6983_v20  ;;  %v7912_v43 = vld [vmem:[#allocation4 + $0x394] sm:$0xf0]  ;;  %v6975_v2 = vld [vmem:[#allocation4 + $0x398] sm:$0xf0] }
 0x672   : > { %4071 = vmatpush.bf16.msrb.mxu3 %v7026_v1  ;;  %v6973_v1 = vld [vmem:[#allocation4 + $0x390] sm:$0xf] }
 0x673   : > { %v6974_v8 = vor.u32 %v7912_v43, %v6973_v1  ;;  %v4102_v1 = vld [vmem:[%s9469_s10] sm:$0x3]  ;;  %v7969_v43 = vld [vmem:[#allocation6 + $0x164] sm:$0xf] }
 0x674   : > { %4060 = vmatpush.bf16.msrb.mxu2 %v6946_v26  ;;  %v7910_v26 = vld [vmem:[#allocation4 + $0x384] sm:$0xf0] }
 0x675   : > { %4051 = vmatpush.bf16.msrb.mxu1 %v6974_v8  ;;  %v6966_v31 = vor.u32 %v7910_v26, %v6965_v18  ;;  %v7154_v8 = vld [vmem:[#allocation6 + $0x1f0] sm:$0xf] }
 0x676   : > { %v3555_v52 = vpop.f32.mrf.mxu1  ;;  %4072 = vmatpush.bf16.msrb.mxu3 %v7018_v4  ;;  %v6901_v4 = vld [vmem:[#allocation4 + $0x300] sm:$0xf]  ;;  %v7074_v26 = vld [vmem:[#allocation6 + $0x150] sm:$0xf] }
 0x677   : > { %v7894_v52 = vld [vmem:[#allocation4 + $0x304] sm:$0xf0] }
 0x678   : > { %4061 = vmatpush.bf16.msrb.mxu2 %v6938_v7  ;;  %v6902_v13 = vor.u32 %v7894_v52, %v6901_v4  ;;  %v7988_v4 = vld [vmem:[#allocation6 + $0x1f4] sm:$0xf0]  ;;  %v7987_v52 = vld [vmem:[#allocation6 + $0x1f4] sm:$0xf] }
 0x679   : > { %4052 = vmatpush.bf16.msrb.mxu1 %v6966_v31  ;;  %v7155_v34 = vor.u32 %v7988_v4, %v7154_v8  ;;  %v7959_v8 = vld [vmem:[#allocation6 + $0x114] sm:$0xf]  ;;  %v7044_v4 = vld [vmem:[#allocation6 + $0x118] sm:$0xf0] }
 0x67a   : > { %4073 = vmatpush.bf16.msrb.mxu3 %v7010_v42  ;;  %4039 = vmatpush.bf16.msrb.mxu0 %v6902_v13  ;;  %v7156_v13 = vld [vmem:[#allocation6 + $0x1f8] sm:$0xf0] }
 0x67b   : > { %6897 = vmatmul.msk.bf16.vlgmr.msra.gmra.mxu2 %vm2972_vm13, %v6896_v12 }
 0x67c   : > { %4062 = vmatpush.bf16.msrb.mxu2 %v6930_v41 }
 0x67e   : > { %4074 = vmatpush.bf16.msrb.mxu3 %v7002_v23 }
 0x680   : > { %4063 = vmatpush.bf16.msrb.mxu2 %v6922_v33  ;;  %v7971_v33 = vld [vmem:[#allocation6 + $0x174] sm:$0xf] }
 0x681   : > { %6898 = vmatmul.msk.bf16.vlgmr.msra.gmra.mxu3 %vm2972_vm13, %v6896_v12  ;;  %v6978_v12 = vor.u32 %v7911_v6, %v6975_v2  ;;  %v7095_v24 = vor.u32 %v7971_v33, %v7092_v60  ;;  %v7084_v6 = vld [vmem:[#allocation6 + $0x168] sm:$0xf0]  ;;  %v7962_v60 = vld [vmem:[#allocation6 + $0x124] sm:$0xf0] }
 0x682   : > { %4075 = vmatpush.bf16.msrb.mxu3 %v6994_v11  ;;  %v7132_v33 = vld [vmem:[#allocation6 + $0x1c8] sm:$0xf0] }
 0x684   : > { %4064 = vmatpush.bf16.msrb.mxu2 %v6914_v10  ;;  %v7082_v10 = vld [vmem:[#allocation6 + $0x160] sm:$0xf] }
 0x685   : > { %v7083_v14 = vor.u32 %v7970_v32, %v7082_v10  ;;  %v7124_v10 = vld [vmem:[#allocation6 + $0x1b8] sm:$0xf0] }
 0x686   : > { %4076 = vmatpush.bf16.msrb.mxu3 %v6986_v0  ;;  %v7029_v0 = vld [vmem:[%s9469_s10 + $0x2] sm:$0x3] }
 0x688   : > { %4065 = vmatpush.bf16.msrb.mxu2 %v6906_v15  ;;  %v7087_v15 = vor.u32 %v7969_v43, %v7084_v6 }
 0x68a   : > { %4077 = vmatpush.bf16.msrb.mxu3 %v6978_v12 }
 0x68e   : > { %4078 = vmatpush.bf16.msrb.mxu3 %v6970_v9  ;;  %v7159_v9 = vor.u32 %v7987_v52, %v7156_v13  ;;  %v7114_v52 = vld [vmem:[#allocation6 + $0x1a0] sm:$0xf]  ;;  %v7977_v13 = vld [vmem:[#allocation6 + $0x1a4] sm:$0xf] }
 0x6e8   : > { %v3787_v25 = vpop.f32.mrf.mxu0 }
 0x6ee   : > { %v3800_v38 = vpop.f32.mrf.mxu1  ;;  %v3761_v53 = vpop.f32.mrf.mxu2 }
 0x6ef   : > { %v3801_v3 = vadd.f32 %v3800_v38, %v3787_v25  ;;  %v7967_v25 = vld [vmem:[#allocation6 + $0x154] sm:$0xf]  ;;  %v7076_v38 = vld [vmem:[#allocation6 + $0x158] sm:$0xf0] }
 0x6f0   : > { %v3789_v7 = vpop.f32.mrf.mxu0 }
 0x6f1   : > { %v3805_v40 = vadd.f32 %v3801_v3, %v9391_v28  ;;  %v4086_v28 = vld [vmem:[%s9468_s9] sm:$0x3]  ;;  %v7986_v3 = vld [vmem:[#allocation6 + $0x1e4] sm:$0xf0]  ;;  %v7985_v7 = vld [vmem:[#allocation6 + $0x1e4] sm:$0xf] }
 0x6f2   : > { %v4089_v11 = vperm.slane %v4086_v28, 1 }
 0x6f4   : > { %v3774_v27 = vpop.f32.mrf.mxu3 }
 0x6f5   : > { %v3775_v42 = vadd.f32 %v3774_v27, %v3761_v53  ;;  %v7146_v53 = vld [vmem:[#allocation6 + $0x1e0] sm:$0xf] }
 0x6f6   : > { %v3802_v16 = vpop.f32.mrf.mxu1  ;;  %v3763_v45 = vpop.f32.mrf.mxu2 }
 0x6f7   : > { %v3804_v59 = vadd.f32 %v3775_v42, %v9389_v44  ;;  %v4088_v44 = vperm.slane %v4086_v28, 0  ;;  %v7075_v42 = vor.u32 %v7968_v21, %v7074_v26  ;;  %v7079_v16 = vor.u32 %v7967_v25, %v7076_v38  ;;  %v7066_v45 = vld [vmem:[#allocation6 + $0x140] sm:$0xf]  ;;  %v7958_v26 = vld [vmem:[#allocation6 + $0x104] sm:$0xf0] }
 0x6f8   : > { %v7957_v21 = vld [vmem:[#allocation6 + $0x104] sm:$0xf]  ;;  %v7218_v25 = vld [vmem:[#allocation6 + $0x70] sm:$0xf]  ;;  %v7940_v38 = vld [vmem:[#allocation6 + $0x74] sm:$0xf0] }
 0x6fc   : > { %v3776_v36 = vpop.f32.mrf.mxu3 }
 0x6fd   : > { %v7147_v36 = vor.u32 %v7986_v3, %v7146_v53  ;;  %v7939_v53 = vld [vmem:[#allocation6 + $0x74] sm:$0xf]  ;;  %v7220_v3 = vld [vmem:[#allocation6 + $0x78] sm:$0xf0] }
 0x6fe   : > { %v3820_v19 = vpop.f32.mrf.mxu2 }
 0x6ff   : > { %v3837_v54 = vpack.c.bf16 %v3820_v19, %v3820_v19 }
 0x701   : > { %4040 = vmatmul.bf16.vlgmr.msrb.gmra.mxu0 %v3837_v54  ;;  %4066 = vmatmul.bf16.vlgmr.msrb.gmra.mxu2 %v3837_v54  ;;  %v7965_v54 = vld [vmem:[#allocation6 + $0x144] sm:$0xf] }
 0x704   : > { %v3833_v17 = vpop.f32.mrf.mxu3 }
 0x705   : > { %v3838_v48 = vpack.c.bf16 %v3833_v17, %v3833_v17  ;;  %v7068_v17 = vld [vmem:[#allocation6 + $0x148] sm:$0xf0] }
 0x706   : > { %v3822_v41 = vpop.f32.mrf.mxu2 }
 0x707   : > { %4053 = vmatmul.bf16.vlgmr.msrb.gmra.mxu1 %v3838_v48  ;;  %4079 = vmatmul.bf16.vlgmr.msrb.gmra.mxu3 %v3838_v48  ;;  %v7138_v48 = vld [vmem:[#allocation6 + $0x1d0] sm:$0xf]  ;;  %v7984_v41 = vld [vmem:[#allocation6 + $0x1d4] sm:$0xf0] }
 0x70c   : > { %v3835_v46 = vpop.f32.mrf.mxu3 }
 0x70d   : > { %v7983_v46 = vld [vmem:[#allocation6 + $0x1d4] sm:$0xf] }
 0x77e   : > { %v4041_v51 = vpop.f32.mrf.mxu0 }
 0x784   : > { %v4054_v23 = vpop.f32.mrf.mxu1  ;;  %v4067_v5 = vpop.f32.mrf.mxu2 }
 0x785   : > { %v4055_v55 = vadd.f32 %v4054_v23, %v4041_v51  ;;  %v7140_v51 = vld [vmem:[#allocation6 + $0x1d8] sm:$0xf0]  ;;  %v7071_v23 = vor.u32 %v7965_v54, %v7068_v17  ;;  %v7210_v54 = vld [vmem:[#allocation6 + $0x60] sm:$0xf]  ;;  %v7938_v17 = vld [vmem:[#allocation6 + $0x64] sm:$0xf0] }
 0x786   : > { %v4043_v58 = vpop.f32.mrf.mxu0 }
 0x787   : > { %v4084_v47 = vadd.f32 %v4055_v55, %v3804_v59  ;;  %v7966_v59 = vld [vmem:[#allocation6 + $0x144] sm:$0xf0]  ;;  %v7964_v55 = vld [vmem:[#allocation6 + $0x134] sm:$0xf0]  ;;  %v7143_v58 = vor.u32 %v7983_v46, %v7140_v51  ;;  %v7212_v51 = vld [vmem:[#allocation6 + $0x68] sm:$0xf0] }
 0x788   : > { %v7067_v28 = vor.u32 %v7966_v59, %v7066_v45 }
 0x789   : > { %v4092_v49 = vadd.f32 %v4088_v44, %v4084_v47  ;;  %v7139_v44 = vor.u32 %v7984_v41, %v7138_v48  ;;  %v7963_v47 = vld [vmem:[#allocation6 + $0x134] sm:$0xf]  ;;  %v7937_v48 = vld [vmem:[#allocation6 + $0x64] sm:$0xf] }
 0x78a   : > { %v4080_v37 = vpop.f32.mrf.mxu3 }
 0x78b   : > { %v4096_v62 = vmul.f32 0.2, %v4092_v49  ;;  %v4081_v57 = vadd.f32 %v4080_v37, %v4067_v5  ;;  %vm4094_vm15 = vcmp.ge.f32.partialorder %v4092_v49, 0.0  ;;  %v7058_v5 = vld [vmem:[#allocation6 + $0x130] sm:$0xf] }
 0x78c   : > { %v4056_v35 = vpop.f32.mrf.mxu1  ;;  %v4069_v61 = vpop.f32.mrf.mxu2  ;;  %v7130_v37 = vld [vmem:[#allocation6 + $0x1c0] sm:$0xf] }
 0x78d   : > { %v4085_v63 = vadd.f32 %v4081_v57, %v3805_v40  ;;  %v4098_v30 = vsel %vm4094_vm15, %v4092_v49, %v4096_v62  ;;  %v7148_v40 = vld [vmem:[#allocation6 + $0x1e8] sm:$0xf0]  ;;  %v7060_v49 = vld [vmem:[#allocation6 + $0x138] sm:$0xf0]  ;;  %v7059_v62 = vor.u32 %v7964_v55, %v7058_v5  ;;  %v7131_v35 = vor.u32 %v7982_v50, %v7130_v37  ;;  %v7973_v5 = vld [vmem:[#allocation6 + $0x184] sm:$0xf] }
 0x78e   : > { %v4100_v39 = vpack.c.bf16 %v4098_v30, %v4098_v30  ;;  %v7151_v19 = vor.u32 %v7985_v7, %v7148_v40  ;;  %v7063_v57 = vor.u32 %v7963_v47, %v7060_v49  ;;  %v7135_v61 = vor.u32 %v7981_v56, %v7132_v33  ;;  %v7052_v30 = vld [vmem:[#allocation6 + $0x128] sm:$0xf0]  ;;  %v7106_v7 = vld [vmem:[#allocation6 + $0x190] sm:$0xf]  ;;  %v7976_v40 = vld [vmem:[#allocation6 + $0x194] sm:$0xf0] }
 0x78f   : > { %v4093_v20 = vadd.f32 %v4089_v11, %v4085_v63  ;;  %v7050_v11 = vld [vmem:[#allocation6 + $0x120] sm:$0xf]  ;;  %v7961_v63 = vld [vmem:[#allocation6 + $0x124] sm:$0xf]  ;;  %v7107_v41 = vor.u32 %v7976_v40, %v7106_v7  ;;  %v7100_v55 = vld [vmem:[#allocation6 + $0x188] sm:$0xf0]  ;;  %v7211_v37 = vor.u32 %v7938_v17, %v7210_v54  ;;  %v7215_v50 = vor.u32 %v7937_v48, %v7212_v51 }
 0x790   : > { %v9410_v2 = vsel %vm4107_vm0, %v4100_v39, 0  ;;  %v7122_v39 = vld [vmem:[#allocation6 + $0x1b0] sm:$0xf]  ;;  %v7051_v32 = vor.u32 %v7962_v60, %v7050_v11  ;;  %v7955_v47 = vld [vmem:[#allocation6 + $0xf4] sm:$0xf] }
 0x791   : > { %v4097_v12 = vmul.f32 0.2, %v4093_v20  ;;  %4121 = vmatpush.bf16.msra.mxu0 %v9410_v2  ;;  %4186 = vmatpush.bf16.msra.mxu2 %v9410_v2  ;;  %vm4095_vm2 = vcmp.ge.f32.partialorder %v4093_v20, 0.0  ;;  %v7284_v49 = vld [vmem:[#allocation6 + $0xf8] sm:$0xf0] }
 0x792   : > { %v4082_v29 = vpop.f32.mrf.mxu3  ;;  %v7202_v56 = vld [vmem:[#allocation6 + $0x50] sm:$0xf]  ;;  %v7935_v11 = vld [vmem:[#allocation6 + $0x54] sm:$0xf]  ;;  %v7204_v60 = vld [vmem:[#allocation6 + $0x58] sm:$0xf0] }
 0x793   : > { %v4099_v18 = vsel %vm4095_vm2, %v4093_v20, %v4097_v12  ;;  %v7055_v20 = vor.u32 %v7961_v63, %v7052_v30  ;;  %v7978_v12 = vld [vmem:[#allocation6 + $0x1a4] sm:$0xf0]  ;;  %v7116_v29 = vld [vmem:[#allocation6 + $0x1a8] sm:$0xf0]  ;;  %v7274_v63 = vld [vmem:[#allocation6 + $0xe0] sm:$0xf] }
 0x794   : > { %7030 = vmatmul.msk.bf16.vlgmr.msra.gmra.mxu2 %vm4103_vm1, %v7029_v0  ;;  %v4101_v31 = vpack.c.bf16 %v4099_v18, %v4099_v18  ;;  %7027 = vmatmul.msk.bf16.vlgmr.msra.gmra.mxu0 %vm4103_vm1, %v4102_v1  ;;  %v7034_v18 = vld [vmem:[#allocation6 + $0x100] sm:$0xf]  ;;  %v7954_v30 = vld [vmem:[#allocation6 + $0xe4] sm:$0xf0]  ;;  %v7947_v54 = vld [vmem:[#allocation6 + $0xb4] sm:$0xf] }
 0x795   : > { %4400 = vmatpush.bf16.msrb.mxu0 %v7091_v22  ;;  %4426 = vmatpush.bf16.msrb.mxu2 %v7095_v24  ;;  %v7980_v22 = vld [vmem:[#allocation6 + $0x1b4] sm:$0xf0]  ;;  %v7979_v24 = vld [vmem:[#allocation6 + $0x1b4] sm:$0xf]  ;;  %v7035_v45 = vor.u32 %v7958_v26, %v7034_v18  ;;  %v7188_v26 = vld [vmem:[#allocation6 + $0x38] sm:$0xf0] }
 0x796   : > { %v9417_v27 = vsel %vm4107_vm0, %v4101_v31, 0  ;;  %v7123_v43 = vor.u32 %v7980_v22, %v7122_v39  ;;  %v7127_v6 = vor.u32 %v7979_v24, %v7124_v10  ;;  %v7115_v31 = vor.u32 %v7978_v12, %v7114_v52  ;;  %v7953_v39 = vld [vmem:[#allocation6 + $0xe4] sm:$0xf]  ;;  %v7276_v22 = vld [vmem:[#allocation6 + $0xe8] sm:$0xf0] }
 0x797   : > { %4134 = vmatpush.bf16.msra.mxu1 %v9417_v27  ;;  %4199 = vmatpush.bf16.msra.mxu3 %v9417_v27  ;;  %v7207_v10 = vor.u32 %v7935_v11, %v7204_v60  ;;  %v7951_v52 = vld [vmem:[#allocation6 + $0xd4] sm:$0xf]  ;;  %v7268_v12 = vld [vmem:[#allocation6 + $0xd8] sm:$0xf0]  ;;  %v7178_v7 = vld [vmem:[#allocation6 + $0x20] sm:$0xf] }
 0x798   : > { %v7931_v18 = vld [vmem:[#allocation6 + $0x34] sm:$0xf]  ;;  %v7930_v40 = vld [vmem:[#allocation6 + $0x24] sm:$0xf0]  ;;  %v7252_v17 = vld [vmem:[#allocation6 + $0xb8] sm:$0xf0] }
 0x799   : > { %4401 = vmatpush.bf16.msrb.mxu0 %v7083_v14  ;;  %4427 = vmatpush.bf16.msrb.mxu2 %v7087_v15  ;;  %v7047_v15 = vor.u32 %v7959_v8, %v7044_v4  ;;  %v7266_v8 = vld [vmem:[#allocation6 + $0xd0] sm:$0xf]  ;;  %v7952_v4 = vld [vmem:[#allocation6 + $0xd4] sm:$0xf0]  ;;  %v7179_v48 = vor.u32 %v7930_v40, %v7178_v7  ;;  %v7925_v11 = vld [vmem:[#allocation6 + $0x4] sm:$0xf] }
 0x79a   : > { %7031 = vmatmul.msk.bf16.vlgmr.msra.gmra.mxu3 %vm4103_vm1, %v7029_v0  ;;  %7028 = vmatmul.msk.bf16.vlgmr.msra.gmra.mxu1 %vm4103_vm1, %v4102_v1  ;;  %v7042_v0 = vld [vmem:[#allocation6 + $0x110] sm:$0xf]  ;;  %v7960_v1 = vld [vmem:[#allocation6 + $0x114] sm:$0xf0]  ;;  %v7405_v7 = vld [vmem:[#allocation6 + $0x2e0] sm:$0xf] }
 0x79b   : > { %4413 = vmatpush.bf16.msrb.mxu1 %v7155_v34  ;;  %4439 = vmatpush.bf16.msrb.mxu3 %v7159_v9  ;;  %v7043_v14 = vor.u32 %v7960_v1, %v7042_v0  ;;  %v7119_v34 = vor.u32 %v7977_v13, %v7116_v29  ;;  %v7036_v9 = vld [vmem:[#allocation6 + $0x108] sm:$0xf0]  ;;  %v7933_v0 = vld [vmem:[#allocation6 + $0x44] sm:$0xf]  ;;  %v7928_v51 = vld [vmem:[#allocation6 + $0x14] sm:$0xf0] }
 0x79c   : > { %v7039_v59 = vor.u32 %v7957_v21, %v7036_v9  ;;  %v7196_v1 = vld [vmem:[#allocation6 + $0x48] sm:$0xf0]  ;;  %v7267_v21 = vor.u32 %v7952_v4, %v7266_v8  ;;  %v7950_v9 = vld [vmem:[#allocation6 + $0xc4] sm:$0xf0]  ;;  %v7349_v4 = vld [vmem:[#allocation6 + $0x270] sm:$0xf] }
 0x79d   : > { %4402 = vmatpush.bf16.msrb.mxu0 %v7075_v42  ;;  %4428 = vmatpush.bf16.msrb.mxu2 %v7079_v16  ;;  %v7975_v42 = vld [vmem:[#allocation6 + $0x194] sm:$0xf]  ;;  %v7108_v16 = vld [vmem:[#allocation6 + $0x198] sm:$0xf0]  ;;  %v7199_v29 = vor.u32 %v7933_v0, %v7196_v1  ;;  %v7941_v0 = vld [vmem:[#allocation6 + $0x84] sm:$0xf] }
 0x79e   : > { %v7111_v46 = vor.u32 %v7975_v42, %v7108_v16  ;;  %v7929_v42 = vld [vmem:[#allocation6 + $0x24] sm:$0xf]  ;;  %v7180_v16 = vld [vmem:[#allocation6 + $0x28] sm:$0xf0]  ;;  %v8018_v40 = vld [vmem:[#allocation6 + $0x2e4] sm:$0xf0] }
 0x79f   : > { %4414 = vmatpush.bf16.msrb.mxu1 %v7147_v36  ;;  %4440 = vmatpush.bf16.msrb.mxu3 %v7151_v19  ;;  %v7219_v36 = vor.u32 %v7940_v38, %v7218_v25  ;;  %v7223_v19 = vor.u32 %v7939_v53, %v7220_v3  ;;  %v7949_v25 = vld [vmem:[#allocation6 + $0xc4] sm:$0xf]  ;;  %v7260_v38 = vld [vmem:[#allocation6 + $0xc8] sm:$0xf0]  ;;  %v7191_v3 = vor.u32 %v7931_v18, %v7188_v26  ;;  %v8002_v18 = vld [vmem:[#allocation6 + $0x264] sm:$0xf0] }
 0x7a1   : > { %4403 = vmatpush.bf16.msrb.mxu0 %v7067_v28  ;;  %4429 = vmatpush.bf16.msrb.mxu2 %v7071_v23  ;;  %v7098_v28 = vld [vmem:[#allocation6 + $0x180] sm:$0xf]  ;;  %v7974_v23 = vld [vmem:[#allocation6 + $0x184] sm:$0xf0] }
 0x7a2   : > { %v7099_v33 = vor.u32 %v7974_v23, %v7098_v28  ;;  %v7927_v28 = vld [vmem:[#allocation6 + $0x14] sm:$0xf]  ;;  %v7172_v23 = vld [vmem:[#allocation6 + $0x18] sm:$0xf0] }
 0x7a3   : > { %4415 = vmatpush.bf16.msrb.mxu1 %v7139_v44  ;;  %4441 = vmatpush.bf16.msrb.mxu3 %v7143_v58  ;;  %v7282_v44 = vld [vmem:[#allocation6 + $0xf0] sm:$0xf]  ;;  %v7956_v58 = vld [vmem:[#allocation6 + $0xf4] sm:$0xf0] }
 0x7a5   : > { %4404 = vmatpush.bf16.msrb.mxu0 %v7059_v62  ;;  %4430 = vmatpush.bf16.msrb.mxu2 %v7063_v57  ;;  %v7103_v62 = vor.u32 %v7973_v5, %v7100_v55  ;;  %v7936_v57 = vld [vmem:[#allocation6 + $0x54] sm:$0xf0]  ;;  %v7255_v55 = vor.u32 %v7947_v54, %v7252_v17  ;;  %v7397_v54 = vld [vmem:[#allocation6 + $0x2d0] sm:$0xf] }
 0x7a6   : > { %v7203_v24 = vor.u32 %v7936_v57, %v7202_v56  ;;  %v7244_v56 = vld [vmem:[#allocation6 + $0xa8] sm:$0xf0]  ;;  %v7926_v57 = vld [vmem:[#allocation6 + $0x4] sm:$0xf0]  ;;  %v8016_v17 = vld [vmem:[#allocation6 + $0x2d4] sm:$0xf0] }
 0x7a7   : > { %4416 = vmatpush.bf16.msrb.mxu1 %v7131_v35  ;;  %4442 = vmatpush.bf16.msrb.mxu3 %v7135_v61  ;;  %v7283_v35 = vor.u32 %v7956_v58, %v7282_v44  ;;  %v7287_v61 = vor.u32 %v7955_v47, %v7284_v49  ;;  %v7175_v58 = vor.u32 %v7927_v28, %v7172_v23  ;;  %v7242_v47 = vld [vmem:[#allocation6 + $0xa0] sm:$0xf]  ;;  %v7946_v49 = vld [vmem:[#allocation6 + $0xa4] sm:$0xf0] }
 0x7a8   : > { %v7389_v23 = vld [vmem:[#allocation6 + $0x2c0] sm:$0xf] }
 0x7a9   : > { %4405 = vmatpush.bf16.msrb.mxu0 %v7051_v32  ;;  %4431 = vmatpush.bf16.msrb.mxu2 %v7055_v20  ;;  %v7194_v32 = vld [vmem:[#allocation6 + $0x40] sm:$0xf]  ;;  %v7934_v20 = vld [vmem:[#allocation6 + $0x44] sm:$0xf0] }
 0x7aa   : > { %v7195_v13 = vor.u32 %v7934_v20, %v7194_v32  ;;  %v7226_v32 = vld [vmem:[#allocation6 + $0x80] sm:$0xf]  ;;  %v7942_v20 = vld [vmem:[#allocation6 + $0x84] sm:$0xf0] }
 0x7ab   : > { %4417 = vmatpush.bf16.msrb.mxu1 %v7123_v43  ;;  %4443 = vmatpush.bf16.msrb.mxu3 %v7127_v6  ;;  %v7275_v43 = vor.u32 %v7954_v30, %v7274_v63  ;;  %v7279_v6 = vor.u32 %v7953_v39, %v7276_v22  ;;  %v7234_v63 = vld [vmem:[#allocation6 + $0x90] sm:$0xf]  ;;  %v7944_v30 = vld [vmem:[#allocation6 + $0x94] sm:$0xf0]  ;;  %v7943_v39 = vld [vmem:[#allocation6 + $0x94] sm:$0xf]  ;;  %v7227_v1 = vor.u32 %v7942_v20, %v7226_v32 }
 0x7ac   : > { %v7235_v22 = vor.u32 %v7944_v30, %v7234_v63  ;;  %v7293_v63 = vld [vmem:[#allocation6 + $0x200] sm:$0xf]  ;;  %v7990_v30 = vld [vmem:[#allocation6 + $0x204] sm:$0xf0] }
 0x7ad   : > { %4406 = vmatpush.bf16.msrb.mxu0 %v7043_v14  ;;  %4432 = vmatpush.bf16.msrb.mxu2 %v7047_v15  ;;  %v7186_v14 = vld [vmem:[#allocation6 + $0x30] sm:$0xf]  ;;  %v7932_v15 = vld [vmem:[#allocation6 + $0x34] sm:$0xf0]  ;;  %v7357_v20 = vld [vmem:[#allocation6 + $0x280] sm:$0xf] }
 0x7ae   : > { %v7187_v53 = vor.u32 %v7932_v15, %v7186_v14  ;;  %v7341_v15 = vld [vmem:[#allocation6 + $0x260] sm:$0xf] }
 0x7af   : > { %4418 = vmatpush.bf16.msrb.mxu1 %v7115_v31  ;;  %4444 = vmatpush.bf16.msrb.mxu3 %v7119_v34  ;;  %v7271_v31 = vor.u32 %v7951_v52, %v7268_v12  ;;  %v7258_v34 = vld [vmem:[#allocation6 + $0xc0] sm:$0xf]  ;;  %v8004_v52 = vld [vmem:[#allocation6 + $0x274] sm:$0xf0] }
 0x7b1   : > { %4407 = vmatpush.bf16.msrb.mxu0 %v7035_v45  ;;  %4433 = vmatpush.bf16.msrb.mxu2 %v7039_v59  ;;  %v7259_v45 = vor.u32 %v7950_v9, %v7258_v34  ;;  %v7263_v59 = vor.u32 %v7949_v25, %v7260_v38  ;;  %v7342_v34 = vor.u32 %v8002_v18, %v7341_v15  ;;  %v7333_v9 = vld [vmem:[#allocation6 + $0x250] sm:$0xf]  ;;  %v8000_v25 = vld [vmem:[#allocation6 + $0x254] sm:$0xf0]  ;;  %v7335_v18 = vld [vmem:[#allocation6 + $0x258] sm:$0xf0] }
 0x7b3   : > { %4419 = vmatpush.bf16.msrb.mxu1 %v7107_v41  ;;  %4445 = vmatpush.bf16.msrb.mxu3 %v7111_v46  ;;  %v7183_v41 = vor.u32 %v7929_v42, %v7180_v16  ;;  %v7170_v46 = vld [vmem:[#allocation6 + $0x10] sm:$0xf]  ;;  %v7334_v42 = vor.u32 %v8000_v25, %v7333_v9  ;;  %v7399_v9 = vld [vmem:[#allocation6 + $0x2d8] sm:$0xf0]  ;;  %v7997_v25 = vld [vmem:[#allocation6 + $0x244] sm:$0xf] }
 0x7b4   : > { %v7171_v44 = vor.u32 %v7928_v51, %v7170_v46  ;;  %v7996_v46 = vld [vmem:[#allocation6 + $0x234] sm:$0xf0]  ;;  %v7398_v51 = vor.u32 %v8016_v17, %v7397_v54  ;;  %v8011_v54 = vld [vmem:[#allocation6 + $0x2b4] sm:$0xf]  ;;  %v7383_v17 = vld [vmem:[#allocation6 + $0x2b8] sm:$0xf0] }
 0x7b5   : > { %4612 = vmatpush.bf16.msra.mxu0 %v7219_v36  ;;  %4638 = vmatpush.bf16.msra.mxu2 %v7223_v19  ;;  %v7250_v36 = vld [vmem:[#allocation6 + $0xb0] sm:$0xf]  ;;  %v7948_v19 = vld [vmem:[#allocation6 + $0xb4] sm:$0xf0] }
 0x7b6   : > { %v7251_v5 = vor.u32 %v7948_v19, %v7250_v36  ;;  %v7998_v36 = vld [vmem:[#allocation6 + $0x244] sm:$0xf0]  ;;  %v7406_v19 = vor.u32 %v8018_v40, %v7405_v7  ;;  %v7995_v7 = vld [vmem:[#allocation6 + $0x234] sm:$0xf]  ;;  %v7319_v40 = vld [vmem:[#allocation6 + $0x238] sm:$0xf0] }
 0x7b7   : > { %4420 = vmatpush.bf16.msrb.mxu1 %v7099_v33  ;;  %4446 = vmatpush.bf16.msrb.mxu3 %v7103_v62  ;;  %v7162_v62 = vld [vmem:[#allocation6] sm:$0xf] }
 0x7b8   : > { %v7163_v60 = vor.u32 %v7926_v57, %v7162_v62  ;;  %v7301_v62 = vld [vmem:[#allocation6 + $0x210] sm:$0xf]  ;;  %v7992_v57 = vld [vmem:[#allocation6 + $0x214] sm:$0xf0] }
 0x7b9   : > { %4613 = vmatpush.bf16.msra.mxu0 %v7211_v37  ;;  %4639 = vmatpush.bf16.msra.mxu2 %v7215_v50  ;;  %v7945_v37 = vld [vmem:[#allocation6 + $0xa4] sm:$0xf]  ;;  %v7243_v50 = vor.u32 %v7946_v49, %v7242_v47  ;;  %v7994_v47 = vld [vmem:[#allocation6 + $0x224] sm:$0xf0] }
 0x7ba   : > { %v7247_v33 = vor.u32 %v7945_v37, %v7244_v56  ;;  %v7381_v37 = vld [vmem:[#allocation6 + $0x2b0] sm:$0xf] }
 0x7bb   : > { %4625 = vmatpush.bf16.msra.mxu1 %v7283_v35  ;;  %4651 = vmatpush.bf16.msra.mxu3 %v7287_v61  ;;  %v7164_v35 = vld [vmem:[#allocation6 + $0x8] sm:$0xf0] }
 0x7bc   : > { %v7167_v61 = vor.u32 %v7925_v11, %v7164_v35  ;;  %v8010_v35 = vld [vmem:[#allocation6 + $0x2a4] sm:$0xf0] }
 0x7bd   : > { %4614 = vmatpush.bf16.msra.mxu0 %v7203_v24  ;;  %4640 = vmatpush.bf16.msra.mxu2 %v7207_v10  ;;  %v7236_v24 = vld [vmem:[#allocation6 + $0x98] sm:$0xf0] }
 0x7be   : > { %v7239_v10 = vor.u32 %v7943_v39, %v7236_v24  ;;  %v8008_v24 = vld [vmem:[#allocation6 + $0x294] sm:$0xf0] }
 0x7bf   : > { %4626 = vmatpush.bf16.msra.mxu1 %v7275_v43  ;;  %4652 = vmatpush.bf16.msra.mxu3 %v7279_v6  ;;  %v7228_v43 = vld [vmem:[#allocation6 + $0x88] sm:$0xf0] }
 0x7c0   : > { %v7231_v6 = vor.u32 %v7941_v0, %v7228_v43  ;;  %v8006_v0 = vld [vmem:[#allocation6 + $0x284] sm:$0xf0] }
 0x7c1   : > { %4615 = vmatpush.bf16.msra.mxu0 %v7195_v13  ;;  %4641 = vmatpush.bf16.msra.mxu2 %v7199_v29  ;;  %v7350_v13 = vor.u32 %v8004_v52, %v7349_v4  ;;  %v7358_v43 = vor.u32 %v8006_v0, %v7357_v20  ;;  %v8001_v52 = vld [vmem:[#allocation6 + $0x264] sm:$0xf] }
 0x7c3   : > { %4627 = vmatpush.bf16.msra.mxu1 %v7267_v21  ;;  %4653 = vmatpush.bf16.msra.mxu3 %v7271_v31  ;;  %v7413_v21 = vld [vmem:[#allocation6 + $0x2f0] sm:$0xf]  ;;  %v8020_v31 = vld [vmem:[#allocation6 + $0x2f4] sm:$0xf0] }
 0x7c5   : > { %4616 = vmatpush.bf16.msra.mxu0 %v7187_v53  ;;  %4642 = vmatpush.bf16.msra.mxu2 %v7191_v3  ;;  %v7414_v53 = vor.u32 %v8020_v31, %v7413_v21  ;;  %v8017_v21 = vld [vmem:[#allocation6 + $0x2e4] sm:$0xf]  ;;  %v7407_v31 = vld [vmem:[#allocation6 + $0x2e8] sm:$0xf0] }
 0x7c7   : > { %4628 = vmatpush.bf16.msra.mxu1 %v7259_v45  ;;  %4654 = vmatpush.bf16.msra.mxu3 %v7263_v59  ;;  %v7325_v59 = vld [vmem:[#allocation6 + $0x240] sm:$0xf] }
 0x7c9   : > { %4617 = vmatpush.bf16.msra.mxu0 %v7179_v48  ;;  %4643 = vmatpush.bf16.msra.mxu2 %v7183_v41  ;;  %v7326_v48 = vor.u32 %v7998_v36, %v7325_v59  ;;  %v7317_v41 = vld [vmem:[#allocation6 + $0x230] sm:$0xf]  ;;  %v7993_v36 = vld [vmem:[#allocation6 + $0x224] sm:$0xf] }
 0x7cb   : > { %4629 = vmatpush.bf16.msra.mxu1 %v7251_v5  ;;  %4655 = vmatpush.bf16.msra.mxu3 %v7255_v55  ;;  %v8014_v5 = vld [vmem:[#allocation6 + $0x2c4] sm:$0xf0] }
 0x7cc   : > { %v7390_v49 = vor.u32 %v8014_v5, %v7389_v23  ;;  %v8009_v23 = vld [vmem:[#allocation6 + $0x2a4] sm:$0xf]  ;;  %v7375_v5 = vld [vmem:[#allocation6 + $0x2a8] sm:$0xf0] }
 0x7cd   : > { %4618 = vmatpush.bf16.msra.mxu0 %v7171_v44  ;;  %4644 = vmatpush.bf16.msra.mxu2 %v7175_v58  ;;  %v7318_v44 = vor.u32 %v7996_v46, %v7317_v41  ;;  %v7309_v58 = vld [vmem:[#allocation6 + $0x220] sm:$0xf]  ;;  %v7386_v41 = vor.u32 %v8011_v54, %v7383_v17  ;;  %v7991_v46 = vld [vmem:[#allocation6 + $0x214] sm:$0xf] }
 0x7ce   : > { %v7310_v56 = vor.u32 %v7994_v47, %v7309_v58  ;;  %v7367_v58 = vld [vmem:[#allocation6 + $0x298] sm:$0xf0]  ;;  %v7989_v47 = vld [vmem:[#allocation6 + $0x204] sm:$0xf] }
 0x7cf   : > { %4630 = vmatpush.bf16.msra.mxu1 %v7243_v50  ;;  %4656 = vmatpush.bf16.msra.mxu3 %v7247_v33  ;;  %v8012_v50 = vld [vmem:[#allocation6 + $0x2b4] sm:$0xf0] }
 0x7d0   : > { %v7382_v11 = vor.u32 %v8012_v50, %v7381_v37  ;;  %v7295_v37 = vld [vmem:[#allocation6 + $0x208] sm:$0xf0] }
 0x7d1   : > { %4619 = vmatpush.bf16.msra.mxu0 %v7163_v60  ;;  %4645 = vmatpush.bf16.msra.mxu2 %v7167_v61  ;;  %v7373_v60 = vld [vmem:[#allocation6 + $0x2a0] sm:$0xf]  ;;  %v7302_v61 = vor.u32 %v7992_v57, %v7301_v62  ;;  %v7359_v62 = vld [vmem:[#allocation6 + $0x288] sm:$0xf0] }
 0x7d2   : > { %v7374_v39 = vor.u32 %v8010_v35, %v7373_v60 }
 0x7d3   : > { %4631 = vmatpush.bf16.msra.mxu1 %v7235_v22  ;;  %4657 = vmatpush.bf16.msra.mxu3 %v7239_v10  ;;  %v7365_v22 = vld [vmem:[#allocation6 + $0x290] sm:$0xf]  ;;  %v7294_v10 = vor.u32 %v7990_v30, %v7293_v63 }
 0x7d4   : > { %v7366_v32 = vor.u32 %v8008_v24, %v7365_v22 }
 0x7d7   : > { %4632 = vmatpush.bf16.msra.mxu1 %v7227_v1  ;;  %4658 = vmatpush.bf16.msra.mxu3 %v7231_v6  ;;  %v7288_v1 = vld [vmem:[%s9469_s10 + $0x4] sm:$0x3]  ;;  %v8003_v6 = vld [vmem:[#allocation6 + $0x274] sm:$0xf] }
 0x811   : > { %v4123_v8 = vpop.f32.mrf.mxu0 }
 0x812   : > { %v4140_v55 = vpack.c.bf16 %v4123_v8, %v4123_v8  ;;  %v7351_v8 = vld [vmem:[#allocation6 + $0x278] sm:$0xf0] }
 0x813   : > { %v7354_v4 = vor.u32 %v8003_v6, %v7351_v8  ;;  %v7480_v8 = vld [vmem:[#allocation6 + $0x370] sm:$0xf] }
 0x817   : > { %v4188_v12 = vpop.f32.mrf.mxu2  ;;  %v4136_v29 = vpop.f32.mrf.mxu1 }
 0x818   : > { %v4205_v14 = vpack.c.bf16 %v4188_v12, %v4188_v12  ;;  %v4141_v33 = vpack.c.bf16 %v4136_v29, %v4136_v29  ;;  %v7343_v12 = vld [vmem:[#allocation6 + $0x268] sm:$0xf0]  ;;  %v7415_v29 = vld [vmem:[#allocation6 + $0x2f8] sm:$0xf0] }
 0x819   : > { %v4125_v26 = vpop.f32.mrf.mxu0 }
 0x81a   : > { %4408 = vmatmul.bf16.vlgmr.msrb.gmra.mxu0 %v4205_v14  ;;  %4434 = vmatmul.bf16.vlgmr.msrb.gmra.mxu2 %v4205_v14  ;;  %v7346_v14 = vor.u32 %v8001_v52, %v7343_v12  ;;  %v7544_v52 = vld [vmem:[#allocation6 + $0x3f0] sm:$0xf] }
 0x81b   : > { %4676 = vmatpush.bf16.msrb.mxu0 %v9410_v2  ;;  %4890 = vmatpush.bf16.msrb.mxu2 %v7350_v13  ;;  %v8019_v13 = vld [vmem:[#allocation6 + $0x2f4] sm:$0xf] }
 0x81c   : > { %v7418_v15 = vor.u32 %v8019_v13, %v7415_v29  ;;  %v8052_v13 = vld [vmem:[#allocation6 + $0x3f4] sm:$0xf0] }
 0x81d   : > { %v4201_v38 = vpop.f32.mrf.mxu3  ;;  %v7545_v29 = vor.u32 %v8052_v13, %v7544_v52  ;;  %v8026_v13 = vld [vmem:[#allocation6 + $0x324] sm:$0xf0] }
 0x81e   : > { %v4206_v3 = vpack.c.bf16 %v4201_v38, %v4201_v38 }
 0x81f   : > { %4891 = vmatpush.bf16.msrb.mxu2 %v7342_v34  ;;  %v4190_v16 = vpop.f32.mrf.mxu2  ;;  %v4138_v45 = vpop.f32.mrf.mxu1  ;;  %v8015_v34 = vld [vmem:[#allocation6 + $0x2d4] sm:$0xf] }
 0x820   : > { %4421 = vmatmul.bf16.vlgmr.msrb.gmra.mxu1 %v4206_v3  ;;  %4447 = vmatmul.bf16.vlgmr.msrb.gmra.mxu3 %v4206_v3  ;;  %v7402_v38 = vor.u32 %v8015_v34, %v7399_v9  ;;  %v8013_v16 = vld [vmem:[#allocation6 + $0x2c4] sm:$0xf]  ;;  %v7391_v45 = vld [vmem:[#allocation6 + $0x2c8] sm:$0xf0] }
 0x821   : > { %4689 = vmatpush.bf16.msrb.mxu1 %v9417_v27  ;;  %4903 = vmatpush.bf16.msrb.mxu3 %v7414_v53  ;;  %v7327_v53 = vld [vmem:[#allocation6 + $0x248] sm:$0xf0]  ;;  %v7394_v59 = vor.u32 %v8013_v16, %v7391_v45  ;;  %v8051_v16 = vld [vmem:[#allocation6 + $0x3f4] sm:$0xf]  ;;  %v7546_v45 = vld [vmem:[#allocation6 + $0x3f8] sm:$0xf0] }
 0x822   : > { %v7330_v3 = vor.u32 %v7997_v25, %v7327_v53  ;;  %v7549_v54 = vor.u32 %v8051_v16, %v7546_v45  ;;  %v8041_v16 = vld [vmem:[#allocation6 + $0x3a4] sm:$0xf] }
 0x823   : > { %4892 = vmatpush.bf16.msrb.mxu2 %v7334_v42  ;;  %v7322_v42 = vor.u32 %v7995_v7, %v7319_v40  ;;  %v8033_v40 = vld [vmem:[#allocation6 + $0x364] sm:$0xf] }
 0x825   : > { %4904 = vmatpush.bf16.msrb.mxu3 %v7406_v19  ;;  %v4203_v28 = vpop.f32.mrf.mxu3  ;;  %v7311_v19 = vld [vmem:[#allocation6 + $0x228] sm:$0xf0] }
 0x827   : > { %4893 = vmatpush.bf16.msrb.mxu2 %v7326_v48  ;;  %v7314_v48 = vor.u32 %v7993_v36, %v7311_v19 }
 0x829   : > { %4905 = vmatpush.bf16.msrb.mxu3 %v7398_v51  ;;  %v7303_v51 = vld [vmem:[#allocation6 + $0x218] sm:$0xf0] }
 0x82a   : > { %4620 = vmatmul.bf16.vlgmr.msra.gmra.mxu0 %v4140_v55  ;;  %4646 = vmatmul.bf16.vlgmr.msra.gmra.mxu2 %v4140_v55  ;;  %v7306_v28 = vor.u32 %v7991_v46, %v7303_v51  ;;  %v7378_v55 = vor.u32 %v8009_v23, %v7375_v5  ;;  %v7419_v23 = vld [vmem:[%s9469_s10 + $0x6] sm:$0x3]  ;;  %v7464_v5 = vld [vmem:[#allocation6 + $0x350] sm:$0xf] }
 0x82b   : > { %4894 = vmatpush.bf16.msrb.mxu2 %v7318_v44  ;;  %4916 = vmatpush.bf16.msra.mxu0 %v7354_v4  ;;  %v8007_v44 = vld [vmem:[#allocation6 + $0x294] sm:$0xf]  ;;  %v8036_v4 = vld [vmem:[#allocation6 + $0x374] sm:$0xf0] }
 0x82c   : > { %v7481_v12 = vor.u32 %v8036_v4, %v7480_v8  ;;  %v7522_v4 = vld [vmem:[#allocation6 + $0x3c8] sm:$0xf0] }
 0x82d   : > { %4906 = vmatpush.bf16.msrb.mxu3 %v7390_v49  ;;  %v7370_v49 = vor.u32 %v8007_v44, %v7367_v58  ;;  %v8031_v44 = vld [vmem:[#allocation6 + $0x354] sm:$0xf] }
 0x82f   : > { %4895 = vmatpush.bf16.msrb.mxu2 %v7310_v56  ;;  %4917 = vmatpush.bf16.msra.mxu0 %v7346_v14  ;;  %v7298_v56 = vor.u32 %v7989_v47, %v7295_v37  ;;  %v7472_v14 = vld [vmem:[#allocation6 + $0x360] sm:$0xf]  ;;  %v7466_v47 = vld [vmem:[#allocation6 + $0x358] sm:$0xf0] }
 0x830   : > { %4633 = vmatmul.bf16.vlgmr.msra.gmra.mxu1 %v4141_v33  ;;  %4659 = vmatmul.bf16.vlgmr.msra.gmra.mxu3 %v4141_v33  ;;  %v8005_v33 = vld [vmem:[#allocation6 + $0x284] sm:$0xf]  ;;  %v7456_v37 = vld [vmem:[#allocation6 + $0x340] sm:$0xf] }
 0x831   : > { %4907 = vmatpush.bf16.msrb.mxu3 %v7382_v11  ;;  %4929 = vmatpush.bf16.msra.mxu1 %v7418_v15  ;;  %v7362_v57 = vor.u32 %v8005_v33, %v7359_v62  ;;  %v7458_v62 = vld [vmem:[#allocation6 + $0x348] sm:$0xf0] }
 0x833   : > { %4896 = vmatpush.bf16.msrb.mxu2 %v7302_v61 }
 0x835   : > { %4908 = vmatpush.bf16.msrb.mxu3 %v7374_v39 }
 0x837   : > { %4897 = vmatpush.bf16.msrb.mxu2 %v7294_v10 }
 0x839   : > { %4909 = vmatpush.bf16.msrb.mxu3 %v7366_v32 }
 0x83a   : > { %7289 = vmatmul.msk.bf16.vlgmr.msrb.gmra.mxu0 %vm4103_vm1, %v7288_v1 }
 0x83b   : > { %4956 = vmatpush.bf16.msra.mxu2 %v9410_v2  ;;  %v7999_v2 = vld [vmem:[#allocation6 + $0x254] sm:$0xf] }
 0x83c   : > { %v7338_v26 = vor.u32 %v7999_v2, %v7335_v18  ;;  %v8034_v2 = vld [vmem:[#allocation6 + $0x364] sm:$0xf0]  ;;  %v7536_v18 = vld [vmem:[#allocation6 + $0x3e0] sm:$0xf] }
 0x83d   : > { %4910 = vmatpush.bf16.msrb.mxu3 %v7358_v43  ;;  %v7473_v34 = vor.u32 %v8034_v2, %v7472_v14  ;;  %v7512_v2 = vld [vmem:[#allocation6 + $0x3b0] sm:$0xf] }
 0x83e   : > { %4918 = vmatpush.bf16.msra.mxu0 %v7338_v26  ;;  %v8050_v26 = vld [vmem:[#allocation6 + $0x3e4] sm:$0xf0] }
 0x83f   : > { %v7537_v9 = vor.u32 %v8050_v26, %v7536_v18  ;;  %v8044_v18 = vld [vmem:[#allocation6 + $0x3b4] sm:$0xf0]  ;;  %v8043_v26 = vld [vmem:[#allocation6 + $0x3b4] sm:$0xf] }
 0x840   : > { %7290 = vmatmul.msk.bf16.vlgmr.msrb.gmra.mxu1 %vm4103_vm1, %v7288_v1 }
 0x841   : > { %4969 = vmatpush.bf16.msra.mxu3 %v9417_v27  ;;  %v7410_v27 = vor.u32 %v8017_v21, %v7407_v31  ;;  %v8035_v31 = vld [vmem:[#allocation6 + $0x374] sm:$0xf] }
 0x842   : > { %4919 = vmatpush.bf16.msra.mxu0 %v7330_v3 }
 0x843   : > { %4930 = vmatpush.bf16.msra.mxu1 %v7410_v27  ;;  %v7482_v27 = vld [vmem:[#allocation6 + $0x378] sm:$0xf0] }
 0x844   : > { %v7485_v3 = vor.u32 %v8035_v31, %v7482_v27  ;;  %v7513_v27 = vor.u32 %v8044_v18, %v7512_v2 }
 0x846   : > { %4920 = vmatpush.bf16.msra.mxu0 %v7322_v42  ;;  %v7474_v42 = vld [vmem:[#allocation6 + $0x368] sm:$0xf0] }
 0x847   : > { %4931 = vmatpush.bf16.msra.mxu1 %v7402_v38  ;;  %v7477_v36 = vor.u32 %v8033_v40, %v7474_v42  ;;  %v7504_v40 = vld [vmem:[#allocation6 + $0x3a0] sm:$0xf]  ;;  %v8042_v42 = vld [vmem:[#allocation6 + $0x3a4] sm:$0xf0] }
 0x84a   : > { %4921 = vmatpush.bf16.msra.mxu0 %v7314_v48  ;;  %v8049_v48 = vld [vmem:[#allocation6 + $0x3e4] sm:$0xf] }
 0x84b   : > { %4932 = vmatpush.bf16.msra.mxu1 %v7394_v59 }
 0x84e   : > { %4922 = vmatpush.bf16.msra.mxu0 %v7306_v28 }
 0x84f   : > { %4933 = vmatpush.bf16.msra.mxu1 %v7386_v41  ;;  %v7538_v41 = vld [vmem:[#allocation6 + $0x3e8] sm:$0xf0] }
 0x850   : > { %v7541_v51 = vor.u32 %v8049_v48, %v7538_v41  ;;  %v8039_v48 = vld [vmem:[#allocation6 + $0x394] sm:$0xf] }
 0x852   : > { %4923 = vmatpush.bf16.msra.mxu0 %v7298_v56  ;;  %v8029_v56 = vld [vmem:[#allocation6 + $0x344] sm:$0xf] }
 0x853   : > { %4934 = vmatpush.bf16.msra.mxu1 %v7378_v55  ;;  %v8032_v55 = vld [vmem:[#allocation6 + $0x354] sm:$0xf0] }
 0x854   : > { %v7465_v58 = vor.u32 %v8032_v55, %v7464_v5  ;;  %v8021_v55 = vld [vmem:[#allocation6 + $0x304] sm:$0xf] }
 0x856   : > { %5170 = vmatpush.bf16.msrb.mxu0 %v7481_v12  ;;  %v7440_v12 = vld [vmem:[#allocation6 + $0x320] sm:$0xf] }
 0x857   : > { %4935 = vmatpush.bf16.msra.mxu1 %v7370_v49  ;;  %v7469_v49 = vor.u32 %v8031_v44, %v7466_v47  ;;  %v7441_v14 = vor.u32 %v8026_v13, %v7440_v12  ;;  %v7426_v44 = vld [vmem:[#allocation6 + $0x308] sm:$0xf0]  ;;  %v7488_v47 = vld [vmem:[#allocation6 + $0x380] sm:$0xf] }
 0x85a   : > { %5171 = vmatpush.bf16.msrb.mxu0 %v7473_v34  ;;  %v7514_v34 = vld [vmem:[#allocation6 + $0x3b8] sm:$0xf0] }
 0x85b   : > { %4936 = vmatpush.bf16.msra.mxu1 %v7362_v57  ;;  %v7528_v57 = vld [vmem:[#allocation6 + $0x3d0] sm:$0xf] }
 0x85e   : > { %5172 = vmatpush.bf16.msrb.mxu0 %v7465_v58  ;;  %v7429_v58 = vor.u32 %v8021_v55, %v7426_v44 }
 0x85f   : > { %5183 = vmatpush.bf16.msrb.mxu1 %v7545_v29  ;;  %v8025_v29 = vld [vmem:[#allocation6 + $0x324] sm:$0xf] }
 0x863   : > { %5184 = vmatpush.bf16.msrb.mxu1 %v7537_v9  ;;  %v7517_v9 = vor.u32 %v8043_v26, %v7514_v34 }
 0x897   : > { %v4409_v50 = vpop.f32.mrf.mxu0 }
 0x89d   : > { %v4422_v11 = vpop.f32.mrf.mxu1  ;;  %v4435_v60 = vpop.f32.mrf.mxu2 }
 0x89e   : > { %v4423_v35 = vadd.f32 %v4422_v11, %v4409_v50  ;;  %v8030_v50 = vld [vmem:[#allocation6 + $0x344] sm:$0xf0]  ;;  %v8048_v11 = vld [vmem:[#allocation6 + $0x3d4] sm:$0xf0] }
 0x89f   : > { %v4411_v61 = vpop.f32.mrf.mxu0  ;;  %v7457_v33 = vor.u32 %v8030_v50, %v7456_v37  ;;  %v8037_v37 = vld [vmem:[#allocation6 + $0x384] sm:$0xf] }
 0x8a0   : > { %v7529_v61 = vor.u32 %v8048_v11, %v7528_v57 }
 0x8a1   : > { %5173 = vmatpush.bf16.msrb.mxu0 %v7457_v33 }
 0x8a2   : > { %5185 = vmatpush.bf16.msrb.mxu1 %v7529_v61 }
 0x8a3   : > { %v4448_v63 = vpop.f32.mrf.mxu3 }
 0x8a4   : > { %v4449_v30 = vadd.f32 %v4448_v63, %v4435_v60  ;;  %v8047_v60 = vld [vmem:[#allocation6 + $0x3d4] sm:$0xf]  ;;  %v7530_v63 = vld [vmem:[#allocation6 + $0x3d8] sm:$0xf0] }
 0x8a5   : > { %v4424_v39 = vpop.f32.mrf.mxu1  ;;  %v4437_v22 = vpop.f32.mrf.mxu2 }
 0x8a6   : > { %v7448_v39 = vld [vmem:[#allocation6 + $0x330] sm:$0xf]  ;;  %v8028_v22 = vld [vmem:[#allocation6 + $0x334] sm:$0xf0] }
 0x8a7   : > { %v4621_v24 = vpop.f32.mrf.mxu0 }
 0x8a8   : > { %v4622_v10 = vadd.f32 %v4621_v24, %v4423_v35  ;;  %v7461_v35 = vor.u32 %v8029_v56, %v7458_v62  ;;  %v8027_v24 = vld [vmem:[#allocation6 + $0x334] sm:$0xf]  ;;  %v7490_v56 = vld [vmem:[#allocation6 + $0x388] sm:$0xf0] }
 0x8a9   : > { %v7493_v33 = vor.u32 %v8037_v37, %v7490_v56 }
 0x8ab   : > { %v4450_v32 = vpop.f32.mrf.mxu3 }
 0x8ac   : > { %v7450_v32 = vld [vmem:[#allocation6 + $0x338] sm:$0xf0] }
 0x8ad   : > { %v4634_v20 = vpop.f32.mrf.mxu1  ;;  %v4647_v0 = vpop.f32.mrf.mxu2 }
 0x8ae   : > { %v9432_v1 = vadd.f32 %v4634_v20, %v4622_v10  ;;  %v4648_v43 = vadd.f32 %v4647_v0, %v4449_v30  ;;  %v7533_v30 = vor.u32 %v8047_v60, %v7530_v63  ;;  %v7449_v10 = vor.u32 %v8028_v22, %v7448_v39  ;;  %v7520_v20 = vld [vmem:[#allocation6 + $0x3c0] sm:$0xf]  ;;  %v8046_v0 = vld [vmem:[#allocation6 + $0x3c4] sm:$0xf0] }
 0x8af   : > { %v4623_v6 = vpop.f32.mrf.mxu0  ;;  %v7521_v8 = vor.u32 %v8046_v0, %v7520_v20 }
 0x8b0   : > { %v7453_v6 = vor.u32 %v8027_v24, %v7450_v32  ;;  %5174 = vmatpush.bf16.msrb.mxu0 %v7449_v10 }
 0x8b1   : > { %5186 = vmatpush.bf16.msrb.mxu1 %v7521_v8 }
 0x8b3   : > { %v4660_v15 = vpop.f32.mrf.mxu3 }
 0x8b4   : > { %v9434_v21 = vadd.f32 %v4660_v15, %v4648_v43  ;;  %v8045_v43 = vld [vmem:[#allocation6 + $0x3c4] sm:$0xf]  ;;  %v7442_v15 = vld [vmem:[#allocation6 + $0x328] sm:$0xf0]  ;;  %5175 = vmatpush.bf16.msrb.mxu0 %v7441_v14 }
 0x8b5   : > { %v4636_v25 = vpop.f32.mrf.mxu1  ;;  %v4649_v38 = vpop.f32.mrf.mxu2  ;;  %v7525_v52 = vor.u32 %v8045_v43, %v7522_v4  ;;  %v7445_v31 = vor.u32 %v8025_v29, %v7442_v15  ;;  %5187 = vmatpush.bf16.msrb.mxu1 %v7513_v27 }
 0x8b6   : > { %v7432_v25 = vld [vmem:[#allocation6 + $0x310] sm:$0xf]  ;;  %v8024_v38 = vld [vmem:[#allocation6 + $0x314] sm:$0xf0] }
 0x8b7   : > { %v4678_v53 = vpop.f32.mrf.mxu0 }
 0x8b8   : > { %v4695_v7 = vpack.c.bf16 %v4678_v53, %v4678_v53  ;;  %v8023_v53 = vld [vmem:[#allocation6 + $0x314] sm:$0xf] }
 0x8ba   : > { %4898 = vmatmul.bf16.vlgmr.msrb.gmra.mxu2 %v4695_v7  ;;  %4924 = vmatmul.bf16.vlgmr.msra.gmra.mxu0 %v4695_v7  ;;  %v7434_v7 = vld [vmem:[#allocation6 + $0x318] sm:$0xf0] }
 0x8bb   : > { %v4662_v59 = vpop.f32.mrf.mxu3  ;;  %5196 = vmatpush.bf16.msrb.mxu2 %v7485_v3  ;;  %v7433_v3 = vor.u32 %v8024_v38, %v7432_v25  ;;  %v7437_v45 = vor.u32 %v8023_v53, %v7434_v7 }
 0x8bc   : > { %v7505_v59 = vor.u32 %v8042_v42, %v7504_v40 }
 0x8bd   : > { %v4691_v19 = vpop.f32.mrf.mxu1  ;;  %5176 = vmatpush.bf16.msrb.mxu0 %v7433_v3 }
 0x8be   : > { %v4696_v17 = vpack.c.bf16 %v4691_v19, %v4691_v19  ;;  %5188 = vmatpush.bf16.msrb.mxu1 %v7505_v59 }
 0x8bf   : > { %v4680_v46 = vpop.f32.mrf.mxu0  ;;  %5197 = vmatpush.bf16.msrb.mxu2 %v7477_v36  ;;  %v7506_v36 = vld [vmem:[#allocation6 + $0x3a8] sm:$0xf0] }
 0x8c0   : > { %4911 = vmatmul.bf16.vlgmr.msrb.gmra.mxu3 %v4696_v17  ;;  %4937 = vmatmul.bf16.vlgmr.msra.gmra.mxu1 %v4696_v17  ;;  %v7509_v19 = vor.u32 %v8041_v16, %v7506_v36  ;;  %v8040_v17 = vld [vmem:[#allocation6 + $0x394] sm:$0xf0]  ;;  %v7498_v46 = vld [vmem:[#allocation6 + $0x398] sm:$0xf0] }
 0x8c1   : > { %5209 = vmatpush.bf16.msrb.mxu3 %v7549_v54  ;;  %v7496_v54 = vld [vmem:[#allocation6 + $0x390] sm:$0xf] }
 0x8c2   : > { %v7497_v41 = vor.u32 %v8040_v17, %v7496_v54 }
 0x8c3   : > { %5198 = vmatpush.bf16.msrb.mxu2 %v7469_v49  ;;  %v8038_v49 = vld [vmem:[#allocation6 + $0x384] sm:$0xf0] }
 0x8c4   : > { %5189 = vmatpush.bf16.msrb.mxu1 %v7497_v41  ;;  %v7489_v50 = vor.u32 %v8038_v49, %v7488_v47 }
 0x8c5   : > { %v4693_v28 = vpop.f32.mrf.mxu1  ;;  %5210 = vmatpush.bf16.msrb.mxu3 %v7541_v51  ;;  %v7424_v51 = vld [vmem:[#allocation6 + $0x300] sm:$0xf] }
 0x8c6   : > { %v8022_v28 = vld [vmem:[#allocation6 + $0x304] sm:$0xf0] }
 0x8c7   : > { %5199 = vmatpush.bf16.msrb.mxu2 %v7461_v35  ;;  %v7425_v5 = vor.u32 %v8022_v28, %v7424_v51 }
 0x8c8   : > { %5190 = vmatpush.bf16.msrb.mxu1 %v7489_v50 }
 0x8c9   : > { %5211 = vmatpush.bf16.msrb.mxu3 %v7533_v30  ;;  %5177 = vmatpush.bf16.msrb.mxu0 %v7425_v5 }
 0x8ca   : > { %7420 = vmatmul.msk.bf16.vlgmr.msra.gmra.mxu2 %vm4103_vm1, %v7419_v23 }
 0x8cb   : > { %5200 = vmatpush.bf16.msrb.mxu2 %v7453_v6 }
 0x8cd   : > { %5212 = vmatpush.bf16.msrb.mxu3 %v7525_v52 }
 0x8cf   : > { %5201 = vmatpush.bf16.msrb.mxu2 %v7445_v31 }
 0x8d0   : > { %7421 = vmatmul.msk.bf16.vlgmr.msra.gmra.mxu3 %vm4103_vm1, %v7419_v23  ;;  %v7501_v23 = vor.u32 %v8039_v48, %v7498_v46 }
 0x8d1   : > { %5213 = vmatpush.bf16.msrb.mxu3 %v7517_v9 }
 0x8d3   : > { %5202 = vmatpush.bf16.msrb.mxu2 %v7437_v45 }
 0x8d5   : > { %5214 = vmatpush.bf16.msrb.mxu3 %v7509_v19 }
 0x8d7   : > { %5203 = vmatpush.bf16.msrb.mxu2 %v7429_v58 }
 0x8d9   : > { %5215 = vmatpush.bf16.msrb.mxu3 %v7501_v23 }
 0x8dd   : > { %5216 = vmatpush.bf16.msrb.mxu3 %v7493_v33 }
 0x937   : > { %v4925_v62 = vpop.f32.mrf.mxu0 }
 0x93d   : > { %v4938_v57 = vpop.f32.mrf.mxu1  ;;  %v4899_v11 = vpop.f32.mrf.mxu2 }
 0x93e   : > { %v4939_v60 = vadd.f32 %v4938_v57, %v4925_v62 }
 0x93f   : > { %v4927_v35 = vpop.f32.mrf.mxu0 }
 0x940   : > { %v4943_v61 = vadd.f32 %v4939_v60, %v9434_v21  ;;  %v5241_v21 = vld [vmem:[%s9472_s13] sm:$0xff] }
 0x941   : > { %5243 = vst [vmem:[#allocation1] ss:$2 sm:$0xff] %v5241_v21 }
 0x943   : > { %v4912_v63 = vpop.f32.mrf.mxu3 }
 0x944   : > { %v4913_v30 = vadd.f32 %v4912_v63, %v4899_v11 }
 0x945   : > { %v4901_v39 = vpop.f32.mrf.mxu2  ;;  %v4940_v22 = vpop.f32.mrf.mxu1 }
 0x946   : > { %v4942_v24 = vadd.f32 %v4913_v30, %v9432_v1  ;;  %v5224_v1 = vld [vmem:[%s9471_s12] sm:$0x3] }
 0x947   : > { %v5226_v15 = vperm.slane %v5224_v1, 0  ;;  %v5227_v31 = vperm.slane %v5224_v1, 1 }
 0x948   : > { %v5244_v16 = vld.sshfl [vmem:[#allocation1] sm:$0xff pattern:$0x75316420]  ;;  %v5245_v45 = vld.sshfl [vmem:[#allocation1 + $0x8] sm:$0xff pattern:$0x75316420] }
 0x94b   : > { %v4914_v10 = vpop.f32.mrf.mxu3 }
 0x94d   : > { %v4958_v32 = vpop.f32.mrf.mxu2 }
 0x94e   : > { %v4975_v20 = vpack.c.bf16 %v4958_v32, %v4958_v32 }
 0x950   : > { %5178 = vmatmul.bf16.vlgmr.msrb.gmra.mxu0 %v4975_v20  ;;  %5204 = vmatmul.bf16.vlgmr.msrb.gmra.mxu2 %v4975_v20 }
 0x953   : > { %v4971_v0 = vpop.f32.mrf.mxu3 }
 0x954   : > { %v4976_v43 = vpack.c.bf16 %v4971_v0, %v4971_v0 }
 0x955   : > { %v4960_v6 = vpop.f32.mrf.mxu2 }
 0x956   : > { %5191 = vmatmul.bf16.vlgmr.msrb.gmra.mxu1 %v4976_v43  ;;  %5217 = vmatmul.bf16.vlgmr.msrb.gmra.mxu3 %v4976_v43 }
 0x95b   : > { %v4973_v8 = vpop.f32.mrf.mxu3 }
 0x9cd   : > { %v5179_v4 = vpop.f32.mrf.mxu0 }
 0x9d3   : > { %v5192_v52 = vpop.f32.mrf.mxu1  ;;  %v5205_v12 = vpop.f32.mrf.mxu2 }
 0x9d4   : > { %v5193_v13 = vadd.f32 %v5192_v52, %v5179_v4 }
 0x9d5   : > { %v5181_v29 = vpop.f32.mrf.mxu0 }
 0x9d6   : > { %v5222_v14 = vadd.f32 %v5193_v13, %v4942_v24 }
 0x9d8   : > { %v5230_v18 = vadd.f32 %v5226_v15, %v5222_v14 }
 0x9d9   : > { %v5218_v2 = vpop.f32.mrf.mxu3 }
 0x9da   : > { %v5219_v26 = vadd.f32 %v5218_v2, %v5205_v12  ;;  %v5234_v25 = vmul.f32 0.2, %v5230_v18  ;;  %vm5232_vm3 = vcmp.ge.f32.partialorder %v5230_v18, 0.0 }
 0x9db   : > { %v5194_v27 = vpop.f32.mrf.mxu1  ;;  %v5207_v34 = vpop.f32.mrf.mxu2 }
 0x9dc   : > { %v5223_v9 = vadd.f32 %v5219_v26, %v4943_v61  ;;  %v5236_v7 = vsel %vm5232_vm3, %v5230_v18, %v5234_v25 }
 0x9de   : > { %v5231_v38 = vadd.f32 %v5227_v31, %v5223_v9 }
 0x9e0   : > { %vm5233_vm4 = vcmp.ge.f32.partialorder %v5231_v38, 0.0  ;;  %v5235_v53 = vmul.f32 0.2, %v5231_v38 }
 0x9e1   : > { %v5220_v3 = vpop.f32.mrf.mxu3 }
 0x9e2   : > { %v5237_v40 = vsel %vm5233_vm4, %v5231_v38, %v5235_v53 }
 0x9e3   : > { %v5238_v42 = vpack.c.bf16 %v5237_v40, %v5236_v7 }
 0x9e5   : > { %v5239_v59 = vunpack.c.l.bf16 %v5238_v42  ;;  %v5240_v36 = vunpack.c.h.bf16 %v5238_v42 }
 0x9e7   : > { %v5248_v19 = vmul.f32 %v5244_v16, %v5239_v59  ;;  %v5249_v54 = vmul.f32 %v5245_v45, %v5240_v36 }
 0x9e9   : > { %v5250_v17 = vsel %vm4107_vm0, %v5248_v19, 0.0  ;;  %v5251_v48 = vsel %vm4107_vm0, %v5249_v54, 0.0 }
 0x9ea   : > { %v5252_v41 = vadd.f32 %v5251_v48, %v5250_v17 }
 0x9ec   : > { %5253 = vadd.xlane.f32.xlu0 %v5252_v41 }
 0xa5f   : > { %v5254_v46 = vpop.xlane.xlu0 %5253 }
 0xa60   : > { %v5255_v51 = vsel %vm4107_vm0, %v5254_v46, 0.0 }
 0xa61   : > { %v5256_v28 = vrot.slane %v5255_v51, 4 }
 0xa63   : > { %v5257_v23 = vadd.f32 %v5256_v28, %v5255_v51 }
 0xa65   : > { %v5258_v5 = vrot.slane %v5257_v23, 2 }
 0xa67   : > { %v5259_v55 = vadd.f32 %v5258_v5, %v5257_v23 }
 0xa69   : > { %v5260_v44 = vrot.slane %v5259_v55, 1 }
 0xa6b   : > { %v5261_v58 = vadd.f32 %v5260_v44, %v5259_v55 }
 0xa6d   : > { %v5262_v47 = vsub.f32 0.0, %v5261_v58 }
 0xa6f   : > { %v5263_v49 = vmul.f32 1.442695, %v5262_v47 }
 0xa71   : > { %8094 = vpow2.f32 %v5263_v49 }
 0xa77   : > { %v8095_v37 = vpop.eup %8094 }
 0xa78   : > { %v5265_v50 = vadd.f32 1.0, %v8095_v37 }
 0xa7a   : > { %8096 = vrcp.f32 %v5265_v50  ;;  %v5277_v57 = vand.u32 2147483648, %v5265_v50  ;;  %v5275_v60 = vand.u32 2147483647, %v5265_v50  ;;  %vm5271_vm6 = vweird.f32 %v5265_v50 }
 0xa7c   : > { %v5278_v61 = vor.u32 1.1754944e-38, %v5277_v57  ;;  %vm5276_vm9 = vcmp.eq.f32.partialorder %v5275_v60, 8.507059e+37 }
 0xa80   : > { %v8097_v56 = vpop.eup %8096 }
 0xa81   : > { %v5267_v33 = vmul.f32 %v8097_v56, %v5265_v50  ;;  %vm5272_vm5 = vweird.f32 %v8097_v56 }
 0xa82   : > { %vm5273_vm7 = vmor %vm5271_vm6, %vm5272_vm5 }
 0xa83   : > { %v5268_v62 = vsub.f32 1.0, %v5267_v33 }
 0xa85   : > { %v5269_v11 = vmul.f32 %v8097_v56, %v5268_v62 }
 0xa87   : > { %v5270_v35 = vadd.f32 %v8097_v56, %v5269_v11 }
 0xa89   : > { %v5274_v63 = vsel %vm5273_vm7, %v8097_v56, %v5270_v35 }
 0xa8a   : > { %v5279_v30 = vsel %vm5276_vm9, %v5278_v61, %v5274_v63 }
 0xa8b   : > { %5282 = vst.msk [vmem:[%s513_s27] sm:$0x1] %vm5281_vm8, %v5279_v30 }
 0xa8c PF: > { %s26_s29 = sadd.s32 1, %s8202_s29  }
 0xa8d   : > { %p23_p7 = scmp.ge.s32.totalorder %s26_s29, 4  }
 0xa8f   :  { %25 = sbr.rel (!%p23_p7) target bundleno = 2 (0x2), region = 143 }
 0xa94   :  { %5300 = vsyncpa [#allocation3], 1 }
 0xa95   :  { %5302 = vsyncpa [#allocation3 + $0x1], 1 }
 0xa96   :  { %5303 = vsyncpa [#allocation5], 1 }

</bundles_post_ra>
